<compile_context>
chip_gen: v5e
topology: v5e:2x2
jax: 0.10.0
libtpu: 0.0.40
codegen_flags: <defaults>
</compile_context>

<pallas_src>
import jax
import jax.numpy as jnp
from jax import lax
from jax.experimental import pallas as pl
from jax.experimental.pallas import tpu as pltpu


def _make_divisible(value, divisor, min_value=None):
    if min_value is None:
        min_value = divisor
    new_value = max(min_value, int(value + divisor / 2) // divisor * divisor)
    if new_value < 0.9 * value:
        new_value += divisor
    return new_value


# ---------------------------------------------------------------------------
# Pallas kernel + wrapper
# ---------------------------------------------------------------------------
def mbconv_pallas(x_nhwc, pk):
    """Fused MBConv forward.  x_nhwc: (B, H, W, Cin).  Returns (B, H, W, Cout) bf16."""
    B, H, W, Cin = x_nhwc.shape
    hidden = pk['w_dw_tiled'].shape[1] // W
    Cout = pk['w_proj_big'].shape[1] // W
    Hp = H + 2
    WCin, WCout = W * Cin, W * Cout
    WHid, WpHid = W * hidden, (W + 2) * hidden

    # Lane-dense packed layout (B, H, W*C); the reshape is a free contiguous view.
    x_packed = x_nhwc.reshape(B, H, WCin).astype(jnp.bfloat16)

    def kernel(x_ref, w_exp_ref, s1_ref, b1_ref, w_dw_ref, s2_ref, b2_ref,
               pool_ref, se_w1_ref, se_b1_ref, se_w2_ref, se_b2_ref, bcast_ref,
               w_proj_ref, s3_ref, b3_ref, o_ref, hpad_ref):
        x = x_ref[...]                                           # (H, W*Cin) bf16

        # -- 1x1 expand (block-diag weight also emits the zero column halo) + BN + SiLU
        h = jnp.dot(x, w_exp_ref[...], preferred_element_type=jnp.float32)
        h = jax.nn.silu(h * s1_ref[...] + b1_ref[...])           # (H, Wp*hidden); halo cols == 0

        # -- row halo: zero-bordered VMEM scratch, fully rewritten every step
        zrow = jnp.zeros((1, WpHid), jnp.float32)
        hpad_ref[0:1, :] = zrow
        hpad_ref[Hp - 1:Hp, :] = zrow
        hpad_ref[1:1 + H, :] = h

        # -- depthwise 3x3, stride 1: 9 lane-dense shifted multiply-accumulates
        acc = jnp.zeros((H, WHid), jnp.float32)
        for kh in range(3):
            for kw in range(3):
                win = hpad_ref[kh:kh + H, kw * hidden:kw * hidden + WHid]
                tap = w_dw_ref[kh * 3 + kw:kh * 3 + kw + 1, :]   # (1, W*hidden)
                acc = acc + win * tap
        d = jax.nn.silu(acc * s2_ref[...] + b2_ref[...])         # (H, W*hidden)

        # -- squeeze & excite (global mean pool folded into pool_ref's 1/(H*W))
        colsum = jnp.sum(d, axis=0, keepdims=True)               # (1, W*hidden)
        pooled = jnp.dot(colsum, pool_ref[...], preferred_element_type=jnp.float32)
        y = jax.nn.silu(jnp.dot(pooled, se_w1_ref[...],
                                preferred_element_type=jnp.float32) + se_b1_ref[...])
        y = jax.nn.sigmoid(jnp.dot(y, se_w2_ref[...],
                                   preferred_element_type=jnp.float32) + se_b2_ref[...])
        y_t = jnp.dot(y, bcast_ref[...], preferred_element_type=jnp.float32)  # (1, W*hidden)
        d = d * y_t

        # -- 1x1 project (block-diag) + folded BN + identity residual
        out = jnp.dot(d.astype(jnp.bfloat16), w_proj_ref[...],
                      preferred_element_type=jnp.float32)        # (H, W*Cout)
        out = out * s3_ref[...] + b3_ref[...]
        out = out + x.astype(jnp.float32)       # valid: stride == 1 and Cin == Cout
        o_ref[...] = out.astype(o_ref.dtype)                     # lane-dense (H, 128) store

    weight_arrays = [pk['w_exp_big'], pk['s1_big'], pk['b1_big'], pk['w_dw_tiled'],
                     pk['s2_big'], pk['b2_big'], pk['pool_mat'], pk['se_w1'],
                     pk['se_b1'], pk['se_w2'], pk['se_b2'], pk['bcast_mat'],
                     pk['w_proj_big'], pk['s3_big'], pk['b3_big']]

    def wspec(shape):
        nd = len(shape)
        # Grid-invariant block: fetched once and reused across grid steps.
        return pl.BlockSpec(shape, lambda b, _nd=nd: (0,) * _nd)

    in_specs = ([pl.BlockSpec((None, H, WCin), lambda b: (b, 0, 0))]
                + [wspec(w.shape) for w in weight_arrays])

    out = pl.pallas_call(
        kernel,
        out_shape=jax.ShapeDtypeStruct((B, H, WCout), jnp.bfloat16),
        grid_spec=pltpu.PrefetchScalarGridSpec(
            num_scalar_prefetch=0,
            grid=(B,),
            in_specs=in_specs,
            out_specs=pl.BlockSpec((None, H, WCout), lambda b: (b, 0, 0)),
            scratch_shapes=[pltpu.VMEM((Hp, WpHid), jnp.float32)],
        ),
        compiler_params=pltpu.CompilerParams(
            dimension_semantics=("parallel",),       # shard batch across TCs on v7x
            vmem_limit_bytes=32 * 1024 * 1024,
        ),
    )(x_packed, *weight_arrays)
    return out.reshape(B, H, W, Cout)


# ---------------------------------------------------------------------------
# Parameters: natural (PyTorch-like) params, bf16 rounding, lane packing
# ---------------------------------------------------------------------------
def make_params(key, inp, oup, expand_ratio):
    """Natural MBConv parameters (f32), with BatchNorm pre-folded to scale/bias."""
    hidden = int(round(inp * expand_ratio))
    se_dim = _make_divisible(inp // 4, 8)
    keys = iter(jax.random.split(key, 24))
    eps = 1e-5

    def normal(shape, scale=0.2):
        return (scale * jax.random.normal(next(keys), shape)).astype(jnp.float32)

    def bn_fold(c):
        gamma = 1.0 + 0.1 * jax.random.normal(next(keys), (c,))
        beta = 0.1 * jax.random.normal(next(keys), (c,))
        mean = 0.1 * jax.random.normal(next(keys), (c,))
        var = 1.0 + jax.random.uniform(next(keys), (c,))
        scale = gamma / jnp.sqrt(var + eps)
        bias = beta - mean * scale
        return scale.astype(jnp.float32), bias.astype(jnp.float32)

    p = {}
    p['w_exp'] = normal((inp, hidden))               # Conv2d(inp, hidden, 1) as (Cin, hidden)
    p['s1'], p['b1'] = bn_fold(hidden)
    p['w_dw'] = normal((9, hidden))                  # depthwise 3x3 taps, row = kh*3+kw
    p['s2'], p['b2'] = bn_fold(hidden)
    p['se_w1'] = normal((hidden, se_dim))            # fc1 weight (transposed)
    p['se_b1'] = normal((1, se_dim))
    p['se_w2'] = normal((se_dim, hidden))            # fc2 weight (transposed)
    p['se_b2'] = normal((1, hidden))
    p['w_proj'] = normal((hidden, oup))
    p['s3'], p['b3'] = bn_fold(oup)
    return p


def quantize_params(p):
    """bf16 round-trip on the two big 1x1 weights (stored/consumed as bf16 by the kernel)."""
    q = dict(p)
    for k in ('w_exp', 'w_proj'):
        q[k] = p[k].astype(jnp.bfloat16).astype(jnp.float32)
    return q


def pack_params(p, H, W):
    """Build lane-packed / block-diagonal kernel parameters from natural ones."""
    hidden = p['w_exp'].shape[1]
    eye_w = jnp.eye(W, dtype=jnp.float32)
    eye_h = jnp.eye(hidden, dtype=jnp.float32)

    pk = {}
    # 1x1 expand -> block-diag matmul that also emits the zero column halo.
    w_exp_bd = jnp.kron(eye_w, p['w_exp'])                                 # (W*Cin, W*hidden)
    pk['w_exp_big'] = jnp.pad(w_exp_bd, ((0, 0), (hidden, hidden))).astype(jnp.bfloat16)
    pk['s1_big'] = jnp.pad(jnp.tile(p['s1'], W), (hidden, hidden)).reshape(1, -1)
    pk['b1_big'] = jnp.pad(jnp.tile(p['b1'], W), (hidden, hidden)).reshape(1, -1)
    # Depthwise taps / BN tiled over the packed (w, c) lane axis.
    pk['w_dw_tiled'] = jnp.tile(p['w_dw'], (1, W))                         # (9, W*hidden)
    pk['s2_big'] = jnp.tile(p['s2'], W).reshape(1, -1)
    pk['b2_big'] = jnp.tile(p['b2'], W).reshape(1, -1)
    # SE: mean-pool / broadcast expressed as tiny structural matmuls (no lane reshapes).
    pk['pool_mat'] = jnp.tile(eye_h, (W, 1)) / float(H * W)                # (W*hidden, hidden)
    pk['bcast_mat'] = jnp.tile(eye_h, (1, W))                              # (hidden, W*hidden)
    pk['se_w1'], pk['se_b1'] = p['se_w1'], p['se_b1']
    pk['se_w2'], pk['se_b2'] = p['se_w2'], p['se_b2']
    # 1x1 project -> block-diag matmul straight into the packed output layout.
    pk['w_proj_big'] = jnp.kron(eye_w, p['w_proj']).astype(jnp.bfloat16)   # (W*hidden, W*Cout)
    pk['s3_big'] = jnp.tile(p['s3'], W).reshape(1, -1)
    pk['b3_big'] = jnp.tile(p['b3'], W).reshape(1, -1)
    return pk


# ---------------------------------------------------------------------------
# Pure-JAX reference (NHWC, f32, natural params)
# ---------------------------------------------------------------------------
def mbconv_ref(x_nhwc, p):
    x = x_nhwc.astype(jnp.float32)
    B, H, W, Cin = x.shape
    hidden = p['w_exp'].shape[1]
    Cout = p['w_proj'].shape[1]
    dn = ('NHWC', 'HWIO', 'NHWC')

    h = lax.conv_general_dilated(x, p['w_exp'].reshape(1, 1, Cin, hidden),
                                 (1, 1), 'VALID', dimension_numbers=dn)
    h = jax.nn.silu(h * p['s1'] + p['b1'])

    d = lax.conv_general_dilated(h, p['w_dw'].reshape(3, 3, 1, hidden),
                                 (1, 1), ((1, 1), (1, 1)),
                                 dimension_numbers=dn, feature_group_count=hidden)
    d = jax.nn.silu(d * p['s2'] + p['b2'])

    pooled = jnp.mean(d, axis=(1, 2))                    # (B, hidden)
    y = jax.nn.silu(pooled @ p['se_w1'] + p['se_b1'])
    y = jax.nn.sigmoid(y @ p['se_w2'] + p['se_b2'])
    d = d * y[:, None, None, :]

    out = lax.conv_general_dilated(d, p['w_proj'].reshape(1, 1, hidden, Cout),
                                   (1, 1), 'VALID', dimension_numbers=dn)
    out = out * p['s3'] + p['b3']
    return out + x


if __name__ == "__main__":
    # MBConv(inp=8, oup=8, stride=1, expand_ratio=4, use_se=True) -> identity path.
    # W * Cin = 128 so the packed activation layout is exactly lane-dense.
    B, H, W, Cin = 2, 16, 16, 8
    Cout, expand_ratio = Cin, 4

    key = jax.random.PRNGKey(0)
    kx, kp = jax.random.split(key)
    x = jax.random.normal(kx, (B, H, W, Cin), dtype=jnp.float32)
    x = x.astype(jnp.bfloat16).astype(jnp.float32)       # activations stored as bf16

    params = quantize_params(make_params(kp, Cin, Cout, expand_ratio))
    packed = pack_params(params, H, W)

    out = jax.block_until_ready(mbconv_pallas(x, packed))
    ref = jax.block_until_ready(mbconv_ref(x, params))

    assert out.shape == (B, H, W, Cout), out.shape
    err = float(jnp.max(jnp.abs(out.astype(jnp.float32) - ref)))
    assert err < 5e-2, f"max abs err {err}"
    print("KERNEL_OK")
</pallas_src>

<mosaic_0001>
module attributes {stable_mosaic.version = 11 : i64} {
  func.func @kernel(%arg0: i32, %arg1: memref<1x16x128xbf16, #tpu.memory_space<vmem>>, %arg2: memref<128x576xbf16, #tpu.memory_space<vmem>>, %arg3: memref<1x576xf32, #tpu.memory_space<vmem>>, %arg4: memref<1x576xf32, #tpu.memory_space<vmem>>, %arg5: memref<9x512xf32, #tpu.memory_space<vmem>>, %arg6: memref<1x512xf32, #tpu.memory_space<vmem>>, %arg7: memref<1x512xf32, #tpu.memory_space<vmem>>, %arg8: memref<512x32xf32, #tpu.memory_space<vmem>>, %arg9: memref<32x8xf32, #tpu.memory_space<vmem>>, %arg10: memref<1x8xf32, #tpu.memory_space<vmem>>, %arg11: memref<8x32xf32, #tpu.memory_space<vmem>>, %arg12: memref<1x32xf32, #tpu.memory_space<vmem>>, %arg13: memref<32x512xf32, #tpu.memory_space<vmem>>, %arg14: memref<512x128xbf16, #tpu.memory_space<vmem>>, %arg15: memref<1x128xf32, #tpu.memory_space<vmem>>, %arg16: memref<1x128xf32, #tpu.memory_space<vmem>>, %arg17: memref<1x16x128xbf16, #tpu.memory_space<vmem>>, %arg18: memref<18x576xf32, #tpu.memory_space<vmem>>) attributes {dimension_semantics = [#tpu.dimension_semantics<parallel>], iteration_bounds = array<i64: 2>, scalar_prefetch = 0 : i64, scratch_operands = 1 : i64, tpu.core_type = #tpu.core_type<tc>, window_params = [{transform_indices = @transform_0, window_bounds = array<i64: 1, 16, 128>}, {pipeline_mode = #tpu.pipeline_mode<synchronous>, transform_indices = @transform_1, window_bounds = array<i64: 128, 576>}, {pipeline_mode = #tpu.pipeline_mode<synchronous>, transform_indices = @transform_2, window_bounds = array<i64: 1, 576>}, {pipeline_mode = #tpu.pipeline_mode<synchronous>, transform_indices = @transform_3, window_bounds = array<i64: 1, 576>}, {pipeline_mode = #tpu.pipeline_mode<synchronous>, transform_indices = @transform_4, window_bounds = array<i64: 9, 512>}, {pipeline_mode = #tpu.pipeline_mode<synchronous>, transform_indices = @transform_5, window_bounds = array<i64: 1, 512>}, {pipeline_mode = #tpu.pipeline_mode<synchronous>, transform_indices = @transform_6, window_bounds = array<i64: 1, 512>}, {pipeline_mode = #tpu.pipeline_mode<synchronous>, transform_indices = @transform_7, window_bounds = array<i64: 512, 32>}, {pipeline_mode = #tpu.pipeline_mode<synchronous>, transform_indices = @transform_8, window_bounds = array<i64: 32, 8>}, {pipeline_mode = #tpu.pipeline_mode<synchronous>, transform_indices = @transform_9, window_bounds = array<i64: 1, 8>}, {pipeline_mode = #tpu.pipeline_mode<synchronous>, transform_indices = @transform_10, window_bounds = array<i64: 8, 32>}, {pipeline_mode = #tpu.pipeline_mode<synchronous>, transform_indices = @transform_11, window_bounds = array<i64: 1, 32>}, {pipeline_mode = #tpu.pipeline_mode<synchronous>, transform_indices = @transform_12, window_bounds = array<i64: 32, 512>}, {pipeline_mode = #tpu.pipeline_mode<synchronous>, transform_indices = @transform_13, window_bounds = array<i64: 512, 128>}, {pipeline_mode = #tpu.pipeline_mode<synchronous>, transform_indices = @transform_14, window_bounds = array<i64: 1, 128>}, {pipeline_mode = #tpu.pipeline_mode<synchronous>, transform_indices = @transform_15, window_bounds = array<i64: 1, 128>}, {transform_indices = @transform_16, window_bounds = array<i64: 1, 16, 128>}]} {
    %c0 = arith.constant 0 : index
    %c0_0 = arith.constant 0 : index
    %c0_1 = arith.constant 0 : index
    %0 = vector.load %arg1[%c0, %c0_0, %c0_1] : memref<1x16x128xbf16, #tpu.memory_space<vmem>>, vector<1x16x128xbf16>
    %1 = vector.shape_cast %0 : vector<1x16x128xbf16> to vector<16x128xbf16>
    %c0_2 = arith.constant 0 : index
    %c0_3 = arith.constant 0 : index
    %2 = vector.load %arg2[%c0_2, %c0_3] : memref<128x576xbf16, #tpu.memory_space<vmem>>, vector<128x576xbf16>
    %cst = arith.constant dense<0.000000e+00> : vector<16x576xf32>
    %3 = tpu.matmul %1, %2, %cst {dimension_numbers = #tpu.dot_dimension_numbers<[1], [0], [0], [1], [0, 0, 1, 1], [], []>} : vector<16x128xbf16>, vector<128x576xbf16>, vector<16x576xf32> -> vector<16x576xf32>
    %c0_4 = arith.constant 0 : index
    %c0_5 = arith.constant 0 : index
    %4 = vector.load %arg3[%c0_4, %c0_5] : memref<1x576xf32, #tpu.memory_space<vmem>>, vector<1x576xf32>
    %5 = vector.broadcast %4 : vector<1x576xf32> to vector<16x576xf32>
    %6 = arith.mulf %3, %5 : vector<16x576xf32>
    %c0_6 = arith.constant 0 : index
    %c0_7 = arith.constant 0 : index
    %7 = vector.load %arg4[%c0_6, %c0_7] : memref<1x576xf32, #tpu.memory_space<vmem>>, vector<1x576xf32>
    %8 = vector.broadcast %7 : vector<1x576xf32> to vector<16x576xf32>
    %9 = arith.addf %6, %8 : vector<16x576xf32>
    %10 = arith.negf %9 : vector<16x576xf32>
    %11 = math.exp %10 : vector<16x576xf32>
    %cst_8 = arith.constant 1.000000e+00 : f32
    %12 = vector.broadcast %cst_8 : f32 to vector<16x576xf32>
    %13 = arith.addf %12, %11 : vector<16x576xf32>
    %14 = arith.divf %12, %13 : vector<16x576xf32>
    %15 = arith.mulf %9, %14 : vector<16x576xf32>
    %cst_9 = arith.constant 0.000000e+00 : f32
    %16 = vector.broadcast %cst_9 : f32 to vector<1x576xf32>
    %c0_10 = arith.constant 0 : index
    %c0_11 = arith.constant 0 : index
    %17 = vector.load %arg18[%c0_10, %c0_11] : memref<18x576xf32, #tpu.memory_space<vmem>>, vector<1x576xf32>
    tpu.vector_store %arg18[%c0_10, %c0_11], %16 {strides = array<i32>} : memref<18x576xf32, #tpu.memory_space<vmem>>, vector<1x576xf32>,
    %c17 = arith.constant 17 : index
    %c0_12 = arith.constant 0 : index
    %18 = vector.load %arg18[%c17, %c0_12] : memref<18x576xf32, #tpu.memory_space<vmem>>, vector<1x576xf32>
    tpu.vector_store %arg18[%c17, %c0_12], %16 {strides = array<i32>} : memref<18x576xf32, #tpu.memory_space<vmem>>, vector<1x576xf32>,
    %c1 = arith.constant 1 : index
    %c0_13 = arith.constant 0 : index
    %19 = vector.load %arg18[%c1, %c0_13] : memref<18x576xf32, #tpu.memory_space<vmem>>, vector<16x576xf32>
    tpu.vector_store %arg18[%c1, %c0_13], %15 {strides = array<i32>} : memref<18x576xf32, #tpu.memory_space<vmem>>, vector<16x576xf32>,
    %cst_14 = arith.constant 0.000000e+00 : f32
    %20 = vector.broadcast %cst_14 : f32 to vector<16x512xf32>
    %c0_15 = arith.constant 0 : index
    %c0_16 = arith.constant 0 : index
    %21 = vector.load %arg18[%c0_15, %c0_16] : memref<18x576xf32, #tpu.memory_space<vmem>>, vector<16x512xf32>
    %c0_17 = arith.constant 0 : index
    %c0_18 = arith.constant 0 : index
    %22 = vector.load %arg5[%c0_17, %c0_18] : memref<9x512xf32, #tpu.memory_space<vmem>>, vector<1x512xf32>
    %23 = vector.broadcast %22 : vector<1x512xf32> to vector<16x512xf32>
    %24 = arith.mulf %21, %23 : vector<16x512xf32>
    %25 = arith.addf %20, %24 : vector<16x512xf32>
    %c0_19 = arith.constant 0 : index
    %c32 = arith.constant 32 : index
    %26 = vector.load %arg18[%c0_19, %c32] : memref<18x576xf32, #tpu.memory_space<vmem>>, vector<16x512xf32>
    %c1_20 = arith.constant 1 : index
    %c0_21 = arith.constant 0 : index
    %27 = vector.load %arg5[%c1_20, %c0_21] : memref<9x512xf32, #tpu.memory_space<vmem>>, vector<1x512xf32>
    %28 = vector.broadcast %27 : vector<1x512xf32> to vector<16x512xf32>
    %29 = arith.mulf %26, %28 : vector<16x512xf32>
    %30 = arith.addf %25, %29 : vector<16x512xf32>
    %c0_22 = arith.constant 0 : index
    %c64 = arith.constant 64 : index
    %31 = vector.load %arg18[%c0_22, %c64] : memref<18x576xf32, #tpu.memory_space<vmem>>, vector<16x512xf32>
    %c2 = arith.constant 2 : index
    %c0_23 = arith.constant 0 : index
    %32 = vector.load %arg5[%c2, %c0_23] : memref<9x512xf32, #tpu.memory_space<vmem>>, vector<1x512xf32>
    %33 = vector.broadcast %32 : vector<1x512xf32> to vector<16x512xf32>
    %34 = arith.mulf %31, %33 : vector<16x512xf32>
    %35 = arith.addf %30, %34 : vector<16x512xf32>
    %c1_24 = arith.constant 1 : index
    %c0_25 = arith.constant 0 : index
    %36 = vector.load %arg18[%c1_24, %c0_25] : memref<18x576xf32, #tpu.memory_space<vmem>>, vector<16x512xf32>
    %c3 = arith.constant 3 : index
    %c0_26 = arith.constant 0 : index
    %37 = vector.load %arg5[%c3, %c0_26] : memref<9x512xf32, #tpu.memory_space<vmem>>, vector<1x512xf32>
    %38 = vector.broadcast %37 : vector<1x512xf32> to vector<16x512xf32>
    %39 = arith.mulf %36, %38 : vector<16x512xf32>
    %40 = arith.addf %35, %39 : vector<16x512xf32>
    %c1_27 = arith.constant 1 : index
    %c32_28 = arith.constant 32 : index
    %41 = vector.load %arg18[%c1_27, %c32_28] : memref<18x576xf32, #tpu.memory_space<vmem>>, vector<16x512xf32>
    %c4 = arith.constant 4 : index
    %c0_29 = arith.constant 0 : index
    %42 = vector.load %arg5[%c4, %c0_29] : memref<9x512xf32, #tpu.memory_space<vmem>>, vector<1x512xf32>
    %43 = vector.broadcast %42 : vector<1x512xf32> to vector<16x512xf32>
    %44 = arith.mulf %41, %43 : vector<16x512xf32>
    %45 = arith.addf %40, %44 : vector<16x512xf32>
    %c1_30 = arith.constant 1 : index
    %c64_31 = arith.constant 64 : index
    %46 = vector.load %arg18[%c1_30, %c64_31] : memref<18x576xf32, #tpu.memory_space<vmem>>, vector<16x512xf32>
    %c5 = arith.constant 5 : index
    %c0_32 = arith.constant 0 : index
    %47 = vector.load %arg5[%c5, %c0_32] : memref<9x512xf32, #tpu.memory_space<vmem>>, vector<1x512xf32>
    %48 = vector.broadcast %47 : vector<1x512xf32> to vector<16x512xf32>
    %49 = arith.mulf %46, %48 : vector<16x512xf32>
    %50 = arith.addf %45, %49 : vector<16x512xf32>
    %c2_33 = arith.constant 2 : index
    %c0_34 = arith.constant 0 : index
    %51 = vector.load %arg18[%c2_33, %c0_34] : memref<18x576xf32, #tpu.memory_space<vmem>>, vector<16x512xf32>
    %c6 = arith.constant 6 : index
    %c0_35 = arith.constant 0 : index
    %52 = vector.load %arg5[%c6, %c0_35] : memref<9x512xf32, #tpu.memory_space<vmem>>, vector<1x512xf32>
    %53 = vector.broadcast %52 : vector<1x512xf32> to vector<16x512xf32>
    %54 = arith.mulf %51, %53 : vector<16x512xf32>
    %55 = arith.addf %50, %54 : vector<16x512xf32>
    %c2_36 = arith.constant 2 : index
    %c32_37 = arith.constant 32 : index
    %56 = vector.load %arg18[%c2_36, %c32_37] : memref<18x576xf32, #tpu.memory_space<vmem>>, vector<16x512xf32>
    %c7 = arith.constant 7 : index
    %c0_38 = arith.constant 0 : index
    %57 = vector.load %arg5[%c7, %c0_38] : memref<9x512xf32, #tpu.memory_space<vmem>>, vector<1x512xf32>
    %58 = vector.broadcast %57 : vector<1x512xf32> to vector<16x512xf32>
    %59 = arith.mulf %56, %58 : vector<16x512xf32>
    %60 = arith.addf %55, %59 : vector<16x512xf32>
    %c2_39 = arith.constant 2 : index
    %c64_40 = arith.constant 64 : index
    %61 = vector.load %arg18[%c2_39, %c64_40] : memref<18x576xf32, #tpu.memory_space<vmem>>, vector<16x512xf32>
    %c8 = arith.constant 8 : index
    %c0_41 = arith.constant 0 : index
    %62 = vector.load %arg5[%c8, %c0_41] : memref<9x512xf32, #tpu.memory_space<vmem>>, vector<1x512xf32>
    %63 = vector.broadcast %62 : vector<1x512xf32> to vector<16x512xf32>
    %64 = arith.mulf %61, %63 : vector<16x512xf32>
    %65 = arith.addf %60, %64 : vector<16x512xf32>
    %c0_42 = arith.constant 0 : index
    %c0_43 = arith.constant 0 : index
    %66 = vector.load %arg6[%c0_42, %c0_43] : memref<1x512xf32, #tpu.memory_space<vmem>>, vector<1x512xf32>
    %67 = vector.broadcast %66 : vector<1x512xf32> to vector<16x512xf32>
    %68 = arith.mulf %65, %67 : vector<16x512xf32>
    %c0_44 = arith.constant 0 : index
    %c0_45 = arith.constant 0 : index
    %69 = vector.load %arg7[%c0_44, %c0_45] : memref<1x512xf32, #tpu.memory_space<vmem>>, vector<1x512xf32>
    %70 = vector.broadcast %69 : vector<1x512xf32> to vector<16x512xf32>
    %71 = arith.addf %68, %70 : vector<16x512xf32>
    %72 = arith.negf %71 : vector<16x512xf32>
    %73 = math.exp %72 : vector<16x512xf32>
    %cst_46 = arith.constant 1.000000e+00 : f32
    %74 = vector.broadcast %cst_46 : f32 to vector<16x512xf32>
    %75 = arith.addf %74, %73 : vector<16x512xf32>
    %76 = arith.divf %74, %75 : vector<16x512xf32>
    %77 = arith.mulf %71, %76 : vector<16x512xf32>
    %cst_47 = arith.constant dense<0.000000e+00> : vector<512xf32>
    %78 = vector.multi_reduction <add>, %77, %cst_47 [0] : vector<16x512xf32> to vector<512xf32>
    %79 = vector.shape_cast %78 : vector<512xf32> to vector<1x512xf32>
    %c0_48 = arith.constant 0 : index
    %c0_49 = arith.constant 0 : index
    %80 = vector.load %arg8[%c0_48, %c0_49] : memref<512x32xf32, #tpu.memory_space<vmem>>, vector<512x32xf32>
    %cst_50 = arith.constant dense<0.000000e+00> : vector<1x32xf32>
    %81 = tpu.matmul %79, %80, %cst_50 {dimension_numbers = #tpu.dot_dimension_numbers<[1], [0], [0], [1], [0, 0, 1, 1], [], []>} : vector<1x512xf32>, vector<512x32xf32>, vector<1x32xf32> -> vector<1x32xf32>
    %c0_51 = arith.constant 0 : index
    %c0_52 = arith.constant 0 : index
    %82 = vector.load %arg9[%c0_51, %c0_52] : memref<32x8xf32, #tpu.memory_space<vmem>>, vector<32x8xf32>
    %cst_53 = arith.constant dense<0.000000e+00> : vector<1x8xf32>
    %83 = tpu.matmul %81, %82, %cst_53 {dimension_numbers = #tpu.dot_dimension_numbers<[1], [0], [0], [1], [0, 0, 1, 1], [], []>} : vector<1x32xf32>, vector<32x8xf32>, vector<1x8xf32> -> vector<1x8xf32>
    %c0_54 = arith.constant 0 : index
    %c0_55 = arith.constant 0 : index
    %84 = vector.load %arg10[%c0_54, %c0_55] : memref<1x8xf32, #tpu.memory_space<vmem>>, vector<1x8xf32>
    %85 = arith.addf %83, %84 : vector<1x8xf32>
    %86 = arith.negf %85 : vector<1x8xf32>
    %87 = math.exp %86 : vector<1x8xf32>
    %cst_56 = arith.constant 1.000000e+00 : f32
    %88 = vector.broadcast %cst_56 : f32 to vector<1x8xf32>
    %89 = arith.addf %88, %87 : vector<1x8xf32>
    %90 = arith.divf %88, %89 : vector<1x8xf32>
    %91 = arith.mulf %85, %90 : vector<1x8xf32>
    %c0_57 = arith.constant 0 : index
    %c0_58 = arith.constant 0 : index
    %92 = vector.load %arg11[%c0_57, %c0_58] : memref<8x32xf32, #tpu.memory_space<vmem>>, vector<8x32xf32>
    %cst_59 = arith.constant dense<0.000000e+00> : vector<1x32xf32>
    %93 = tpu.matmul %91, %92, %cst_59 {dimension_numbers = #tpu.dot_dimension_numbers<[1], [0], [0], [1], [0, 0, 1, 1], [], []>} : vector<1x8xf32>, vector<8x32xf32>, vector<1x32xf32> -> vector<1x32xf32>
    %c0_60 = arith.constant 0 : index
    %c0_61 = arith.constant 0 : index
    %94 = vector.load %arg12[%c0_60, %c0_61] : memref<1x32xf32, #tpu.memory_space<vmem>>, vector<1x32xf32>
    %95 = arith.addf %93, %94 : vector<1x32xf32>
    %96 = arith.negf %95 : vector<1x32xf32>
    %97 = math.exp %96 : vector<1x32xf32>
    %cst_62 = arith.constant 1.000000e+00 : f32
    %98 = vector.broadcast %cst_62 : f32 to vector<1x32xf32>
    %99 = arith.addf %98, %97 : vector<1x32xf32>
    %100 = arith.divf %98, %99 : vector<1x32xf32>
    %c0_63 = arith.constant 0 : index
    %c0_64 = arith.constant 0 : index
    %101 = vector.load %arg13[%c0_63, %c0_64] : memref<32x512xf32, #tpu.memory_space<vmem>>, vector<32x512xf32>
    %cst_65 = arith.constant dense<0.000000e+00> : vector<1x512xf32>
    %102 = tpu.matmul %100, %101, %cst_65 {dimension_numbers = #tpu.dot_dimension_numbers<[1], [0], [0], [1], [0, 0, 1, 1], [], []>} : vector<1x32xf32>, vector<32x512xf32>, vector<1x512xf32> -> vector<1x512xf32>
    %103 = vector.broadcast %102 : vector<1x512xf32> to vector<16x512xf32>
    %104 = arith.mulf %77, %103 : vector<16x512xf32>
    %105 = arith.truncf %104 : vector<16x512xf32> to vector<16x512xbf16>
    %c0_66 = arith.constant 0 : index
    %c0_67 = arith.constant 0 : index
    %106 = vector.load %arg14[%c0_66, %c0_67] : memref<512x128xbf16, #tpu.memory_space<vmem>>, vector<512x128xbf16>
    %cst_68 = arith.constant dense<0.000000e+00> : vector<16x128xf32>
    %107 = tpu.matmul %105, %106, %cst_68 {dimension_numbers = #tpu.dot_dimension_numbers<[1], [0], [0], [1], [0, 0, 1, 1], [], []>} : vector<16x512xbf16>, vector<512x128xbf16>, vector<16x128xf32> -> vector<16x128xf32>
    %c0_69 = arith.constant 0 : index
    %c0_70 = arith.constant 0 : index
    %108 = vector.load %arg15[%c0_69, %c0_70] : memref<1x128xf32, #tpu.memory_space<vmem>>, vector<1x128xf32>
    %109 = vector.broadcast %108 : vector<1x128xf32> to vector<16x128xf32>
    %110 = arith.mulf %107, %109 : vector<16x128xf32>
    %c0_71 = arith.constant 0 : index
    %c0_72 = arith.constant 0 : index
    %111 = vector.load %arg16[%c0_71, %c0_72] : memref<1x128xf32, #tpu.memory_space<vmem>>, vector<1x128xf32>
    %112 = vector.broadcast %111 : vector<1x128xf32> to vector<16x128xf32>
    %113 = arith.addf %110, %112 : vector<16x128xf32>
    %114 = arith.extf %1 : vector<16x128xbf16> to vector<16x128xf32>
    %115 = arith.addf %113, %114 : vector<16x128xf32>
    %116 = arith.truncf %115 : vector<16x128xf32> to vector<16x128xbf16>
    %c0_73 = arith.constant 0 : index
    %c0_74 = arith.constant 0 : index
    %c0_75 = arith.constant 0 : index
    %117 = vector.load %arg17[%c0_73, %c0_74, %c0_75] : memref<1x16x128xbf16, #tpu.memory_space<vmem>>, vector<1x16x128xbf16>
    %118 = vector.shape_cast %117 : vector<1x16x128xbf16> to vector<16x128xbf16>
    %119 = vector.shape_cast %116 : vector<16x128xbf16> to vector<1x16x128xbf16>
    tpu.vector_store %arg17[%c0_73, %c0_74, %c0_75], %119 {strides = array<i32>} : memref<1x16x128xbf16, #tpu.memory_space<vmem>>, vector<1x16x128xbf16>,
    return
  }
  func.func @transform_0(%arg0: i32) -> (i32, i32, i32) {
    %c0_i32 = arith.constant 0 : i32
    %c0_i32_0 = arith.constant 0 : i32
    %c0_i32_1 = arith.constant 0 : i32
    return %arg0, %c0_i32, %c0_i32_0 : i32, i32, i32
  }
  func.func @transform_1(%arg0: i32) -> (i32, i32) {
    %c0_i32 = arith.constant 0 : i32
    %c0_i32_0 = arith.constant 0 : i32
    %c0_i32_1 = arith.constant 0 : i32
    return %c0_i32, %c0_i32_0 : i32, i32
  }
  func.func @transform_2(%arg0: i32) -> (i32, i32) {
    %c0_i32 = arith.constant 0 : i32
    %c0_i32_0 = arith.constant 0 : i32
    %c0_i32_1 = arith.constant 0 : i32
    return %c0_i32, %c0_i32_0 : i32, i32
  }
  func.func @transform_3(%arg0: i32) -> (i32, i32) {
    %c0_i32 = arith.constant 0 : i32
    %c0_i32_0 = arith.constant 0 : i32
    %c0_i32_1 = arith.constant 0 : i32
    return %c0_i32, %c0_i32_0 : i32, i32
  }
  func.func @transform_4(%arg0: i32) -> (i32, i32) {
    %c0_i32 = arith.constant 0 : i32
    %c0_i32_0 = arith.constant 0 : i32
    %c0_i32_1 = arith.constant 0 : i32
    return %c0_i32, %c0_i32_0 : i32, i32
  }
  func.func @transform_5(%arg0: i32) -> (i32, i32) {
    %c0_i32 = arith.constant 0 : i32
    %c0_i32_0 = arith.constant 0 : i32
    %c0_i32_1 = arith.constant 0 : i32
    return %c0_i32, %c0_i32_0 : i32, i32
  }
  func.func @transform_6(%arg0: i32) -> (i32, i32) {
    %c0_i32 = arith.constant 0 : i32
    %c0_i32_0 = arith.constant 0 : i32
    %c0_i32_1 = arith.constant 0 : i32
    return %c0_i32, %c0_i32_0 : i32, i32
  }
  func.func @transform_7(%arg0: i32) -> (i32, i32) {
    %c0_i32 = arith.constant 0 : i32
    %c0_i32_0 = arith.constant 0 : i32
    %c0_i32_1 = arith.constant 0 : i32
    return %c0_i32, %c0_i32_0 : i32, i32
  }
  func.func @transform_8(%arg0: i32) -> (i32, i32) {
    %c0_i32 = arith.constant 0 : i32
    %c0_i32_0 = arith.constant 0 : i32
    %c0_i32_1 = arith.constant 0 : i32
    return %c0_i32, %c0_i32_0 : i32, i32
  }
  func.func @transform_9(%arg0: i32) -> (i32, i32) {
    %c0_i32 = arith.constant 0 : i32
    %c0_i32_0 = arith.constant 0 : i32
    %c0_i32_1 = arith.constant 0 : i32
    return %c0_i32, %c0_i32_0 : i32, i32
  }
  func.func @transform_10(%arg0: i32) -> (i32, i32) {
    %c0_i32 = arith.constant 0 : i32
    %c0_i32_0 = arith.constant 0 : i32
    %c0_i32_1 = arith.constant 0 : i32
    return %c0_i32, %c0_i32_0 : i32, i32
  }
  func.func @transform_11(%arg0: i32) -> (i32, i32) {
    %c0_i32 = arith.constant 0 : i32
    %c0_i32_0 = arith.constant 0 : i32
    %c0_i32_1 = arith.constant 0 : i32
    return %c0_i32, %c0_i32_0 : i32, i32
  }
  func.func @transform_12(%arg0: i32) -> (i32, i32) {
    %c0_i32 = arith.constant 0 : i32
    %c0_i32_0 = arith.constant 0 : i32
    %c0_i32_1 = arith.constant 0 : i32
    return %c0_i32, %c0_i32_0 : i32, i32
  }
  func.func @transform_13(%arg0: i32) -> (i32, i32) {
    %c0_i32 = arith.constant 0 : i32
    %c0_i32_0 = arith.constant 0 : i32
    %c0_i32_1 = arith.constant 0 : i32
    return %c0_i32, %c0_i32_0 : i32, i32
  }
  func.func @transform_14(%arg0: i32) -> (i32, i32) {
    %c0_i32 = arith.constant 0 : i32
    %c0_i32_0 = arith.constant 0 : i32
    %c0_i32_1 = arith.constant 0 : i32
    return %c0_i32, %c0_i32_0 : i32, i32
  }
  func.func @transform_15(%arg0: i32) -> (i32, i32) {
    %c0_i32 = arith.constant 0 : i32
    %c0_i32_0 = arith.constant 0 : i32
    %c0_i32_1 = arith.constant 0 : i32
    return %c0_i32, %c0_i32_0 : i32, i32
  }
  func.func @transform_16(%arg0: i32) -> (i32, i32, i32) {
    %c0_i32 = arith.constant 0 : i32
    %c0_i32_0 = arith.constant 0 : i32
    %c0_i32_1 = arith.constant 0 : i32
    return %arg0, %c0_i32, %c0_i32_0 : i32, i32, i32
  }
}

</mosaic_0001>

<bundles_post_ra>
// kernel: tpu_custom_call.1
= control target key start
LH: loop header
LB: loop body
LE: loop exit
PB: predicated region body
PF: predicated region fallthrough
CT: control target
= control target key end

     0   :  { %s5840_s0 = inlined_call_operand.vmem [shape: bf16[2,16,128], index: 0, kind: input, shape index: {}]   ;;  %s5841_s1 = inlined_call_operand.vmem [shape: bf16[128,576], index: 1, kind: input, shape index: {}]   ;;  %s5842_s2 = inlined_call_operand.vmem [shape: f32[1,576], index: 2, kind: input, shape index: {}]   ;;  %s5843_s3 = inlined_call_operand.vmem [shape: f32[1,576], index: 3, kind: input, shape index: {}]   ;;  %s5844_s4 = inlined_call_operand.vmem [shape: f32[9,512], index: 4, kind: input, shape index: {}]   ;;  %s5845_s5 = inlined_call_operand.vmem [shape: f32[1,512], index: 5, kind: input, shape index: {}]   ;;  %s5846_s6 = inlined_call_operand.vmem [shape: f32[1,512], index: 6, kind: input, shape index: {}]   ;;  %s5847_s7 = inlined_call_operand.vmem [shape: f32[512,32], index: 7, kind: input, shape index: {}]   ;;  %s5848_s8 = inlined_call_operand.vmem [shape: f32[32,8], index: 8, kind: input, shape index: {}]   ;;  %s5849_s9 = inlined_call_operand.vmem [shape: f32[1,8], index: 9, kind: input, shape index: {}]   ;;  %s5850_s10 = inlined_call_operand.vmem [shape: f32[8,32], index: 10, kind: input, shape index: {}]   ;;  %s5851_s11 = inlined_call_operand.vmem [shape: f32[1,32], index: 11, kind: input, shape index: {}]   ;;  %s5852_s12 = inlined_call_operand.vmem [shape: f32[32,512], index: 12, kind: input, shape index: {}]   ;;  %s5853_s13 = inlined_call_operand.vmem [shape: bf16[512,128], index: 13, kind: input, shape index: {}]   ;;  %s5854_s14 = inlined_call_operand.vmem [shape: f32[1,128], index: 14, kind: input, shape index: {}]   ;;  %s5855_s15 = inlined_call_operand.vmem [shape: f32[1,128], index: 15, kind: input, shape index: {}]   ;;  %s5856_s16 = inlined_call_operand.hbm [shape: bf16[2,16,128], index: 16, kind: output, shape index: {}]  }
   0x1   :  { %5890 = sst [smem:[#allocation39_spill]] %s5840_s0 }
   0x2   :  { %5891 = sst [smem:[#allocation40_spill]] %s5841_s1 }
   0x3   :  { %5892 = sst [smem:[#allocation41_spill]] %s5842_s2 }
   0x4   :  { %21 = vsyncpa [#allocation4], 0 }
   0x5   :  { %23 = vsyncpa [#allocation4 + $0x1], 0  ;;  %s3715_s21 = smov 0   ;;  %s3717_s22 = smov 0  }
   0x6   :  { %s3719_s23 = smov 0   ;;  %s3721_s24 = smov 0  }
   0x7 LB: > { %5893 = sst [smem:[#allocation6_spill]] %s3611_s21  ;;  %s3736_s25 = sadd.s32 4294967295, %s3623_s24   ;;  %s3623_s24 = sphi %s3721_s24, %s6010_s24   ;;  %s3619_s23 = sphi %s3719_s23, %s6012_s23   ;;  %s3615_s22 = sphi %s3717_s22, %s6014_s22   ;;  %s3611_s21 = sphi %s3715_s21, %s6013_s21  }
   0x8   : > { %5894 = sst [smem:[#allocation7_spill]] %s3619_s23  ;;  %s3016_s26 = sadd.s32 4294967294, %s3623_s24  }
   0x9   : > { %5895 = sst [smem:[#allocation8_spill]] %s3623_s24  ;;  %s3740_s27 = sadd.s32 1, %s3623_s24  }
   0xa   : > { %5896 = sst [smem:[#allocation9_spill]] %s3740_s27  ;;  %s377_s28 = sadd.s32 1, %s3619_s23 }
   0xb   : > { %s374_s29 = ssub.s32 %s3623_s24, %s3740_s27  ;;  %p387_p0 = scmp.ne.s32.totalorder %s3619_s23, %s3615_s22 }
   0xc   : > { %p375_p1 = scmp.eq.s32.totalorder %s374_s29, 0  ;;  %p388_p2 = scmp.eq.s32.totalorder %s3736_s25, 1 }
   0xd   : > { %p393_p3 = scmp.ne.s32.totalorder %s3615_s22, %s3611_s21  ;;  %p394_p4 = scmp.eq.s32.totalorder %s3016_s26, 1 }
   0xe   : > { %s3751_s30 = scalar_select %p375_p1, %s3619_s23, %s377_s28  }
   0xf   : > { %p3753_p5 = por %p388_p2, %p387_p0  ;;  %p3757_p6 = por %p394_p4, %p393_p3 }
  0x10   : > { %5897 = sst [smem:[#allocation10_spill]] %s3751_s30  ;;  %p3019_p7 = scmp.ge.s32.totalorder %s3623_s24, 1 }
  0x11   : > { %s5899_s17 = scalar_select %p3757_p6, 1, 0 }
  0x12   : > { %p465_p8 = scmp.lt.s32.totalorder %s3623_s24, 3 }
  0x13   : > { %5900 = sst [smem:[#allocation11_spill]] %s5899_s17 }
  0x14   : > { %p466_p9 = pnand %p3019_p7, %p465_p8 }
  0x16   : > { %469 = sbr.rel (%p466_p9) target bundleno = 1331 (0x533), region = 84 }
  0x1b   : > { %s5901_s1 = sld [smem:[#allocation40_spill]]  ;;  %p515_p10 = scmp.lt.s32.totalorder %s3736_s25, 1  ;;  %vm1217_vm5 = vcmask 261120   ;;  %vm1158_vm15 = vcmask 523264  }
  0x1c   : > { %s3625_s30 = smov 32   ;;  %s5902_s24 = sld [smem:[#allocation39_spill]] }
  0x1d   : > { %s516_s18 = scalar_select %p515_p10, %s3736_s25, 1 }
  0x1e   : > { %s3626_s27 = smov 64   ;;  %s5903_s2 = sld [smem:[#allocation41_spill]] }
  0x1f   : > { %s3354_s19 = sshll.u32 %s516_s18, 3  ;;  %s3628_s20 = smov 96  }
  0x20   : > { %s3428_s18 = sshll.u32 %s3736_s25, 3 }
  0x21   : > { %v3169_v0 = vld [vmem:[%s5901_s1 + $0x118] sm:$0xf]  ;;  %v3393_v1 = vld [vmem:[%s5901_s1 + $0x128] sm:$0xf0]  ;;  %v3391_v2 = vld [vmem:[%s5901_s1 + $0x11c] sm:$0xf]  ;;  %s2950_s21 = scalar_lea.hbm %s5856_s16, %s3428_s18 }
  0x22   : > { %v3170_v3 = vor.u32 %v3393_v1, %v3169_v0  ;;  %v3171_v4 = vld [vmem:[%s5901_s1 + $0x12c] sm:$0xf0]  ;;  %v3177_v5 = vld [vmem:[%s5901_s1 + $0x120] sm:$0xf]  ;;  %v3394_v6 = vld [vmem:[%s5901_s1 + $0x130] sm:$0xf0]  ;;  %s3971_s28 = scalar_lea.vmem %s5902_s24, %s3354_s19 }
  0x23   : > { %v3174_v7 = vor.u32 %v3391_v2, %v3171_v4  ;;  %v3178_v8 = vor.u32 %v3394_v6, %v3177_v5  ;;  %v3392_v9 = vld [vmem:[%s5901_s1 + $0x124] sm:$0xf]  ;;  %v3179_v10 = vld [vmem:[%s5901_s1 + $0x134] sm:$0xf0]  ;;  %v3149_v11 = vld [vmem:[%s5901_s1 + $0xf0] sm:$0xf] }
  0x24   : > { %784 = vmatpush.bf16.msra.mxu0 %v3170_v3  ;;  %v3182_v12 = vor.u32 %v3392_v9, %v3179_v10  ;;  %v3388_v13 = vld [vmem:[%s5901_s1 + $0x100] sm:$0xf0]  ;;  %v3386_v14 = vld [vmem:[%s5901_s1 + $0xf4] sm:$0xf]  ;;  %v3151_v15 = vld [vmem:[%s5901_s1 + $0x104] sm:$0xf0] }
  0x25   : > { %798 = vmatpush.bf16.msra.mxu1 %v3174_v7  ;;  %812 = vmatpush.bf16.msra.mxu2 %v3178_v8  ;;  %v3150_v16 = vor.u32 %v3388_v13, %v3149_v11  ;;  %v3154_v17 = vor.u32 %v3386_v14, %v3151_v15  ;;  %v3157_v18 = vld [vmem:[%s5901_s1 + $0xf8] sm:$0xf]  ;;  %v3389_v19 = vld [vmem:[%s5901_s1 + $0x108] sm:$0xf0]  ;;  %v3387_v20 = vld [vmem:[%s5901_s1 + $0xfc] sm:$0xf] }
  0x26   : > { %826 = vmatpush.bf16.msra.mxu3 %v3182_v12  ;;  %v3158_v21 = vor.u32 %v3389_v19, %v3157_v18  ;;  %v3159_v22 = vld [vmem:[%s5901_s1 + $0x10c] sm:$0xf0]  ;;  %v3129_v23 = vld [vmem:[%s5901_s1 + $0xc8] sm:$0xf]  ;;  %v3383_v24 = vld [vmem:[%s5901_s1 + $0xd8] sm:$0xf0] }
  0x27   : > { %v3162_v25 = vor.u32 %v3387_v20, %v3159_v22  ;;  %v3381_v26 = vld [vmem:[%s5901_s1 + $0xcc] sm:$0xf]  ;;  %v3131_v27 = vld [vmem:[%s5901_s1 + $0xdc] sm:$0xf0]  ;;  %v3137_v28 = vld [vmem:[%s5901_s1 + $0xd0] sm:$0xf]  ;;  %v3130_v29 = vor.u32 %v3383_v24, %v3129_v23 }
  0x28   : > { %785 = vmatpush.bf16.msra.mxu0 %v3150_v16  ;;  %v3384_v30 = vld [vmem:[%s5901_s1 + $0xe0] sm:$0xf0]  ;;  %v3382_v31 = vld [vmem:[%s5901_s1 + $0xd4] sm:$0xf]  ;;  %v3139_v32 = vld [vmem:[%s5901_s1 + $0xe4] sm:$0xf0]  ;;  %v3134_v33 = vor.u32 %v3381_v26, %v3131_v27 }
  0x29   : > { %799 = vmatpush.bf16.msra.mxu1 %v3154_v17  ;;  %813 = vmatpush.bf16.msra.mxu2 %v3158_v21  ;;  %v3138_v34 = vor.u32 %v3384_v30, %v3137_v28  ;;  %v3109_v35 = vld [vmem:[%s5901_s1 + $0xa0] sm:$0xf]  ;;  %v3378_v36 = vld [vmem:[%s5901_s1 + $0xb0] sm:$0xf0]  ;;  %v3376_v37 = vld [vmem:[%s5901_s1 + $0xa4] sm:$0xf]  ;;  %v3142_v38 = vor.u32 %v3382_v31, %v3139_v32 }
  0x2a   : > { %827 = vmatpush.bf16.msra.mxu3 %v3162_v25  ;;  %v3111_v39 = vld [vmem:[%s5901_s1 + $0xb4] sm:$0xf0]  ;;  %v3117_v40 = vld [vmem:[%s5901_s1 + $0xa8] sm:$0xf]  ;;  %v3379_v41 = vld [vmem:[%s5901_s1 + $0xb8] sm:$0xf0]  ;;  %v3110_v44 = vor.u32 %v3378_v36, %v3109_v35 }
  0x2b   : > { %v3377_v42 = vld [vmem:[%s5901_s1 + $0xac] sm:$0xf]  ;;  %v3119_v43 = vld [vmem:[%s5901_s1 + $0xbc] sm:$0xf0]  ;;  %v3114_v45 = vor.u32 %v3376_v37, %v3111_v39  ;;  %v3118_v46 = vor.u32 %v3379_v41, %v3117_v40  ;;  %v3089_v47 = vld [vmem:[%s5901_s1 + $0x78] sm:$0xf] }
  0x2c   : > { %786 = vmatpush.bf16.msra.mxu0 %v3130_v29  ;;  %v3373_v48 = vld [vmem:[%s5901_s1 + $0x88] sm:$0xf0]  ;;  %v3371_v49 = vld [vmem:[%s5901_s1 + $0x7c] sm:$0xf]  ;;  %v3122_v50 = vor.u32 %v3377_v42, %v3119_v43  ;;  %v3091_v51 = vld [vmem:[%s5901_s1 + $0x8c] sm:$0xf0] }
  0x2d   : > { %800 = vmatpush.bf16.msra.mxu1 %v3134_v33  ;;  %814 = vmatpush.bf16.msra.mxu2 %v3138_v34  ;;  %v3097_v52 = vld [vmem:[%s5901_s1 + $0x80] sm:$0xf]  ;;  %v3374_v53 = vld [vmem:[%s5901_s1 + $0x90] sm:$0xf0]  ;;  %v3372_v54 = vld [vmem:[%s5901_s1 + $0x84] sm:$0xf]  ;;  %v3090_v56 = vor.u32 %v3373_v48, %v3089_v47  ;;  %v3094_v57 = vor.u32 %v3371_v49, %v3091_v51 }
  0x2e   : > { %828 = vmatpush.bf16.msra.mxu3 %v3142_v38  ;;  %v3099_v55 = vld [vmem:[%s5901_s1 + $0x94] sm:$0xf0]  ;;  %v3098_v58 = vor.u32 %v3374_v53, %v3097_v52  ;;  %v3069_v59 = vld [vmem:[%s5901_s1 + $0x50] sm:$0xf]  ;;  %v3368_v60 = vld [vmem:[%s5901_s1 + $0x60] sm:$0xf0] }
  0x2f   : > { %v3366_v61 = vld [vmem:[%s5901_s1 + $0x54] sm:$0xf]  ;;  %v3102_v62 = vor.u32 %v3372_v54, %v3099_v55  ;;  %v3071_v63 = vld [vmem:[%s5901_s1 + $0x64] sm:$0xf0]  ;;  %v3077_v0 = vld [vmem:[%s5901_s1 + $0x58] sm:$0xf]  ;;  %v3070_v5 = vor.u32 %v3368_v60, %v3069_v59 }
  0x30   : > { %787 = vmatpush.bf16.msra.mxu0 %v3110_v44  ;;  %v3369_v1 = vld [vmem:[%s5901_s1 + $0x68] sm:$0xf0]  ;;  %v3367_v2 = vld [vmem:[%s5901_s1 + $0x5c] sm:$0xf]  ;;  %v3079_v3 = vld [vmem:[%s5901_s1 + $0x6c] sm:$0xf0]  ;;  %v3074_v9 = vor.u32 %v3366_v61, %v3071_v63 }
  0x31   : > { %801 = vmatpush.bf16.msra.mxu1 %v3114_v45  ;;  %815 = vmatpush.bf16.msra.mxu2 %v3118_v46  ;;  %v3049_v4 = vld [vmem:[%s5901_s1 + $0x28] sm:$0xf]  ;;  %v3363_v6 = vld [vmem:[%s5901_s1 + $0x38] sm:$0xf0]  ;;  %v3361_v7 = vld [vmem:[%s5901_s1 + $0x2c] sm:$0xf]  ;;  %v3078_v10 = vor.u32 %v3369_v1, %v3077_v0  ;;  %v3082_v14 = vor.u32 %v3367_v2, %v3079_v3 }
  0x32   : > { %829 = vmatpush.bf16.msra.mxu3 %v3122_v50  ;;  %v3051_v8 = vld [vmem:[%s5901_s1 + $0x3c] sm:$0xf0]  ;;  %v3057_v11 = vld [vmem:[%s5901_s1 + $0x30] sm:$0xf]  ;;  %v3364_v12 = vld [vmem:[%s5901_s1 + $0x40] sm:$0xf0]  ;;  %v3050_v19 = vor.u32 %v3363_v6, %v3049_v4 }
  0x33   : > { %v3362_v13 = vld [vmem:[%s5901_s1 + $0x34] sm:$0xf]  ;;  %v3059_v15 = vld [vmem:[%s5901_s1 + $0x44] sm:$0xf0]  ;;  %v3029_v17 = vld [vmem:[%s5901_s1] sm:$0xf]  ;;  %v3054_v23 = vor.u32 %v3361_v7, %v3051_v8  ;;  %v3058_v24 = vor.u32 %v3364_v12, %v3057_v11 }
  0x34   : > { %788 = vmatpush.bf16.msra.mxu0 %v3090_v56  ;;  %v3197_v16 = vld [vmem:[%s5844_s4 + $0x1] ss:$8 sm:$0xf]  ;;  %v3358_v20 = vld [vmem:[%s5901_s1 + $0x10] sm:$0xf0]  ;;  %v3062_v27 = vor.u32 %v3362_v13, %v3059_v15  ;;  %s512_s19 = sand.u32 1, %s3615_s22  }
  0x35   : > { %802 = vmatpush.bf16.msra.mxu1 %v3094_v57  ;;  %816 = vmatpush.bf16.msra.mxu2 %v3098_v58  ;;  %v1205_v18 = vperm.slane %v3197_v16, 0  ;;  %v3356_v21 = vld [vmem:[%s5901_s1 + $0x4] sm:$0xf]  ;;  %v1207_v22 = vperm.slane %v3197_v16, 2  ;;  %v3031_v25 = vld [vmem:[%s5901_s1 + $0x14] sm:$0xf0]  ;;  %v3030_v33 = vor.u32 %v3358_v20, %v3029_v17 }
  0x36   : > { %830 = vmatpush.bf16.msra.mxu3 %v3102_v62  ;;  %v3037_v26 = vld [vmem:[%s5901_s1 + $0x8] sm:$0xf]  ;;  %v3359_v28 = vld [vmem:[%s5901_s1 + $0x18] sm:$0xf0]  ;;  %v3357_v29 = vld [vmem:[%s5901_s1 + $0xc] sm:$0xf]  ;;  %v3034_v34 = vor.u32 %v3356_v21, %v3031_v25 }
  0x37   : > { %v3039_v30 = vld [vmem:[%s5901_s1 + $0x1c] sm:$0xf0]  ;;  %1209 = vrot.lane.b32.xlu0 %v1205_v18, %s3625_s30  ;;  %v3185_v31 = vld [vmem:[%s5901_s1 + $0x128] sm:$0xf]  ;;  %v3395_v32 = vld [vmem:[%s5901_s1 + $0x138] sm:$0xf0]  ;;  %v3038_v35 = vor.u32 %v3359_v28, %v3037_v26 }
  0x38   : > { %789 = vmatpush.bf16.msra.mxu0 %v3070_v5  ;;  %1213 = vrot.lane.b32.xlu1 %v1207_v22, %s3625_s30  ;;  %v3042_v36 = vor.u32 %v3357_v29, %v3039_v30  ;;  %v3186_v37 = vor.u32 %v3395_v32, %v3185_v31  ;;  %v3974_v38 = vld [vmem:[%s3971_s28] sm:$0xff]  ;;  %v3390_v40 = vld [vmem:[%s5901_s1 + $0x110] sm:$0xf0]  ;;  %v1206_v41 = vperm.slane %v3197_v16, 1  ;;  %v1208_v42 = vperm.slane %v3197_v16, 3  ;;  %s3020_s24 = sshll.u32 %s512_s19, 3 }
  0x39   : > { %803 = vmatpush.bf16.msra.mxu1 %v3074_v9  ;;  %817 = vmatpush.bf16.msra.mxu2 %v3078_v10  ;;  %v3165_v39 = vld [vmem:[%s5901_s1 + $0x100] sm:$0xf]  ;;  %v3145_v46 = vld [vmem:[%s5901_s1 + $0xd8] sm:$0xf]  ;;  %v3385_v47 = vld [vmem:[%s5901_s1 + $0xe8] sm:$0xf0] }
  0x3a   : > { %831 = vmatpush.bf16.msra.mxu3 %v3082_v14  ;;  %v3198_v43 = vld [vmem:[%s5844_s4 + $0x2] ss:$8 sm:$0xf]  ;;  %v3166_v44 = vor.u32 %v3390_v40, %v3165_v39  ;;  %v3146_v48 = vor.u32 %v3385_v47, %v3145_v46  ;;  %v3200_v49 = vld [vmem:[%s5844_s4 + $0x4] ss:$8 sm:$0xf] }
  0x3b   : > { %v1294_v45 = vperm.slane %v3198_v43, 0  ;;  %v3125_v50 = vld [vmem:[%s5901_s1 + $0xb0] sm:$0xf]  ;;  %v3380_v51 = vld [vmem:[%s5901_s1 + $0xc0] sm:$0xf0]  ;;  %v1296_v52 = vperm.slane %v3198_v43, 2 }
  0x3c   : > { %790 = vmatpush.bf16.msra.mxu0 %v3050_v19  ;;  %v1463_v53 = vperm.slane %v3200_v49, 0  ;;  %v3126_v54 = vor.u32 %v3380_v51, %v3125_v50  ;;  %v1295_v55 = vperm.slane %v3198_v43, 1  ;;  %v3105_v56 = vld [vmem:[%s5901_s1 + $0x88] sm:$0xf]  ;;  %v3375_v57 = vld [vmem:[%s5901_s1 + $0x98] sm:$0xf0] }
  0x3d   : > { %804 = vmatpush.bf16.msra.mxu1 %v3054_v23  ;;  %818 = vmatpush.bf16.msra.mxu2 %v3058_v24  ;;  %v3106_v58 = vor.u32 %v3375_v57, %v3105_v56  ;;  %v3085_v59 = vld [vmem:[%s5901_s1 + $0x60] sm:$0xf]  ;;  %v3370_v60 = vld [vmem:[%s5901_s1 + $0x70] sm:$0xf0]  ;;  %v1465_v61 = vperm.slane %v3200_v49, 2  ;;  %v1297_v62 = vperm.slane %v3198_v43, 3 }
  0x3e   : > { %832 = vmatpush.bf16.msra.mxu3 %v3062_v27  ;;  %1298 = vrot.lane.b32.xlu2 %v1294_v45, %s3626_s27  ;;  %v3086_v63 = vor.u32 %v3370_v60, %v3085_v59  ;;  %v1464_v0 = vperm.slane %v3200_v49, 1  ;;  %v3065_v1 = vld [vmem:[%s5901_s1 + $0x38] sm:$0xf]  ;;  %v3365_v2 = vld [vmem:[%s5901_s1 + $0x48] sm:$0xf0]  ;;  %v1466_v10 = vperm.slane %v3200_v49, 3 }
  0x3f   : > { %1211 = vrot.lane.b32.xlu0 %v1206_v41, %s3625_s30  ;;  %v3201_v3 = vld [vmem:[%s5844_s4 + $0x5] ss:$8 sm:$0xf]  ;;  %v3066_v4 = vor.u32 %v3365_v2, %v3065_v1  ;;  %v3045_v5 = vld [vmem:[%s5901_s1 + $0x10] sm:$0xf]  ;;  %v3627_v45 = vmov 0.0  }
  0x40   : > { %791 = vmatpush.bf16.msra.mxu0 %v3030_v33  ;;  %1215 = vrot.lane.b32.xlu1 %v1208_v42, %s3625_s30  ;;  %v3360_v6 = vld [vmem:[%s5901_s1 + $0x20] sm:$0xf0]  ;;  %v1585_v7 = vperm.slane %v3201_v3, 0  ;;  %v1586_v8 = vperm.slane %v3201_v3, 1  ;;  %v1588_v12 = vperm.slane %v3201_v3, 3  ;;  %v1587_v14 = vperm.slane %v3201_v3, 2 }
  0x41   : > { %805 = vmatpush.bf16.msra.mxu1 %v3034_v34  ;;  %819 = vmatpush.bf16.msra.mxu2 %v3038_v35  ;;  %v3046_v9 = vor.u32 %v3360_v6, %v3045_v5  ;;  %v3203_v11 = vld [vmem:[%s5844_s4 + $0x7] ss:$8 sm:$0xf]  ;;  %v3204_v18 = vld [vmem:[%s5844_s4 + $0x20] ss:$8 sm:$0xf] }
  0x42   : > { %833 = vmatpush.bf16.msra.mxu3 %v3042_v36  ;;  %v1789_v13 = vperm.slane %v3203_v11, 0  ;;  %v1791_v15 = vperm.slane %v3203_v11, 2  ;;  %v1792_v16 = vperm.slane %v3203_v11, 3  ;;  %v1790_v17 = vperm.slane %v3203_v11, 1  ;;  %v4063_v23 = vld [vmem:[%s5903_s2] sm:$0x1f] }
  0x43   : > { %792 = vmatmul.bf16.vlgmr.msra.gmra.mxu0 %v3974_v38  ;;  %v1912_v19 = vperm.slane %v3204_v18, 1  ;;  %v1913_v20 = vperm.slane %v3204_v18, 2  ;;  %v1911_v21 = vperm.slane %v3204_v18, 0  ;;  %v1914_v22 = vperm.slane %v3204_v18, 3  ;;  %v4068_v24 = vld [vmem:[%s5843_s3] sm:$0x1f] }
  0x44   : > { %840 = vmatpush.bf16.msrb.mxu0 %v3186_v37  ;;  %806 = vmatmul.bf16.vlgmr.msra.gmra.mxu1 %v3974_v38  ;;  %v856_v25 = vperm.slane %v4063_v23, 0  ;;  %v857_v26 = vperm.slane %v4063_v23, 1  ;;  %v878_v27 = vperm.slane %v4068_v24, 0  ;;  %v879_v30 = vperm.slane %v4068_v24, 1  ;;  %s514_s29 = scalar_lea.vmem [#allocation3], %s3020_s24  ;;  %s2939_s25 = scalar_lea.sflag [#allocation4], %s512_s19 }
  0x45   : > { %820 = vmatmul.bf16.vlgmr.msra.gmra.mxu2 %v3974_v38  ;;  %834 = vmatmul.bf16.vlgmr.msra.gmra.mxu3 %v3974_v38  ;;  %v858_v39 = vperm.slane %v4063_v23, 2  ;;  %v859_v41 = vperm.slane %v4063_v23, 3  ;;  %v881_v47 = vperm.slane %v4068_v24, 3  ;;  %s3581_s24 = scalar_lea.hbm %s5856_s16, 16 }
  0x46   : > { %1300 = vrot.lane.b32.xlu2 %v1295_v55, %s3626_s27 }
  0x47   : > { %1302 = vrot.lane.b32.xlu0 %v1296_v52, %s3626_s27 }
  0x48   : > { %841 = vmatpush.bf16.msrb.mxu0 %v3166_v44  ;;  %1467 = vrot.lane.b32.xlu1 %v1463_v53, %s3625_s30  ;;  %v880_v44 = vperm.slane %v4068_v24, 2 }
  0x4c   : > { %842 = vmatpush.bf16.msrb.mxu0 %v3146_v48 }
  0x4e   : > { %1469 = vrot.lane.b32.xlu2 %v1464_v0, %s3625_s30 }
  0x4f   : > { %1471 = vrot.lane.b32.xlu0 %v1465_v61, %s3625_s30 }
  0x50   : > { %843 = vmatpush.bf16.msrb.mxu0 %v3126_v54  ;;  %1304 = vrot.lane.b32.xlu1 %v1297_v62, %s3626_s27 }
  0x54   : > { %844 = vmatpush.bf16.msrb.mxu0 %v3106_v58 }
  0x56   : > { %1473 = vrot.lane.b32.xlu2 %v1466_v10, %s3625_s30 }
  0x57   : > { %1589 = vrot.lane.b32.xlu0 %v1585_v7, %s3626_s27 }
  0x58   : > { %845 = vmatpush.bf16.msrb.mxu0 %v3086_v63  ;;  %1591 = vrot.lane.b32.xlu1 %v1586_v8, %s3626_s27 }
  0x5c   : > { %846 = vmatpush.bf16.msrb.mxu0 %v3066_v4 }
  0x5e   : > { %1593 = vrot.lane.b32.xlu2 %v1587_v14, %s3626_s27 }
  0x5f   : > { %1595 = vrot.lane.b32.xlu0 %v1588_v12, %s3626_s27 }
  0x60   : > { %847 = vmatpush.bf16.msrb.mxu0 %v3046_v9  ;;  %1793 = vrot.lane.b32.xlu1 %v1789_v13, %s3625_s30 }
  0x63   : > { %848 = vmatmul.bf16.vlgmr.msrb.gmra.mxu0 %v3974_v38  ;;  %v1098_v38 = vlaneseq }
  0x65   : > { %vm4088_vm0 = vcmp.lt.s32.totalorder %v1098_v38, 576 }
  0x66   : > { %1795 = vrot.lane.b32.xlu2 %v1790_v17, %s3625_s30  ;;  %1102 = vst.msk [vmem:[#allocation2] ss:$8 sm:$0xf] %vm4088_vm0, %v3627_v45 }
  0x67   : > { %1797 = vrot.lane.b32.xlu0 %v1791_v15, %s3625_s30  ;;  %1103 = vst.msk [vmem:[#allocation2] ss:$8 sm:$0x10] %vm4088_vm0, %v3627_v45 }
  0x68   : > { %1799 = vrot.lane.b32.xlu1 %v1792_v16, %s3625_s30  ;;  %1105 = vst.msk [vmem:[#allocation2 + $0x51] ss:$8 sm:$0xf] %vm4088_vm0, %v3627_v45  ;;  %s2951_s30 = sshll.u32 %s514_s29, 4  ;;  %s2952_s30 = int_to_ptr.vmem [resolvable:$true] %s2951_s30 }
  0x69   : > { %1106 = vst.msk [vmem:[#allocation2 + $0x51] ss:$8 sm:$0x10] %vm4088_vm0, %v3627_v45 }
  0x6e   : > { %1915 = vrot.lane.b32.xlu2 %v1911_v21, %s3626_s27 }
  0x6f   : > { %1917 = vrot.lane.b32.xlu0 %v1912_v19, %s3626_s27 }
  0x70   : > { %1919 = vrot.lane.b32.xlu1 %v1913_v20, %s3626_s27 }
  0x76   : > { %1921 = vrot.lane.b32.xlu2 %v1914_v22, %s3626_s27 }
  0x98   : > { %v4076_v33 = vpop.permute.xlu2 %1298 }
  0xa0   : > { %v4116_v59 = vpop.permute.xlu2 %1300 }
  0xa8   : > { %v4137_v19 = vpop.permute.xlu2 %1469 }
  0xa9   : > { %v4073_v28 = vpop.permute.xlu0 %1209 }
  0xaa   : > { %v4078_v34 = vpop.permute.xlu1 %1213 }
  0xb1   : > { %v4102_v54 = vpop.permute.xlu0 %1211 }
  0xb2   : > { %v4118_v60 = vpop.permute.xlu1 %1215 }
  0xb3   : > { %5906 = vst [vmem:[#allocation12_spill] sm:$0xff] %v4118_v60 }
  0xb9   : > { %v4129_v10 = vpop.permute.xlu0 %1302 }
  0xba   : > { %v4139_v20 = vpop.permute.xlu1 %1467 }
  0xc0   : > { %v793_v29 = vpop.f32.mrf.mxu0 }
  0xc1   : > { %v866_v31 = vmul.f32 %v856_v25, %v793_v29  ;;  %v807_v32 = vpop.f32.mrf.mxu1 }
  0xc2   : > { %v867_v35 = vmul.f32 %v857_v26, %v807_v32 }
  0xc3   : > { %v4080_v36 = vadd.f32 %v878_v27, %v866_v31 }
  0xc4   : > { %v4082_v37 = vadd.f32 %v879_v30, %v867_v35 }
  0xc5   : > { %v3187_v40 = vmul.f32 -1.442695, %v4080_v36 }
  0xc6   : > { %v3188_v42 = vmul.f32 -1.442695, %v4082_v37 }
  0xc7   : > { %3480 = vpow2.f32 %v3187_v40 }
  0xc8   : > { %v821_v46 = vpop.f32.mrf.mxu2  ;;  %3482 = vpow2.f32 %v3188_v42  ;;  %v835_v49 = vpop.f32.mrf.mxu3 }
  0xc9   : > { %v868_v48 = vmul.f32 %v858_v39, %v821_v46  ;;  %v795_v50 = vpop.f32.mrf.mxu0  ;;  %v869_v51 = vmul.f32 %v859_v41, %v835_v49  ;;  %v809_v53 = vpop.f32.mrf.mxu1 }
  0xca   : > { %v871_v52 = vmul.f32 %v856_v25, %v795_v50  ;;  %v872_v56 = vmul.f32 %v857_v26, %v809_v53 }
  0xcb   : > { %v4108_v55 = vadd.f32 %v880_v44, %v868_v48  ;;  %v4112_v57 = vadd.f32 %v881_v47, %v869_v51 }
  0xcc   : > { %v4114_v58 = vadd.f32 %v878_v27, %v871_v52  ;;  %v4121_v62 = vadd.f32 %v879_v30, %v872_v56 }
  0xcd   : > { %v3189_v61 = vmul.f32 -1.442695, %v4108_v55  ;;  %v3481_v63 = vpop.eup %3480  ;;  %v3190_v0 = vmul.f32 -1.442695, %v4112_v57 }
  0xce   : > { %v3483_v1 = vpop.eup %3482  ;;  %v928_v2 = vadd.f32 1.0, %v3481_v63  ;;  %v3192_v3 = vmul.f32 -1.442695, %v4114_v58  ;;  %v3193_v5 = vmul.f32 -1.442695, %v4121_v62 }
  0xcf   : > { %3484 = vpow2.f32 %v3189_v61  ;;  %v4125_v4 = vadd.f32 1.0, %v3483_v1 }
  0xd0   : > { %3486 = vpow2.f32 %v3190_v0  ;;  %v823_v6 = vpop.f32.mrf.mxu2  ;;  %v947_v8 = vand.u32 2147483647, %v928_v2  ;;  %v949_v9 = vand.u32 2147483648, %v928_v2  ;;  %v837_v14 = vpop.f32.mrf.mxu3  ;;  %vm943_vm1 = vweird.f32 %v928_v2 }
  0xd1   : > { %3488 = vrcp.f32 %v928_v2  ;;  %v873_v13 = vmul.f32 %v858_v39, %v823_v6  ;;  %v962_v16 = vand.u32 2147483647, %v4125_v4  ;;  %v964_v17 = vand.u32 2147483648, %v4125_v4  ;;  %v4184_v0 = vpop.permute.xlu0 %1471 }
  0xd2   : > { %3490 = vrcp.f32 %v4125_v4  ;;  %vm958_vm2 = vweird.f32 %v4125_v4  ;;  %vm4143_vm3 = vcmp.eq.f32.partialorder %v947_v8, 8.507059e+37  ;;  %v950_v27 = vor.u32 1.1754944e-38, %v949_v9 }
  0xd3   : > { %3492 = vpow2.f32 %v3192_v3  ;;  %v874_v30 = vmul.f32 %v859_v41, %v837_v14  ;;  %v4153_v35 = vadd.f32 %v880_v44, %v873_v13  ;;  %vm4155_vm6 = vcmp.eq.f32.partialorder %v962_v16, 8.507059e+37 }
  0xd4   : > { %3494 = vpow2.f32 %v3193_v5  ;;  %v965_v40 = vor.u32 1.1754944e-38, %v964_v17 }
  0xd5   : > { %v3485_v7 = vpop.eup %3484  ;;  %v4173_v50 = vadd.f32 %v881_v47, %v874_v30  ;;  %v3194_v53 = vmul.f32 -1.442695, %v4153_v35 }
  0xd6   : > { %v3487_v11 = vpop.eup %3486  ;;  %v4131_v12 = vadd.f32 1.0, %v3485_v7 }
  0xd7   : > { %v3489_v15 = vpop.eup %3488  ;;  %v4135_v18 = vadd.f32 1.0, %v3487_v11  ;;  %v4200_v11 = vpop.permute.xlu2 %1473 }
  0xd8   : > { %v3491_v21 = vpop.eup %3490  ;;  %v939_v22 = vmul.f32 %v3489_v15, %v928_v2  ;;  %3496 = vrcp.f32 %v4131_v12  ;;  %vm944_vm4 = vweird.f32 %v3489_v15  ;;  %v977_v42 = vand.u32 2147483647, %v4131_v12  ;;  %5917 = vst [vmem:[#allocation13_spill] sm:$0xff] %v4200_v11 }
  0xd9   : > { %v3493_v25 = vpop.eup %3492  ;;  %v954_v29 = vmul.f32 %v3491_v21, %v4125_v4  ;;  %3498 = vrcp.f32 %v4135_v18  ;;  %v979_v41 = vand.u32 2147483648, %v4131_v12  ;;  %vm4166_vm7 = vmor %vm943_vm1, %vm944_vm4  ;;  %vm959_vm8 = vweird.f32 %v3491_v21  ;;  %v4202_v4 = vpop.permute.xlu1 %1304 }
  0xda   : > { %v3495_v31 = vpop.eup %3494  ;;  %v940_v32 = vsub.f32 1.0, %v939_v22  ;;  %v4161_v45 = vadd.f32 1.0, %v3493_v25  ;;  %v992_v49 = vand.u32 2147483647, %v4135_v18  ;;  %vm973_vm9 = vweird.f32 %v4131_v12  ;;  %vm960_vm12 = vmor %vm958_vm2, %vm959_vm8  ;;  %5918 = vst [vmem:[#allocation14_spill] sm:$0xff] %v4202_v4 }
  0xdb   : > { %v955_v38 = vsub.f32 1.0, %v954_v29  ;;  %v4163_v46 = vadd.f32 1.0, %v3495_v31  ;;  %vm4179_vm10 = vcmp.eq.f32.partialorder %v977_v42, 8.507059e+37  ;;  %vm988_vm11 = vweird.f32 %v4135_v18 }
  0xdc   : > { %v941_v43 = vmul.f32 %v3489_v15, %v940_v32  ;;  %3500 = vrcp.f32 %v4161_v45  ;;  %v980_v2 = vor.u32 1.1754944e-38, %v979_v41  ;;  %v994_v3 = vand.u32 2147483648, %v4135_v18 }
  0xdd   : > { %v956_v48 = vmul.f32 %v3491_v21, %v955_v38  ;;  %3502 = vrcp.f32 %v4163_v46  ;;  %vm4196_vm13 = vcmp.eq.f32.partialorder %v992_v49, 8.507059e+37  ;;  %v1024_v22 = vand.u32 2147483648, %v4161_v45 }
  0xde   : > { %v3497_v51 = vpop.eup %3496  ;;  %v942_v52 = vadd.f32 %v3489_v15, %v941_v43  ;;  %3504 = vpow2.f32 %v3194_v53  ;;  %v995_v32 = vor.u32 1.1754944e-38, %v994_v3  ;;  %vm1018_vm2 = vweird.f32 %v4161_v45  ;;  %v4244_v53 = vpop.permute.xlu0 %1589 }
  0xdf   : > { %v957_v56 = vadd.f32 %v3491_v21, %v956_v48  ;;  %v969_v61 = vmul.f32 %v3497_v51, %v4131_v12  ;;  %v3499_v47 = vpop.eup %3498  ;;  %vm974_vm14 = vweird.f32 %v3497_v51  ;;  %v3195_v38 = vmul.f32 -1.442695, %v4173_v50 }
  0xe0   : > { %v946_v1 = vsel %vm4166_vm7, %v3489_v15, %v942_v52  ;;  %v984_v8 = vmul.f32 %v3499_v47, %v4135_v18  ;;  %v1022_v15 = vand.u32 2147483647, %v4161_v45  ;;  %vm989_vm0 = vweird.f32 %v3499_v47  ;;  %vm975_vm1 = vmor %vm973_vm9, %vm974_vm14 }
  0xe1   : > { %v951_v5 = vsel %vm4143_vm3, %v950_v27, %v946_v1  ;;  %v961_v6 = vsel %vm960_vm12, %v3491_v21, %v957_v56  ;;  %v970_v7 = vsub.f32 1.0, %v969_v61  ;;  %vm990_vm4 = vmor %vm988_vm11, %vm989_vm0  ;;  %v1025_v44 = vor.u32 1.1754944e-38, %v1024_v22 }
  0xe2   : > { %v4205_v13 = vmul.f32 %v951_v5, %v4080_v36  ;;  %v966_v14 = vsel %vm4155_vm6, %v965_v40, %v961_v6  ;;  %v985_v21 = vsub.f32 1.0, %v984_v8  ;;  %v3501_v25 = vpop.eup %3500  ;;  %v4218_v36 = vsel %vm1217_vm5, %v4137_v19, %v4184_v0  ;;  %v4261_v5 = vpop.permute.xlu2 %1593 }
  0xe3   : > { %v4211_v16 = vmul.f32 %v966_v14, %v4082_v37  ;;  %v971_v17 = vmul.f32 %v3497_v51, %v970_v7  ;;  %v1014_v30 = vmul.f32 %v3501_v25, %v4161_v45  ;;  %v3503_v31 = vpop.eup %3502  ;;  %vm1019_vm3 = vweird.f32 %v3501_v25  ;;  %v4263_v6 = vpop.permute.xlu1 %1591 }
  0xe4   : > { %v1118_v26 = vrot.slane %v4205_v13, 7  ;;  %v986_v37 = vmul.f32 %v3499_v47, %v985_v21  ;;  %v1029_v43 = vmul.f32 %v3503_v31, %v4163_v46  ;;  %vm4237_vm6 = vcmp.eq.f32.partialorder %v1022_v15, 8.507059e+37  ;;  %v3505_v56 = vpop.eup %3504  ;;  %vm4251_vm7 = vmor %vm1018_vm2, %vm1019_vm3 }
  0xe5   : > { %v1119_v27 = vrot.slane %v4211_v16, 7  ;;  %v972_v29 = vadd.f32 %v3497_v51, %v971_v17  ;;  %v1015_v42 = vsub.f32 1.0, %v1014_v30  ;;  %3506 = vpow2.f32 %v3195_v38 }
  0xe6   : > { %1148 = vst [vmem:[#allocation2] sm:$0xfe] %v1118_v26  ;;  %v987_v40 = vadd.f32 %v3499_v47, %v986_v37  ;;  %v1030_v52 = vsub.f32 1.0, %v1029_v43  ;;  %vm1034_vm8 = vweird.f32 %v3503_v31  ;;  %v1039_v63 = vand.u32 2147483648, %v4163_v46 }
  0xe7   : > { %1149 = vst [vmem:[#allocation2 + $0x8] sm:$0xfe] %v1119_v27  ;;  %v976_v39 = vsel %vm975_vm1, %v3497_v51, %v972_v29  ;;  %v1016_v51 = vmul.f32 %v3501_v25, %v1015_v42  ;;  %v935_v45 = vadd.f32 1.0, %v3505_v56  ;;  %v4268_v7 = vsel %vm1158_vm15, %v4263_v6, %v4261_v5 }
  0xe8   : > { %v981_v41 = vsel %vm4179_vm10, %v980_v2, %v976_v39  ;;  %v991_v49 = vsel %vm990_vm4, %v3499_v47, %v987_v40  ;;  %v1031_v3 = vmul.f32 %v3503_v31, %v1030_v52  ;;  %vm1033_vm9 = vweird.f32 %v4163_v46 }
  0xe9   : > { %v4242_v48 = vmul.f32 %v981_v41, %v4108_v55  ;;  %v996_v61 = vsel %vm4196_vm13, %v995_v32, %v991_v49  ;;  %v1037_v55 = vand.u32 2147483647, %v4163_v46  ;;  %v1017_v2 = vadd.f32 %v3501_v25, %v1016_v51  ;;  %vm1035_vm10 = vmor %vm1033_vm9, %vm1034_vm8  ;;  %v849_v32 = vpop.f32.mrf.mxu0 }
  0xea   : > { %v4259_v1 = vmul.f32 %v996_v61, %v4112_v57  ;;  %v1032_v9 = vadd.f32 %v3503_v31, %v1031_v3  ;;  %v1040_v17 = vor.u32 1.1754944e-38, %v1039_v63  ;;  %3508 = vrcp.f32 %v935_v45  ;;  %v4301_v56 = vpop.permute.xlu2 %1795 }
  0xeb   : > { %v1120_v47 = vrot.slane %v4242_v48, 7  ;;  %v1021_v57 = vsel %vm4251_vm7, %v3501_v25, %v1017_v2  ;;  %v3507_v14 = vpop.eup %3506  ;;  %vm1038_vm11 = vcmp.eq.f32.partialorder %v1037_v55, 8.507059e+37  ;;  %vm1117_vm12 = vcmask 1040384  }
  0xec   : > { %v1121_v8 = vrot.slane %v4259_v1, 7  ;;  %v1026_v15 = vsel %vm4237_vm6, %v1025_v44, %v1021_v57  ;;  %v1036_v22 = vsel %vm1035_vm10, %v3503_v31, %v1032_v9  ;;  %v936_v29 = vadd.f32 1.0, %v3507_v14 }
  0xed   : > { %1150 = vst [vmem:[#allocation2 + $0x10] sm:$0xfe] %v1120_v47  ;;  %v1093_v21 = vmul.f32 %v1026_v15, %v4114_v58  ;;  %v1041_v25 = vsel %vm1038_vm11, %v1040_v17, %v1036_v22  ;;  %v860_v46 = vperm.slane %v4063_v23, 4  ;;  %v4289_v58 = vpop.permute.xlu0 %1595  ;;  %v882_v42 = vperm.slane %v4068_v24, 4 }
  0xee   : > { %1151 = vst [vmem:[#allocation2 + $0x18] sm:$0xfe] %v1121_v8  ;;  %v1094_v30 = vmul.f32 %v1041_v25, %v4121_v62  ;;  %3510 = vrcp.f32 %v936_v29  ;;  %v1052_v43 = vand.u32 2147483647, %v935_v45  ;;  %v1054_v41 = vand.u32 2147483648, %v935_v45  ;;  %v4328_v48 = vld [vmem:[#allocation2 + $0x8] sm:$0xff] }
  0xef   : > { %v1123_v37 = vrot.slane %v1093_v21, 7  ;;  %5923 = vst [vmem:[#allocation15_spill] sm:$0xff] %v4289_v58  ;;  %v870_v40 = vmul.f32 %v860_v46, %v849_v32  ;;  %vm1048_vm14 = vweird.f32 %v935_v45  ;;  %v1069_v52 = vand.u32 2147483648, %v936_v29 }
  0xf0   : > { %v1125_v39 = vrot.slane %v1094_v30, 7  ;;  %v3509_v31 = vpop.eup %3508  ;;  %vm1053_vm1 = vcmp.eq.f32.partialorder %v1052_v43, 8.507059e+37  ;;  %v1067_v55 = vand.u32 2147483647, %v936_v29  ;;  %vm1063_vm3 = vweird.f32 %v936_v29  ;;  %5924 = vst [vmem:[#allocation16_spill] sm:$0xff] %v4328_v48 }
  0xf1   : > { %v4287_v38 = vsel %vm1117_vm12, %v1118_v26, %v1123_v37  ;;  %1160 = vst [vmem:[#allocation2 + $0x50] sm:$0x1] %v1123_v37  ;;  %v1044_v62 = vmul.f32 %v3509_v31, %v935_v45  ;;  %v4298_v12 = vadd.f32 %v882_v42, %v870_v40  ;;  %vm1049_vm13 = vweird.f32 %v3509_v31  ;;  %v851_v2 = vpop.f32.mrf.mxu0  ;;  %v4341_v40 = vld [vmem:[%s5844_s4 + $0x6] ss:$8 sm:$0xf] }
  0xf2   : > { %v4295_v23 = vsel %vm1117_vm12, %v1119_v27, %v1125_v39  ;;  %1161 = vst [vmem:[#allocation2 + $0x58] sm:$0x1] %v1125_v39  ;;  %vm1050_vm0 = vmor %vm1048_vm14, %vm1049_vm13  ;;  %v1055_v27 = vor.u32 1.1754944e-38, %v1054_v41  ;;  %v1070_v14 = vor.u32 1.1754944e-38, %v1069_v52  ;;  %v875_v15 = vmul.f32 %v860_v46, %v851_v2  ;;  %v4471_v2 = vpop.permute.xlu1 %1793 }
  0xf3   : > { %1155 = vst [vmem:[#allocation2 + $0x30] sm:$0xff] %v4295_v23  ;;  %v1045_v13 = vsub.f32 1.0, %v1044_v62  ;;  %v3191_v24 = vmul.f32 -1.442695, %v4298_v12  ;;  %vm1068_vm6 = vcmp.eq.f32.partialorder %v1067_v55, 8.507059e+37  ;;  %v4345_v62 = vperm.slane %v4341_v40, 3 }
  0xf4   : > { %v3511_v26 = vpop.eup %3510  ;;  %v4311_v37 = vadd.f32 %v882_v42, %v875_v15  ;;  %5925 = vst [vmem:[#allocation17_spill] sm:$0xff] %v4341_v40  ;;  %v4353_v43 = vsel %vm1158_vm15, %v4076_v33, %v4116_v59  ;;  %v4390_v15 = vld [vmem:[#allocation2 + $0x10] sm:$0xff]  ;;  %vm1152_vm11 = vcmask 523265  }
  0xf5   : > { %v1046_v44 = vmul.f32 %v3509_v31, %v1045_v13  ;;  %v1059_v49 = vmul.f32 %v3511_v26, %v936_v29  ;;  %3512 = vpow2.f32 %v3191_v24  ;;  %vm1064_vm2 = vweird.f32 %v3511_v26  ;;  %v4303_v63 = vpop.permute.xlu0 %1797  ;;  %5926 = vst [vmem:[#allocation18_spill] sm:$0xff] %v4345_v62  ;;  %v4348_v1 = vld [vmem:[#allocation2 + $0x18] sm:$0xfc] }
  0xf6   : > { %v4308_v45 = vsel %vm1217_vm5, %v4301_v56, %v4303_v63  ;;  %vm1065_vm4 = vmor %vm1063_vm3, %vm1064_vm2  ;;  %v3196_v39 = vmul.f32 -1.442695, %v4311_v37  ;;  %5927 = vst [vmem:[#allocation19_spill] sm:$0xff] %v4348_v1  ;;  %v1315_v55 = vmul.f32 %v4353_v43, %v4328_v48  ;;  %vm1164_vm2 = vcmask 516096  }
  0xf7   : > { %v1047_v51 = vadd.f32 %v3509_v31, %v1046_v44  ;;  %v1060_v16 = vsub.f32 1.0, %v1059_v49  ;;  %5934 = vst [vmem:[#allocation24_spill] sm:$0xff] %v4390_v15  ;;  %vm1421_vm3 = vcmask 1046528  }
  0xf9   : > { %v1051_v61 = vsel %vm1050_vm0, %v3509_v31, %v1047_v51  ;;  %v1061_v18 = vmul.f32 %v3511_v26, %v1060_v16  ;;  %v4361_v16 = vmul.f32 %v4345_v62, %v4348_v1 }
  0xfa   : > { %v1056_v3 = vsel %vm1053_vm1, %v1055_v27, %v1051_v61  ;;  %v4366_v27 = vld [vmem:[%s5844_s4 + $0x3] ss:$8 sm:$0xf] }
  0xfb   : > { %v1095_v57 = vmul.f32 %v1056_v3, %v4153_v35  ;;  %v1062_v9 = vadd.f32 %v3511_v26, %v1061_v18  ;;  %v3513_v22 = vpop.eup %3512  ;;  %5929 = vst [vmem:[#allocation21_spill] sm:$0xff] %v4361_v16  ;;  %v4376_v18 = vsel %vm1217_vm5, %v4102_v54, %v4078_v34  ;;  %v4524_v16 = vld [vmem:[#allocation2 + $0x10] sm:$0xfc] }
  0xfc   : > { %v932_v32 = vadd.f32 1.0, %v3513_v22  ;;  %5930 = vst [vmem:[#allocation22_spill] sm:$0xff] %v4366_v27  ;;  %v4405_v22 = vsel %vm1217_vm5, %v4139_v20, %v4137_v19  ;;  %v4426_v19 = vsel %vm1158_vm15, %v4244_v53, %v4263_v6 }
  0xfd   : > { %v1127_v17 = vrot.slane %v1095_v57, 7  ;;  %v1066_v21 = vsel %vm1065_vm4, %v3511_v26, %v1062_v9  ;;  %v4385_v57 = vperm.slane %v4366_v27, 0  ;;  %v4388_v9 = vperm.slane %v4366_v27, 1  ;;  %5937 = vst [vmem:[#allocation27_spill] sm:$0xff] %v4426_v19 }
  0xfe   : > { %v1071_v25 = vsel %vm1068_vm6, %v1070_v14, %v1066_v21  ;;  %3514 = vrcp.f32 %v932_v32  ;;  %vm1003_vm7 = vweird.f32 %v932_v32  ;;  %v1007_v41 = vand.u32 2147483647, %v932_v32  ;;  %v1378_v21 = vld [vmem:[#allocation2] sm:$0xfe]  ;;  %5946 = vst [vmem:[#allocation33_spill] sm:$0xff] %v4524_v16 }
  0xff   : > { %v4316_v30 = vsel %vm1117_vm12, %v1120_v47, %v1127_v17  ;;  %1162 = vst [vmem:[#allocation2 + $0x60] sm:$0x1] %v1127_v17  ;;  %v1096_v35 = vmul.f32 %v1071_v25, %v4173_v50  ;;  %3516 = vpow2.f32 %v3196_v39  ;;  %v1218_v47 = vsel %vm1217_vm5, %v4073_v28, %v4102_v54 }
 0x100   : > { %v4321_v29 = vmul.f32 %v4268_v7, %v4316_v30  ;;  %v4325_v46 = vmul.f32 %v4308_v45, %v4316_v30  ;;  %v1227_v42 = vmul.f32 %v1218_v47, %v4328_v48  ;;  %v1009_v44 = vand.u32 2147483648, %v932_v32 }
 0x101   : > { %v1129_v31 = vrot.slane %v1096_v35, 7  ;;  %vm1008_vm10 = vcmp.eq.f32.partialorder %v1007_v41, 8.507059e+37  ;;  %v4395_v54 = vsel %vm1217_vm5, %v4078_v34, %v4118_v60  ;;  %v4400_v17 = vsel %vm1158_vm15, %v4116_v59, %v4129_v10  ;;  %v4410_v35 = vld [vmem:[#allocation2 + $0x8] sm:$0xfe]  ;;  %v1380_v34 = vld [vmem:[#allocation2 + $0x10] sm:$0xfe] }
 0x102   : > { %1248 = vrot.lane.b32.xlu0 %v1227_v42, %s3628_s20  ;;  %v1010_v3 = vor.u32 1.1754944e-38, %v1009_v44  ;;  %5935 = vst [vmem:[#allocation25_spill] sm:$0xff] %v4395_v54  ;;  %v4408_v25 = vperm.slane %v4366_v27, 2  ;;  %v4421_v59 = vsel %vm1158_vm15, %v4129_v10, %v4202_v4  ;;  %v1228_v42 = vmul.f32 %v4376_v18, %v4390_v15  ;;  %v4453_v41 = vld [vmem:[#allocation2] sm:$0xff] }
 0x103   : > { %v4333_v50 = vsel %vm1117_vm12, %v1121_v8, %v1129_v31  ;;  %1163 = vst [vmem:[#allocation2 + $0x68] sm:$0x1] %v1129_v31  ;;  %v4433_v31 = vsel %vm1158_vm15, %v4261_v5, %v4289_v58  ;;  %v1232_v10 = vmul.f32 %v1218_v47, %v4295_v23  ;;  %v4445_v6 = vmul.f32 %v4388_v9, %v4410_v35  ;;  %v4493_v58 = vld [vmem:[#allocation2 + $0x18] sm:$0xff] }
 0x104   : > { %v3515_v13 = vpop.eup %3514  ;;  %5936 = vst [vmem:[#allocation26_spill] sm:$0xff] %v4410_v35  ;;  %v4451_v5 = vperm.slane %v4341_v40, 0  ;;  %v4456_v44 = vmul.f32 %v4408_v25, %v1380_v34  ;;  %v4459_v47 = vmul.f32 %v4218_v36, %v1380_v34  ;;  %1250 = vrot.lane.b32.xlu1 %v1228_v42, %s3628_s20  ;;  %v4484_v42 = vmul.f32 %v4139_v20, %v4287_v38 }
 0x105   : > { %v3517_v8 = vpop.eup %3516  ;;  %v999_v26 = vmul.f32 %v3515_v13, %v932_v32  ;;  %vm1004_vm8 = vweird.f32 %v3515_v13  ;;  %v4416_v32 = vsel %vm1217_vm5, %v4184_v0, %v4200_v11  ;;  %5938 = vst [vmem:[#allocation28_spill] sm:$0xff] %v4445_v6  ;;  %1258 = vrot.lane.b32.xlu2 %v1232_v10, %s3628_s20  ;;  %v4487_v10 = vmul.f32 %v4244_v53, %v1378_v21  ;;  %v1382_v11 = vld [vmem:[#allocation2 + $0x50] sm:$0x1] }
 0x106   : > { %v4355_v24 = vadd.f32 1.0, %v3517_v8  ;;  %vm4380_vm9 = vmor %vm1003_vm7, %vm1004_vm8  ;;  %5939 = vst [vmem:[#allocation29_spill] sm:$0xff] %v4453_v41  ;;  %v4499_v60 = vmul.f32 %v4426_v19, %v4295_v23  ;;  %v1229_v48 = vmul.f32 %v4395_v54, %v4493_v58  ;;  %v4538_v6 = vld [vmem:[#allocation2 + $0x50] sm:$0x3]  ;;  %vm1266_vm4 = vcmask 785408  }
 0x107   : > { %v1000_v49 = vsub.f32 1.0, %v999_v26  ;;  %v4441_v26 = vmul.f32 %v4385_v57, %v1378_v21  ;;  %5940 = vst [vmem:[#allocation30_spill] sm:$0xff] %v4456_v44  ;;  %v4613_v44 = vld [vmem:[#allocation2 + $0x18] sm:$0xfe] }
 0x108   : > { %3518 = vrcp.f32 %v4355_v24  ;;  %vm1078_vm13 = vweird.f32 %v4355_v24 }
 0x109   : > { %v1001_v61 = vmul.f32 %v3515_v13, %v1000_v49 }
 0x10a   : > { %v4357_v51 = vld [vmem:[#allocation2 + $0x68] sm:$0x3]  ;;  %1336 = vrot.lane.b32.xlu0 %v1315_v55, %s3626_s27  ;;  %v1084_v55 = vand.u32 2147483648, %v4355_v24 }
 0x10b   : > { %5928 = vst [vmem:[#allocation20_spill] sm:$0xff] %v4357_v51  ;;  %v4370_v52 = vmul.f32 %v4345_v62, %v4357_v51  ;;  %v1002_v14 = vadd.f32 %v3515_v13, %v1001_v61  ;;  %v4505_v61 = vmul.f32 %v4244_v53, %v4287_v38 }
 0x10c   : > { %1252 = vrot.lane.b32.xlu1 %v1229_v48, %s3628_s20  ;;  %v4581_v48 = vmul.f32 %v4451_v5, %v4538_v6 }
 0x10d   : > { %5931 = vst [vmem:[#allocation23_spill] sm:$0xff] %v4370_v52  ;;  %v1006_v39 = vsel %vm4380_vm9, %v3515_v13, %v1002_v14  ;;  %v4509_v52 = vld [vmem:[#allocation2 + $0x60] sm:$0x1] }
 0x10e   : > { %v1011_v0 = vsel %vm1008_vm10, %v1010_v3, %v1006_v39  ;;  %v4438_v8 = vpop.eup %3518  ;;  %v4473_v3 = vld [vmem:[#allocation2] sm:$0xfc]  ;;  %v1082_v39 = vand.u32 2147483647, %v4355_v24  ;;  %v1617_v54 = vmul.f32 %v4268_v7, %v4509_v52 }
 0x10f   : > { %v4448_v13 = vmul.f32 %v1011_v0, %v4298_v12  ;;  %v1074_v49 = vmul.f32 %v4438_v8, %v4355_v24  ;;  %v4466_v12 = vmul.f32 %v4268_v7, %v1380_v34  ;;  %5941 = vst [vmem:[#allocation31_spill] sm:$0xff] %v4473_v3  ;;  %vm1079_vm14 = vweird.f32 %v4438_v8 }
 0x110   : > { %v1226_v0 = vmul.f32 %v4073_v28, %v4453_v41  ;;  %v4480_v34 = vmul.f32 %v4139_v20, %v1378_v21  ;;  %v4514_v4 = vmul.f32 %v4451_v5, %v4473_v3  ;;  %vm4520_vm0 = vmor %vm1078_vm13, %vm1079_vm14  ;;  %vm4527_vm1 = vcmp.eq.f32.partialorder %v1082_v39, 8.507059e+37 }
 0x111   : > { %v1075_v14 = vsub.f32 1.0, %v1074_v49  ;;  %v5942_v49 = vrot.slane %v4448_v13, 7  ;;  %v1320_v3 = vmul.f32 %v4353_v43, %v4295_v23  ;;  %v4536_v24 = vmul.f32 %v4385_v57, %v1382_v11 }
 0x112   : > { %1246 = vrot.lane.b32.xlu0 %v1226_v0, %s3628_s20  ;;  %5943 = vst [vmem:[#allocation32_spill] sm:$0xff] %v4514_v4  ;;  %v1085_v0 = vor.u32 1.1754944e-38, %v1084_v55  ;;  %v4543_v55 = vsel %vm1217_vm5, %v4471_v2, %v4301_v56  ;;  %v1484_v39 = vmul.f32 %v4405_v22, %v4410_v35  ;;  %v4556_v4 = vld [vmem:[#allocation2 + $0x60] sm:$0x3]  ;;  %v4564_v35 = vmul.f32 %v4139_v20, %v1382_v11 }
 0x113   : > { %1153 = vst.msk [vmem:[#allocation2 + $0x20] sm:$0xfe] %vm1152_vm11, %v5942_v49  ;;  %v1076_v21 = vmul.f32 %v4438_v8, %v1075_v14  ;;  %v4507_v49 = vld [vmem:[#allocation2 + $0x58] sm:$0x1]  ;;  %1346 = vrot.lane.b32.xlu2 %v1320_v3, %s3626_s27  ;;  %v4571_v7 = vmul.f32 %v4308_v45, %v4524_v16  ;;  %v1654_v14 = vrot.slane %v1617_v54, 1  ;;  %v1642_v54 = vrot.slane %v4321_v29, 1 }
 0x114   : > { %v1616_v43 = vmul.f32 %v4426_v19, %v4507_v49  ;;  %v4567_v19 = vmul.f32 %v4244_v53, %v1382_v11  ;;  %v1314_v11 = vmul.f32 %v4076_v33, %v4453_v41  ;;  %v1821_v53 = vmul.f32 %v4308_v45, %v4556_v4 }
 0x115   : > { %v1077_v62 = vadd.f32 %v4438_v8, %v1076_v21  ;;  %v4549_v21 = vmul.f32 %v4405_v22, %v4295_v23 }
 0x116   : > { %v1652_v3 = vrot.slane %v1616_v43, 1  ;;  %v1846_v43 = vrot.slane %v4325_v46, 2  ;;  %v1490_v46 = vmul.f32 %v4218_v36, %v4316_v30 }
 0x117   : > { %v1081_v56 = vsel %vm4520_vm0, %v4438_v8, %v1077_v62  ;;  %v4577_v62 = vmul.f32 %v4388_v9, %v4507_v49  ;;  %v1516_v8 = vrot.slane %v1484_v39, 1  ;;  %v4603_v39 = vmul.f32 %v4376_v18, %v4316_v30 }
 0x118   : > { %v1086_v27 = vsel %vm4527_vm1, %v1085_v0, %v1081_v56  ;;  %v4589_v56 = vpop.permute.xlu1 %1799  ;;  %v5951_v18 = vrot.slane %v4549_v21, 1 }
 0x119   : > { %v1097_v20 = vmul.f32 %v1086_v27, %v4311_v37  ;;  %5949 = vst [vmem:[#allocation34_spill] sm:$0xff] %v4589_v56  ;;  %v4593_v37 = vperm.slane %v4341_v40, 2  ;;  %v1845_v27 = vrot.slane %v4571_v7, 2  ;;  %v4599_v45 = vsel %vm1217_vm5, %v4303_v63, %v4589_v56 }
 0x11a   : > { %1334 = vrot.lane.b32.xlu0 %v1314_v11, %s3626_s27  ;;  %v1316_v7 = vmul.f32 %v4400_v17, %v4390_v15  ;;  %v1858_v63 = vrot.slane %v1821_v53, 2  ;;  %v1518_v29 = vsel %vm1421_vm3, %v1516_v8, %v5951_v18  ;;  %v4631_v8 = vsel %vm1421_vm3, %v1642_v54, %v1654_v14 }
 0x11b   : > { %v1131_v0 = vrot.slane %v1097_v20, 7  ;;  %v5950_v20 = vrot.slane %v4448_v13, 7  ;;  %v1495_v13 = vmul.f32 %v4218_v36, %v4509_v52  ;;  %1540 = vrot.lane.b32.xlu2 %v1518_v29, %s3628_s20  ;;  %5953 = vst [vmem:[#allocation35_spill] sm:$0xff] %v4631_v8  ;;  %v1520_v18 = vrot.slane %v1490_v46, 1 }
 0x11c   : > { %1338 = vrot.lane.b32.xlu1 %v1316_v7, %s3626_s27  ;;  %v1486_v36 = vmul.f32 %v4416_v32, %v4613_v44  ;;  %v4635_v7 = vld [vmem:[#allocation2 + $0x68] sm:$0x1]  ;;  %v1491_v29 = vmul.f32 %v4416_v32, %v4333_v50 }
 0x11d   : > { %v1132_v11 = vsel %vm1117_vm12, %v5950_v20, %v1131_v0  ;;  %1165 = vst.msk [vmem:[#allocation2 + $0x70] sm:$0x1] %vm1164_vm2, %v1131_v0  ;;  %v5952_v0 = vrot.slane %v4499_v60, 1  ;;  %v1513_v20 = vrot.slane %v4480_v34, 1  ;;  %vm1747_vm12 = vcmask 1045504  }
 0x11e   : > { %1159 = vst.msk [vmem:[#allocation2 + $0x48] sm:$0xff] %vm1158_vm15, %v1132_v11  ;;  %v1514_v11 = vrot.slane %v4484_v42, 1  ;;  %v1532_v40 = vrot.slane %v1495_v13, 1  ;;  %v1613_v34 = vmul.f32 %v4433_v31, %v4333_v50  ;;  %v5954_v42 = vrot.slane %v4466_v12, 1 }
 0x11f   : > { %v1653_v53 = vsel %vm1421_vm3, %v5952_v0, %v1652_v3  ;;  %v1608_v3 = vmul.f32 %v4433_v31, %v4613_v44  ;;  %v1522_v13 = vrot.slane %v1486_v36, 1  ;;  %v5955_v0 = vrot.slane %v4459_v47, 1  ;;  %v4675_v36 = vld [vmem:[#allocation2 + $0x58] sm:$0x3] }
 0x120   : > { %v4646_v14 = vsel %vm1421_vm3, %v5954_v42, %v1642_v54  ;;  %v4649_v46 = vsel %vm1421_vm3, %v1520_v18, %v1532_v40  ;;  %v4657_v15 = vsel %vm1747_vm12, %v1846_v43, %v1858_v63  ;;  %v1523_v41 = vrot.slane %v1491_v29, 1  ;;  %v4663_v42 = vpop.permute.xlu0 %1917  ;;  %5957 = vst [vmem:[#allocation37_spill] sm:$0xff] %v4675_v36 }
 0x121   : > { %v4654_v56 = vsel %vm1421_vm3, %v5955_v0, %v1520_v18  ;;  %5956 = vst [vmem:[#allocation36_spill] sm:$0xff] %v4657_v15  ;;  %v1644_v8 = vrot.slane %v1608_v3, 1  ;;  %v1645_v12 = vrot.slane %v1613_v34, 1  ;;  %v1496_v54 = vmul.f32 %v4416_v32, %v4635_v7  ;;  %v4685_v3 = vpop.permute.xlu2 %1915 }
 0x122   : > { %1672 = vrot.lane.b32.xlu0 %v1653_v53, %s3626_s27  ;;  %v1618_v47 = vmul.f32 %v4433_v31, %v4635_v7  ;;  %v1812_v18 = vmul.f32 %v4599_v45, %v4348_v1  ;;  %v1817_v63 = vmul.f32 %v4599_v45, %v4333_v50  ;;  %v4673_v53 = vmul.f32 %v4593_v37, %v4524_v16 }
 0x123   : > { %v1317_v32 = vmul.f32 %v4421_v59, %v4493_v58  ;;  %v4680_v29 = vsel %vm1421_vm3, %v1522_v13, %v1523_v41  ;;  %v4683_v31 = vsel %vm1421_vm3, %v1644_v8, %v1645_v12  ;;  %v1515_v34 = vsel %vm1421_vm3, %v1513_v20, %v1514_v11 }
 0x124   : > { %v1528_v0 = vrot.slane %v4564_v35, 1  ;;  %v1534_v40 = vrot.slane %v1496_v54, 1  ;;  %v1656_v16 = vrot.slane %v1618_v47, 1  ;;  %v4692_v1 = vsel %vm1158_vm15, %v4685_v3, %v4663_v42  ;;  %1538 = vrot.lane.b32.xlu2 %v1515_v34, %s3628_s20 }
 0x125   : > { %1340 = vrot.lane.b32.xlu1 %v1317_v32, %s3626_s27  ;;  %v1848_v13 = vrot.slane %v1812_v18, 2  ;;  %v1849_v8 = vrot.slane %v1817_v63, 2  ;;  %v4697_v15 = vsel %vm1747_vm12, %v1845_v27, %v1846_v43  ;;  %v1407_v20 = vmul.f32 %v4408_v25, %v4509_v52 }
 0x126   : > { %5958 = vst [vmem:[#allocation38_spill] sm:$0xff] %v4697_v15  ;;  %v1942_v35 = vmul.f32 %v4692_v1, %v4675_v36  ;;  %v4704_v54 = vsel %vm1421_vm3, %v1523_v41, %v1534_v40  ;;  %v4707_v47 = vsel %vm1421_vm3, %v1645_v12, %v1656_v16  ;;  %v1635_v32 = vrot.slane %v4487_v10, 1 }
 0x127   : > { %v1636_v18 = vrot.slane %v4505_v61, 1  ;;  %v4712_v63 = vsel %vm1747_vm12, %v1848_v13, %v1849_v8  ;;  %v1822_v27 = vmul.f32 %v4599_v45, %v4357_v51  ;;  %v1529_v52 = vsel %vm1421_vm3, %v1514_v11, %v1528_v0 }
 0x128   : > { %v1820_v43 = vmul.f32 %v4543_v55, %v4675_v36  ;;  %v1422_v41 = vrot.slane %v4441_v26, 1  ;;  %v1401_v16 = vmul.f32 %v4385_v57, %v4287_v38  ;;  %v1733_v10 = vmul.f32 %v4593_v37, %v4556_v4  ;;  %v4734_v26 = vld [vmem:[%s5844_s4] ss:$8 sm:$0xf] }
 0x129   : > { %v1231_v12 = vmul.f32 %v4073_v28, %v4287_v38  ;;  %v4729_v45 = vmul.f32 %v4543_v55, %v4295_v23  ;;  %v1860_v11 = vrot.slane %v1822_v27, 2  ;;  %v1434_v57 = vrot.slane %v4536_v24, 1 }
 0x12a   : > { %1548 = vrot.lane.b32.xlu0 %v1529_v52, %s3628_s20  ;;  %v1423_v40 = vrot.slane %v1401_v16, 1  ;;  %v1727_v34 = vmul.f32 %v4451_v5, %v4287_v38  ;;  %v1760_v28 = vrot.slane %v4581_v48, 2  ;;  %v1637_v0 = vsel %vm1421_vm3, %v1635_v32, %v1636_v18  ;;  %v5959_v52 = vld [vmem:[#allocation32_spill] sm:$0xff] }
 0x12b   : > { %v4744_v13 = vsel %vm1747_vm12, %v1849_v8, %v1860_v11  ;;  %v1179_v27 = vperm.slane %v4734_v26, 3  ;;  %v1748_v36 = vrot.slane %v5959_v52, 2  ;;  %v1856_v51 = vrot.slane %v1820_v43, 2 }
 0x12c   : > { %v4749_v16 = vsel %vm1421_vm3, %v1422_v41, %v1423_v40  ;;  %v4752_v24 = vsel %vm1421_vm3, %v1423_v40, %v1434_v57  ;;  %v1749_v5 = vrot.slane %v1727_v34, 2  ;;  %v1438_v48 = vrot.slane %v1407_v20, 1  ;;  %1660 = vrot.lane.b32.xlu2 %v1637_v0, %s3626_s27 }
 0x12d   : > { %v4756_v15 = vmul.f32 %v4692_v1, %v4295_v23  ;;  %1256 = vrot.lane.b32.xlu1 %v1231_v12, %s3628_s20  ;;  %v4761_v8 = vmul.f32 %v1179_v27, %v4493_v58  ;;  %v1402_v32 = vmul.f32 %v4388_v9, %v4295_v23  ;;  %v1843_v43 = vrot.slane %v4729_v45, 2  ;;  %v5960_v58 = vld [vmem:[#allocation22_spill] sm:$0xff] }
 0x12e   : > { %v4767_v41 = vsel %vm1747_vm12, %v1749_v5, %v1760_v28  ;;  %v4770_v20 = vsel %vm1747_vm12, %v1748_v36, %v1749_v5  ;;  %v1403_v11 = vmul.f32 %v4408_v25, %v4316_v30  ;;  %v1754_v12 = vrot.slane %v4673_v53, 2  ;;  %v5964_v5 = vld [vmem:[#allocation30_spill] sm:$0xff] }
 0x12f   : > { %v1978_v40 = vrot.slane %v1942_v35, 2  ;;  %v1426_v57 = vrot.slane %v1402_v32, 1  ;;  %v1392_v34 = vperm.slane %v5960_v58, 3  ;;  %v1764_v0 = vrot.slane %v1733_v10, 2  ;;  %v5962_v35 = vld [vmem:[#allocation28_spill] sm:$0xff] }
 0x130   : > { %v1857_v23 = vsel %vm1747_vm12, %v1843_v43, %v1856_v51  ;;  %v1429_v9 = vrot.slane %v1403_v11, 1  ;;  %v1729_v28 = vmul.f32 %v4593_v37, %v4316_v30  ;;  %v1965_v36 = vrot.slane %v4756_v15, 2 }
 0x131   : > { %v5961_v25 = vrot.slane %v4577_v62, 1  ;;  %v5963_v52 = vrot.slane %v5962_v35, 1  ;;  %v4794_v51 = vmul.f32 %v1179_v27, %v4333_v50  ;;  %v1819_v37 = vmul.f32 %v4471_v2, %v4538_v6 }
 0x132   : > { %1876 = vrot.lane.b32.xlu0 %v1857_v23, %s3628_s20  ;;  %v5965_v15 = vrot.slane %v5964_v5, 1  ;;  %v4804_v62 = vsel %vm1421_vm3, %v1429_v9, %v1438_v48  ;;  %v1755_v11 = vrot.slane %v1729_v28, 2  ;;  %v1319_v58 = vmul.f32 %v4076_v33, %v4287_v38 }
 0x133   : > { %v4786_v53 = vsel %vm1421_vm3, %v1426_v57, %v5961_v25  ;;  %v4791_v10 = vsel %vm1421_vm3, %v5963_v52, %v1426_v57  ;;  %v1979_v57 = vsel %vm1747_vm12, %v1965_v36, %v1978_v40  ;;  %v1404_v27 = vmul.f32 %v1392_v34, %v4333_v50 }
 0x134   : > { %v4801_v32 = vsel %vm1421_vm3, %v5965_v15, %v1429_v9  ;;  %v1408_v23 = vmul.f32 %v1392_v34, %v4635_v7  ;;  %v1494_v25 = vmul.f32 %v4405_v22, %v4507_v49  ;;  %v1650_v35 = vrot.slane %v4567_v19, 1  ;;  %v4820_v9 = vld [vmem:[#allocation2 + $0x8] sm:$0xfc]  ;;  %1998 = vrot.lane.b32.xlu2 %v1979_v57, %s3626_s27  ;;  %v5966_v22 = vld [vmem:[#allocation18_spill] sm:$0xff] }
 0x135   : > { %v4815_v52 = vsel %vm1747_vm12, %v1754_v12, %v1755_v11  ;;  %v4818_v48 = vsel %vm1747_vm12, %v1755_v11, %v1764_v0  ;;  %1344 = vrot.lane.b32.xlu1 %v1319_v58, %s3626_s27  ;;  %v1432_v33 = vrot.slane %v1404_v27, 1  ;;  %v1400_v7 = vmul.f32 %v1392_v34, %v4613_v44  ;;  %v5967_v12 = vld [vmem:[#allocation21_spill] sm:$0xff]  ;;  %v5968_v0 = vld [vmem:[#allocation23_spill] sm:$0xff] }
 0x136   : > { %v1440_v40 = vrot.slane %v1408_v23, 1  ;;  %v1730_v49 = vmul.f32 %v5966_v22, %v4333_v50  ;;  %v1814_v19 = vmul.f32 %v4471_v2, %v4287_v38  ;;  %v1757_v28 = vrot.slane %v5967_v12, 2 }
 0x137   : > { %v1766_v5 = vrot.slane %v5968_v0, 2  ;;  %v1431_v11 = vrot.slane %v1400_v7, 1  ;;  %v1932_v57 = vmul.f32 %v4692_v1, %v4820_v9  ;;  %v1530_v27 = vrot.slane %v1494_v25, 1  ;;  %v5970_v1 = vld [vmem:[#allocation27_spill] sm:$0xff] }
 0x138   : > { %v4832_v15 = vsel %vm1421_vm3, %v1432_v33, %v1440_v40  ;;  %v1758_v58 = vrot.slane %v1730_v49, 2  ;;  %v1651_v44 = vsel %vm1421_vm3, %v1636_v18, %v1650_v35  ;;  %v1854_v34 = vrot.slane %v1819_v37, 2  ;;  %v5969_v49 = vld [vmem:[#allocation26_spill] sm:$0xff] }
 0x139   : > { %v4841_v23 = vsel %vm1421_vm3, %v1431_v11, %v1432_v33  ;;  %v1840_v22 = vrot.slane %v1814_v19, 2  ;;  %v1606_v25 = vmul.f32 %v5970_v1, %v5969_v49  ;;  %v1964_v12 = vrot.slane %v1932_v57, 2  ;;  %v5972_v33 = vld [vmem:[#allocation31_spill] sm:$0xff] }
 0x13a   : > { %1670 = vrot.lane.b32.xlu0 %v1651_v44, %s3626_s27  ;;  %v4844_v40 = vsel %vm1747_vm12, %v1758_v58, %v1766_v5  ;;  %v4847_v7 = vsel %vm1747_vm12, %v1757_v28, %v1758_v58  ;;  %v5971_v61 = vrot.slane %v4549_v21, 1  ;;  %v1931_v19 = vmul.f32 %v4685_v3, %v5972_v33  ;;  %v5973_v21 = vld [vmem:[#allocation25_spill] sm:$0xff] }
 0x13b   : > { %v1855_v37 = vsel %vm1747_vm12, %v1840_v22, %v1854_v34  ;;  %v1638_v35 = vrot.slane %v1606_v25, 1  ;;  %v1936_v28 = vmul.f32 %v4685_v3, %v4287_v38  ;;  %v1966_v0 = vsel %vm1747_vm12, %v1964_v12, %v1965_v36  ;;  %v1200_v25 = vld [vmem:[#allocation2 + $0x20] sm:$0xff]  ;;  %v5975_v12 = vld [vmem:[#allocation12_spill] sm:$0xff] }
 0x13c   : > { %v1531_v18 = vsel %vm1421_vm3, %v5971_v61, %v1530_v27  ;;  %1874 = vrot.lane.b32.xlu2 %v1855_v37, %s3628_s20  ;;  %v1234_v5 = vmul.f32 %v5973_v21, %v4333_v50  ;;  %v5974_v11 = vrot.slane %v4499_v60, 1  ;;  %v1810_v57 = vmul.f32 %v4543_v55, %v4820_v9  ;;  %v1920_v37 = vpop.permute.xlu1 %1919 }
 0x13d   : > { %1550 = vrot.lane.b32.xlu1 %v1531_v18, %s3628_s20  ;;  %v1961_v27 = vrot.slane %v1931_v19, 2  ;;  %v1962_v44 = vrot.slane %v1936_v28, 2  ;;  %v1322_v49 = vmul.f32 %v4421_v59, %v4333_v50  ;;  %v1809_v60 = vmul.f32 %v4471_v2, %v5972_v33  ;;  %v5978_v28 = vld [vmem:[#allocation36_spill] sm:$0xff] }
 0x13e   : > { %v1640_v58 = vsel %vm1421_vm3, %v1638_v35, %v5974_v11  ;;  %v1842_v34 = vrot.slane %v1810_v57, 2  ;;  %v1230_v61 = vmul.f32 %v5975_v12, %v1200_v25  ;;  %v1941_v59 = vmul.f32 %v4685_v3, %v4538_v6  ;;  %v4898_v6 = vpop.permute.xlu2 %1921 }
 0x13f   : > { %v1963_v36 = vsel %vm1747_vm12, %v1961_v27, %v1962_v44  ;;  %v1839_v1 = vrot.slane %v1809_v60, 2  ;;  %v1321_v45 = vmul.f32 %v4400_v17, %v4316_v30  ;;  %v1176_v60 = vperm.slane %v4734_v26, 0 }
 0x140   : > { %v1844_v55 = vsel %vm1747_vm12, %v1842_v34, %v1843_v43  ;;  %v1976_v43 = vrot.slane %v1941_v59, 2 }
 0x141   : > { %v1841_v2 = vsel %vm1747_vm12, %v1839_v1, %v1840_v22  ;;  %v5977_v22 = vld [vmem:[#allocation35_spill] sm:$0xff] }
 0x142   : > { %1988 = vrot.lane.b32.xlu0 %v1966_v0, %s3626_s27  ;;  %v1977_v18 = vsel %vm1747_vm12, %v1962_v44, %v1976_v43  ;;  %v1178_v43 = vperm.slane %v4734_v26, 2 }
 0x144   : > { %1262 = vrot.lane.b32.xlu2 %v1234_v5, %s3628_s20  ;;  %v1177_v5 = vperm.slane %v4734_v26, 1  ;;  %v5990_v26 = vld [vmem:[#allocation37_spill] sm:$0xff] }
 0x145   : > { %1662 = vrot.lane.b32.xlu1 %v1640_v58, %s3626_s27  ;;  %v5980_v58 = vld [vmem:[#allocation33_spill] sm:$0xff] }
 0x14a   : > { %1986 = vrot.lane.b32.xlu0 %v1963_v36, %s3626_s27 }
 0x14c   : > { %1350 = vrot.lane.b32.xlu2 %v1322_v49, %s3626_s27 }
 0x14d   : > { %1866 = vrot.lane.b32.xlu1 %v1844_v55, %s3628_s20  ;;  %v4946_v55 = vld [vmem:[#allocation2 + $0x48] sm:$0xff] }
 0x152   : > { %1260 = vrot.lane.b32.xlu0 %v4603_v39, %s3628_s20  ;;  %v5976_v39 = vld [vmem:[#allocation14_spill] sm:$0xff] }
 0x153   : > { %v1318_v3 = vmul.f32 %v5976_v39, %v1200_v25 }
 0x154   : > { %1254 = vrot.lane.b32.xlu2 %v1230_v61, %s3628_s20  ;;  %v1459_v61 = vld [vmem:[#allocation2 + $0x70] sm:$0x1] }
 0x155   : > { %1864 = vrot.lane.b32.xlu1 %v1841_v2, %s3628_s20  ;;  %v5983_v2 = vld [vmem:[#allocation20_spill] sm:$0xff] }
 0x15a   : > { %1348 = vrot.lane.b32.xlu0 %v1321_v45, %s3626_s27 }
 0x15c   : > { %1552 = vrot.lane.b32.xlu2 %v4649_v46, %s3628_s20  ;;  %v1924_v46 = vsel %vm1158_vm15, %v4663_v42, %v1920_v37 }
 0x15d   : > { %1996 = vrot.lane.b32.xlu1 %v1977_v18, %s3626_s27  ;;  %v1943_v33 = vmul.f32 %v1924_v46, %v4556_v4  ;;  %v5979_v4 = vld [vmem:[#allocation19_spill] sm:$0xff]  ;;  %v1933_v57 = vmul.f32 %v1924_v46, %v5980_v58 }
 0x15f   : > { %v4906_v17 = vpop.permute.xlu2 %1258  ;;  %v1980_v19 = vrot.slane %v1943_v33, 2  ;;  %v1967_v1 = vrot.slane %v1933_v57, 2 }
 0x162   : > { %1342 = vrot.lane.b32.xlu0 %v1318_v3, %s3626_s27  ;;  %v5984_v3 = vld [vmem:[#allocation29_spill] sm:$0xff] }
 0x164   : > { %1544 = vrot.lane.b32.xlu2 %v4680_v29, %s3628_s20  ;;  %v1938_v29 = vmul.f32 %v1924_v46, %v4316_v30 }
 0x165   : > { %1674 = vrot.lane.b32.xlu1 %v5977_v22, %s3626_s27  ;;  %v1184_v22 = vmul.f32 %v1176_v60, %v5984_v3  ;;  %v5988_v3 = vld [vmem:[#allocation34_spill] sm:$0xff] }
 0x16a   : > { %1542 = vrot.lane.b32.xlu0 %v4654_v56, %s3628_s20 }
 0x16c   : > { %1664 = vrot.lane.b32.xlu2 %v4646_v14, %s3626_s27  ;;  %v1968_v14 = vrot.slane %v1938_v29, 2 }
 0x16d   : > { %1666 = vrot.lane.b32.xlu1 %v4683_v31, %s3626_s27  ;;  %v4916_v35 = vpop.permute.xlu2 %1346  ;;  %v1925_v31 = vsel %vm1158_vm15, %v1920_v37, %v4898_v6  ;;  %v5985_v37 = vld [vmem:[#allocation13_spill] sm:$0xff] }
 0x16e   : > { %v1934_v0 = vmul.f32 %v1925_v31, %v5979_v4  ;;  %v1981_v21 = vsel %vm1747_vm12, %v1968_v14, %v1980_v19  ;;  %v1944_v45 = vmul.f32 %v1925_v31, %v5983_v2  ;;  %v4958_v46 = vmul.f32 %v5985_v37, %v4946_v55 }
 0x16f   : > { %v1497_v33 = vmul.f32 %v5985_v37, %v1459_v61  ;;  %v1969_v29 = vsel %vm1747_vm12, %v1967_v1, %v1968_v14  ;;  %v1235_v14 = vmul.f32 %v5975_v12, %v4946_v55  ;;  %v1458_v12 = vld [vmem:[#allocation2 + $0x20] sm:$0xfe] }
 0x170   : > { %v1970_v27 = vrot.slane %v1934_v0, 2  ;;  %v5986_v0 = vld [vmem:[#allocation24_spill] sm:$0xff] }
 0x171   : > { %v1536_v58 = vrot.slane %v1497_v33, 1 }
 0x172   : > { %1554 = vrot.lane.b32.xlu0 %v4704_v54, %s3628_s20  ;;  %v1939_v54 = vmul.f32 %v1925_v31, %v4333_v50  ;;  %v5982_v50 = vld [vmem:[#allocation16_spill] sm:$0xff] }
 0x173   : > { %v1185_v36 = vmul.f32 %v1177_v5, %v5982_v50 }
 0x174   : > { %v1249_v56 = vpop.permute.xlu0 %1248  ;;  %1676 = vrot.lane.b32.xlu2 %v4707_v47, %s3626_s27  ;;  %v1971_v44 = vrot.slane %v1939_v54, 2  ;;  %v5981_v47 = vld [vmem:[#allocation38_spill] sm:$0xff]  ;;  %v1186_v54 = vmul.f32 %v1178_v43, %v5986_v0 }
 0x175   : > { %1878 = vrot.lane.b32.xlu1 %v5978_v28, %s3628_s20  ;;  %v4928_v42 = vpop.permute.xlu2 %1540  ;;  %v1982_v28 = vrot.slane %v1944_v45, 2 }
 0x176   : > { %v1251_v34 = vpop.permute.xlu1 %1250 }
 0x177   : > { %v1268_v25 = vsel %vm1266_vm4, %v1249_v56, %v1251_v34 }
 0x178   : > { %v1284_v59 = vadd.f32 %v1268_v25, %v1185_v36  ;;  %v1983_v36 = vsel %vm1747_vm12, %v1971_v44, %v1982_v28 }
 0x17a   : > { %2000 = vrot.lane.b32.xlu0 %v1981_v21, %s3626_s27 }
 0x17c   : > { %v1337_v11 = vpop.permute.xlu0 %1336  ;;  %1868 = vrot.lane.b32.xlu2 %v5981_v47, %s3628_s20 }
 0x17d   : > { %1870 = vrot.lane.b32.xlu1 %v4712_v63, %s3628_s20  ;;  %v1972_v63 = vsel %vm1747_vm12, %v1970_v27, %v1971_v44 }
 0x17e   : > { %v4943_v49 = vpop.permute.xlu2 %1538  ;;  %v4966_v4 = vpop.permute.xlu1 %1252 }
 0x17f   : > { %v1269_v57 = vsel %vm1266_vm4, %v1251_v34, %v4966_v4 }
 0x180   : > { %v1285_v50 = vadd.f32 %v1269_v57, %v1186_v54  ;;  %v1784_v54 = vld [vmem:[#allocation2 + $0x20] sm:$0xfc] }
 0x182   : > { %1992 = vrot.lane.b32.xlu0 %v1972_v63, %s3626_s27  ;;  %v1785_v63 = vld [vmem:[#allocation2 + $0x70] sm:$0x3] }
 0x184   : > { %v1247_v18 = vpop.permute.xlu0 %1246  ;;  %1880 = vrot.lane.b32.xlu2 %v4744_v13, %s3628_s20  ;;  %v5987_v13 = vld [vmem:[#allocation15_spill] sm:$0xff] }
 0x185   : > { %v1267_v19 = vsel %vm1266_vm4, %v1247_v18, %v1249_v56  ;;  %1990 = vrot.lane.b32.xlu1 %v1969_v29, %s3626_s27  ;;  %v1526_v56 = vrot.slane %v4958_v46, 1  ;;  %v1614_v27 = vmul.f32 %v5987_v13, %v4946_v55  ;;  %v1619_v47 = vmul.f32 %v5987_v13, %v1459_v61 }
 0x186   : > { %v1283_v31 = vadd.f32 %v1267_v19, %v1184_v22  ;;  %v4971_v21 = vpop.permute.xlu2 %1660  ;;  %v1609_v34 = vmul.f32 %v5987_v13, %v1458_v12  ;;  %v1823_v22 = vmul.f32 %v5988_v3, %v1785_v63  ;;  %v1818_v29 = vmul.f32 %v5988_v3, %v4946_v55 }
 0x187   : > { %v1537_v1 = vsel %vm1421_vm3, %v1526_v56, %v1536_v58  ;;  %v1648_v45 = vrot.slane %v1614_v27, 1  ;;  %v1658_v18 = vrot.slane %v1619_v47, 1 }
 0x188   : > { %v1647_v0 = vrot.slane %v1609_v34, 1  ;;  %v1852_v13 = vrot.slane %v1818_v29, 2  ;;  %v1862_v27 = vrot.slane %v1823_v22, 2  ;;  %v1945_v34 = vmul.f32 %v4898_v6, %v1785_v63 }
 0x189   : > { %v1659_v28 = vsel %vm1421_vm3, %v1648_v45, %v1658_v18  ;;  %v1935_v18 = vmul.f32 %v4898_v6, %v1784_v54 }
 0x18a   : > { %1264 = vrot.lane.b32.xlu0 %v1235_v14, %s3628_s20  ;;  %v1649_v57 = vsel %vm1421_vm3, %v1647_v0, %v1648_v45  ;;  %v1984_v29 = vrot.slane %v1945_v34, 2 }
 0x18c   : > { %v1335_v25 = vpop.permute.xlu0 %1334  ;;  %1556 = vrot.lane.b32.xlu2 %v1537_v1, %s3628_s20 }
 0x18d   : > { %v1354_v2 = vsel %vm1158_vm15, %v1335_v25, %v1337_v11  ;;  %2002 = vrot.lane.b32.xlu1 %v1983_v36, %s3626_s27  ;;  %v1863_v36 = vsel %vm1747_vm12, %v1852_v13, %v1862_v27 }
 0x18e   : > { %v1370_v61 = vadd.f32 %v1354_v2, %v1283_v31  ;;  %v1339_v46 = vpop.permute.xlu1 %1338  ;;  %v4992_v33 = vpop.permute.xlu2 %1998  ;;  %v1323_v31 = vmul.f32 %v5976_v39, %v4946_v55 }
 0x18f   : > { %v1355_v19 = vsel %vm1158_vm15, %v1337_v11, %v1339_v46  ;;  %v1487_v11 = vmul.f32 %v5985_v37, %v1458_v12  ;;  %v1940_v12 = vmul.f32 %v4898_v6, %v4946_v55 }
 0x190   : > { %v4990_v44 = vadd.f32 %v4749_v16, %v1370_v61  ;;  %v1371_v14 = vadd.f32 %v1355_v19, %v1284_v59  ;;  %v1813_v16 = vmul.f32 %v5988_v3, %v1784_v54 }
 0x191   : > { %v1525_v2 = vrot.slane %v1487_v11, 1 }
 0x192   : > { %1678 = vrot.lane.b32.xlu0 %v1659_v28, %s3626_s27  ;;  %v1851_v1 = vrot.slane %v1813_v16, 2  ;;  %v5017_v45 = vadd.f32 %v4791_v10, %v1371_v14  ;;  %v1973_v10 = vrot.slane %v1935_v18, 2  ;;  %v1188_v28 = vmul.f32 %v1176_v60, %v4287_v38 }
 0x193   : > { %v1527_v61 = vsel %vm1421_vm3, %v1525_v2, %v1526_v56 }
 0x194   : > { %v5001_v58 = vpop.permute.xlu0 %1672  ;;  %1668 = vrot.lane.b32.xlu2 %v1649_v57, %s3626_s27  ;;  %v1853_v3 = vsel %vm1747_vm12, %v1851_v1, %v1852_v13 }
 0x195   : > { %1352 = vrot.lane.b32.xlu1 %v1323_v31, %s3626_s27 }
 0x196   : > { %v5010_v47 = vpop.permute.xlu2 %1874 }
 0x197   : > { %v5008_v59 = vpop.permute.xlu1 %1340 }
 0x198   : > { %v1356_v39 = vsel %vm1158_vm15, %v1339_v46, %v5008_v59  ;;  %v1974_v46 = vrot.slane %v1940_v12, 2 }
 0x199   : > { %v1372_v25 = vadd.f32 %v1356_v39, %v1285_v50 }
 0x19a   : > { %1882 = vrot.lane.b32.xlu0 %v1863_v36, %s3628_s20  ;;  %v1975_v56 = vsel %vm1747_vm12, %v1973_v10, %v1974_v46  ;;  %v1985_v63 = vsel %vm1747_vm12, %v1974_v46, %v1984_v29 }
 0x19b   : > { %v5030_v19 = vadd.f32 %v4801_v32, %v1372_v25  ;;  %v1558_v25 = vsel %vm1266_vm4, %v4943_v49, %v4928_v42  ;;  %v5081_v49 = vld [vmem:[%s5845_s5] sm:$0xf] }
 0x19c   : > { %v1549_v37 = vpop.permute.xlu0 %1548  ;;  %1872 = vrot.lane.b32.xlu2 %v1853_v3, %s3628_s20  ;;  %v1574_v2 = vadd.f32 %v1558_v25, %v4990_v44  ;;  %v5989_v25 = vld [vmem:[#allocation17_spill] sm:$0xff] }
 0x19d   : > { %1546 = vrot.lane.b32.xlu1 %v1527_v61, %s3628_s20  ;;  %s2953_s20 = sshll.u32 %s2950_s21, 4  ;;  %s2954_s20 = int_to_ptr.hbm [resolvable:$true] %s2953_s20 }
 0x19e   : > { %v5027_v22 = vpop.permute.xlu2 %1262 }
 0x19f   : > { %v1257_v50 = vpop.permute.xlu1 %1256 }
 0x1a0   : > { %v1271_v6 = vsel %vm1266_vm4, %v1257_v50, %v4906_v17 }
 0x1a1   : > { %v1287_v0 = vadd.f32 %v1271_v6, %v1188_v28 }
 0x1a4   : > { %v5032_v55 = vpop.permute.xlu0 %1876  ;;  %2004 = vrot.lane.b32.xlu2 %v1985_v63, %s3626_s27 }
 0x1a5   : > { %1994 = vrot.lane.b32.xlu1 %v1975_v56, %s3626_s27 }
 0x1a6   : > { %v5043_v54 = vpop.permute.xlu2 %1350 }
 0x1a7   : > { %v1345_v32 = vpop.permute.xlu1 %1344 }
 0x1a8   : > { %v1358_v14 = vsel %vm1158_vm15, %v1345_v32, %v4916_v35 }
 0x1a9   : > { %v1374_v31 = vadd.f32 %v1358_v14, %v1287_v0  ;;  %v1888_v0 = vsel %vm1266_vm4, %v5010_v47, %v5032_v55 }
 0x1ab   : > { %v1454_v16 = vadd.f32 %v4752_v24, %v1374_v31 }
 0x1ac   : > { %v1671_v57 = vpop.permute.xlu0 %1670 }
 0x1ad   : > { %v1684_v60 = vsel %vm1158_vm15, %v1671_v57, %v5001_v58 }
 0x1ae   : > { %v1255_v27 = vpop.permute.xlu2 %1254 }
 0x1af   : > { %v5048_v13 = vpop.permute.xlu1 %1550  ;;  %v1270_v11 = vsel %vm1266_vm4, %v4966_v4, %v1255_v27 }
 0x1b0   : > { %v1562_v38 = vsel %vm1266_vm4, %v1549_v37, %v5048_v13  ;;  %v5057_v36 = vadd.f32 %v1270_v11, %v4761_v8  ;;  %v3560_v11 = vld [vmem:[#allocation2 + $0x30] sm:$0xff] }
 0x1b1   : > { %v1578_v39 = vadd.f32 %v1562_v38, %v1454_v16  ;;  %v1189_v47 = vmul.f32 %v3560_v11, %v1177_v5 }
 0x1b3   : > { %v1700_v1 = vadd.f32 %v1684_v60, %v1578_v39  ;;  %v1190_v39 = vmul.f32 %v1178_v43, %v4316_v30  ;;  %v2267_v30 = vld [vmem:[%s5847_s7 + $0x68] sm:$0xff] }
 0x1b4   : > { %v5069_v12 = vpop.permute.xlu0 %1988 }
 0x1b5   : > { %v1780_v24 = vadd.f32 %v4767_v41, %v1700_v1 }
 0x1b6   : > { %v5071_v8 = vpop.permute.xlu2 %1552 }
 0x1b7   : > { %v5064_v18 = vpop.permute.xlu1 %1662  ;;  %v1904_v31 = vadd.f32 %v1888_v0, %v1780_v24  ;;  %v2269_v24 = vld [vmem:[%s5847_s7 + $0x78] sm:$0xff] }
 0x1b8   : > { %v1680_v37 = vsel %vm1158_vm15, %v4971_v21, %v5064_v18  ;;  %v5086_v21 = vld [vmem:[%s5846_s6] sm:$0xf]  ;;  %2318 = vmatpush.msrb.mxu1 %v2269_v24 }
 0x1b9   : > { %v1696_v4 = vadd.f32 %v1680_v37, %v1574_v2  ;;  %v2050_v29 = vperm.slane %v5086_v21, 0  ;;  %v1716_v2 = vperm.slane %v5989_v25, 1 }
 0x1bb   : > { %v1776_v34 = vadd.f32 %v4770_v20, %v1696_v4  ;;  %v2032_v20 = vperm.slane %v5081_v49, 0  ;;  %v1732_v43 = vmul.f32 %v1716_v2, %v5990_v26 }
 0x1bc   : > { %v1987_v61 = vpop.permute.xlu0 %1986 }
 0x1bd   : > { %v2006_v46 = vsel %vm1158_vm15, %v1987_v61, %v5069_v12 }
 0x1be   : > { %v5076_v3 = vpop.permute.xlu2 %1544 }
 0x1bf   : > { %v5074_v41 = vpop.permute.xlu1 %1866 }
 0x1c4   : > { %v1261_v63 = vpop.permute.xlu0 %1260 }
 0x1c5   : > { %v1272_v38 = vsel %vm1266_vm4, %v4906_v17, %v1261_v63  ;;  %v1273_v60 = vsel %vm1266_vm4, %v1261_v63, %v5027_v22  ;;  %v2268_v17 = vld [vmem:[%s5847_s7 + $0x70] sm:$0xff] }
 0x1c6   : > { %v5094_v28 = vpop.permute.xlu2 %1664  ;;  %v1288_v37 = vadd.f32 %v1272_v38, %v1189_v47  ;;  %v1289_v4 = vadd.f32 %v1273_v60, %v1190_v39  ;;  %2319 = vmatpush.msrb.mxu1 %v2268_v17 }
 0x1c7   : > { %v1865_v44 = vpop.permute.xlu1 %1864 }
 0x1c8   : > { %v1884_v50 = vsel %vm1266_vm4, %v1865_v44, %v5074_v41  ;;  %2320 = vmatpush.msrb.mxu1 %v2267_v30 }
 0x1c9   : > { %v1900_v10 = vadd.f32 %v1884_v50, %v1776_v34 }
 0x1cb   : > { %v2022_v6 = vadd.f32 %v2006_v46, %v1900_v10 }
 0x1cc   : > { %v1349_v5 = vpop.permute.xlu0 %1348 }
 0x1cd   : > { %v2040_v56 = vmul.f32 %v2032_v20, %v2022_v6  ;;  %v1359_v61 = vsel %vm1158_vm15, %v4916_v35, %v1349_v5  ;;  %v1360_v44 = vsel %vm1158_vm15, %v1349_v5, %v5043_v54  ;;  %v2266_v6 = vld [vmem:[%s5847_s7 + $0x60] sm:$0xff] }
 0x1ce   : > { %v1376_v10 = vadd.f32 %v1360_v44, %v1289_v4  ;;  %v5131_v46 = vpop.permute.xlu2 %1676  ;;  %2321 = vmatpush.msrb.mxu1 %v2266_v6 }
 0x1cf   : > { %v5099_v32 = vadd.f32 %v2050_v29, %v2040_v56  ;;  %v1997_v14 = vpop.permute.xlu1 %1996  ;;  %v1728_v56 = vmul.f32 %v3560_v11, %v1716_v2 }
 0x1d0   : > { %v2010_v16 = vsel %vm1158_vm15, %v1997_v14, %v4992_v33  ;;  %v1456_v0 = vadd.f32 %v4804_v62, %v1376_v10  ;;  %v2265_v14 = vld [vmem:[%s5847_s7 + $0x58] sm:$0xff] }
 0x1d1   : > { %v3205_v57 = vmul.f32 -1.442695, %v5099_v32  ;;  %v2026_v27 = vadd.f32 %v2010_v16, %v1904_v31  ;;  %v1762_v31 = vrot.slane %v1732_v43, 2  ;;  %v1563_v16 = vsel %vm1266_vm4, %v5048_v13, %v5071_v8  ;;  %2322 = vmatpush.msrb.mxu1 %v2265_v14  ;;  %v2263_v13 = vld [vmem:[%s5847_s7 + $0x48] sm:$0xff] }
 0x1d2   : > { %v1752_v62 = vrot.slane %v1728_v56, 2 }
 0x1d3   : > { %3520 = vpow2.f32 %v3205_v57  ;;  %v2044_v1 = vmul.f32 %v2032_v20, %v2026_v27  ;;  %v1375_v20 = vadd.f32 %v1359_v61, %v1288_v37 }
 0x1d4   : > { %v1343_v11 = vpop.permute.xlu0 %1342  ;;  %v1763_v47 = vsel %vm1747_vm12, %v1752_v62, %v1762_v31 }
 0x1d5   : > { %v5120_v34 = vadd.f32 %v2050_v29, %v2044_v1  ;;  %v1455_v35 = vadd.f32 %v4786_v53, %v1375_v20  ;;  %v2264_v53 = vld [vmem:[%s5847_s7 + $0x50] sm:$0xff]  ;;  %v1357_v17 = vsel %vm1158_vm15, %v5008_v59, %v1343_v11  ;;  %v1724_v20 = vmul.f32 %v1716_v2, %v4820_v9 }
 0x1d6   : > { %2323 = vmatpush.msrb.mxu1 %v2264_v53  ;;  %v5163_v25 = vpop.permute.xlu2 %1868  ;;  %v1373_v4 = vadd.f32 %v1357_v17, %v5057_v36 }
 0x1d7   : > { %v3209_v50 = vmul.f32 -1.442695, %v5120_v34  ;;  %v5133_v29 = vpop.permute.xlu1 %1674  ;;  %v1579_v38 = vadd.f32 %v1563_v16, %v1455_v35 }
 0x1d8   : > { %v1685_v27 = vsel %vm1158_vm15, %v5001_v58, %v5133_v29  ;;  %2324 = vmatpush.msrb.mxu1 %v2263_v13  ;;  %v5175_v59 = vadd.f32 %v4841_v23, %v1373_v4  ;;  %v1681_v23 = vsel %vm1158_vm15, %v5064_v18, %v5094_v28 }
 0x1d9   : > { %v3521_v63 = vpop.eup %3520  ;;  %3522 = vpow2.f32 %v3209_v50  ;;  %v1701_v60 = vadd.f32 %v1685_v27, %v1579_v38 }
 0x1da   : > { %v5146_v57 = vadd.f32 1.0, %v3521_v63 }
 0x1db   : > { %v1781_v1 = vadd.f32 %v1763_v47, %v1701_v60 }
 0x1dc   : > { %3524 = vrcp.f32 %v5146_v57  ;;  %v1543_v5 = vpop.permute.xlu0 %1542  ;;  %v2109_v13 = vand.u32 2147483648, %v5146_v57  ;;  %vm2103_vm9 = vweird.f32 %v5146_v57 }
 0x1dd   : > { %v1559_v26 = vsel %vm1266_vm4, %v4928_v42, %v1543_v5  ;;  %v1560_v43 = vsel %vm1266_vm4, %v1543_v5, %v5076_v3 }
 0x1de   : > { %v1576_v61 = vadd.f32 %v1560_v43, %v5030_v19  ;;  %v1575_v42 = vadd.f32 %v1559_v26, %v5017_v45  ;;  %v5182_v35 = vpop.permute.xlu2 %1880  ;;  %v1751_v19 = vrot.slane %v1724_v20, 2  ;;  %v2110_v43 = vor.u32 1.1754944e-38, %v2109_v13 }
 0x1df   : > { %v3523_v58 = vpop.eup %3522  ;;  %v5159_v39 = vpop.permute.xlu1 %1666 }
 0x1e0   : > { %v2094_v24 = vadd.f32 1.0, %v3523_v58  ;;  %v1682_v10 = vsel %vm1158_vm15, %v5094_v28, %v5159_v39  ;;  %v1697_v2 = vadd.f32 %v1681_v23, %v1575_v42  ;;  %v1753_v38 = vsel %vm1747_vm12, %v1751_v19, %v1752_v62 }
 0x1e1   : > { %v1698_v56 = vadd.f32 %v1682_v10, %v1576_v61  ;;  %v2051_v61 = vperm.slane %v5086_v21, 1 }
 0x1e2   : > { %3526 = vrcp.f32 %v2094_v24  ;;  %v3525_v37 = vpop.eup %3524  ;;  %v1777_v11 = vadd.f32 %v1753_v38, %v1697_v2  ;;  %vm2163_vm8 = vweird.f32 %v2094_v24  ;;  %v2167_v47 = vand.u32 2147483647, %v2094_v24 }
 0x1e3   : > { %v2099_v30 = vmul.f32 %v3525_v37, %v5146_v57  ;;  %v1778_v14 = vadd.f32 %v4815_v52, %v1698_v56  ;;  %vm2104_vm7 = vweird.f32 %v3525_v37  ;;  %v2169_v52 = vand.u32 2147483648, %v2094_v24 }
 0x1e4   : > { %v5188_v31 = vpop.permute.xlu0 %1554  ;;  %vm5209_vm11 = vmor %vm2103_vm9, %vm2104_vm7  ;;  %vm2168_vm13 = vcmp.eq.f32.partialorder %v2167_v47, 8.507059e+37  ;;  %v2258_v47 = vld [vmem:[%s5847_s7 + $0x20] sm:$0xff] }
 0x1e5   : > { %v2100_v6 = vsub.f32 1.0, %v2099_v30  ;;  %v1564_v45 = vsel %vm1266_vm4, %v5071_v8, %v5188_v31  ;;  %v2107_v8 = vand.u32 2147483647, %v5146_v57  ;;  %v2033_v57 = vperm.slane %v5081_v49, 1 }
 0x1e6   : > { %v1580_v60 = vadd.f32 %v1564_v45, %v1456_v0  ;;  %v1686_v0 = vsel %vm1158_vm15, %v5133_v29, %v5131_v46  ;;  %v5215_v4 = vpop.permute.xlu2 %1556  ;;  %v2170_v26 = vor.u32 1.1754944e-38, %v2169_v52 }
 0x1e7   : > { %v5172_v44 = vpop.permute.xlu1 %1878  ;;  %v2101_v16 = vmul.f32 %v3525_v37, %v2100_v6  ;;  %vm2108_vm14 = vcmp.eq.f32.partialorder %v2107_v8, 8.507059e+37  ;;  %v2257_v8 = vld [vmem:[%s5847_s7 + $0x18] sm:$0xff] }
 0x1e8   : > { %v3527_v50 = vpop.eup %3526  ;;  %v1889_v28 = vsel %vm1266_vm4, %v5032_v55, %v5172_v44  ;;  %v1702_v17 = vadd.f32 %v1686_v0, %v1580_v60  ;;  %v1890_v52 = vsel %vm1266_vm4, %v5172_v44, %v5182_v35 }
 0x1e9   : > { %v2159_v36 = vmul.f32 %v3527_v50, %v2094_v24  ;;  %vm2164_vm6 = vweird.f32 %v3527_v50  ;;  %v2102_v18 = vadd.f32 %v3525_v37, %v2101_v16  ;;  %v1905_v24 = vadd.f32 %v1889_v28, %v1781_v1 }
 0x1ea   : > { %vm5202_vm10 = vmor %vm2163_vm8, %vm2164_vm6  ;;  %v1782_v56 = vadd.f32 %v4818_v48, %v1702_v17 }
 0x1eb   : > { %v2160_v63 = vsub.f32 1.0, %v2159_v36  ;;  %v2106_v30 = vsel %vm5209_vm11, %v3525_v37, %v2102_v18  ;;  %v2262_v37 = vld [vmem:[%s5847_s7 + $0x40] sm:$0xff] }
 0x1ec   : > { %v2001_v5 = vpop.permute.xlu0 %2000  ;;  %v2111_v36 = vsel %vm2108_vm14, %v2110_v43, %v2106_v30  ;;  %2325 = vmatpush.msrb.mxu1 %v2262_v37  ;;  %v1906_v0 = vadd.f32 %v1890_v52, %v1782_v56  ;;  %v2255_v43 = vld [vmem:[%s5847_s7 + $0x8] sm:$0xff]  ;;  %v2254_v37 = vld [vmem:[%s5847_s7] sm:$0xff] }
 0x1ed   : > { %v2161_v9 = vmul.f32 %v3527_v50, %v2160_v63  ;;  %v2011_v29 = vsel %vm1158_vm15, %v4992_v33, %v2001_v5  ;;  %v2261_v33 = vld [vmem:[%s5847_s7 + $0x38] sm:$0xff]  ;;  %v5247_v48 = vmul.f32 %v2111_v36, %v5099_v32  ;;  %v2284_v36 = vld [vmem:[%s5847_s7 + $0xf0] sm:$0xff] }
 0x1ee   : > { %v2027_v20 = vadd.f32 %v2011_v29, %v1905_v24  ;;  %2326 = vmatpush.msrb.mxu1 %v2261_v33  ;;  %v5259_v60 = vpop.permute.xlu2 %1668  ;;  %v2256_v24 = vld [vmem:[%s5847_s7 + $0x10] sm:$0xff] }
 0x1ef   : > { %v5193_v27 = vpop.permute.xlu1 %1870  ;;  %v2162_v53 = vadd.f32 %v3527_v50, %v2161_v9  ;;  %v2260_v9 = vld [vmem:[%s5847_s7 + $0x30] sm:$0xff] }
 0x1f0   : > { %v2045_v10 = vmul.f32 %v2033_v57, %v2027_v20  ;;  %v1886_v63 = vsel %vm1266_vm4, %v5163_v25, %v5193_v27  ;;  %2327 = vmatpush.msrb.mxu1 %v2260_v9  ;;  %v2285_v20 = vld [vmem:[%s5847_s7 + $0xf8] sm:$0xff] }
 0x1f1   : > { %v2166_v55 = vsel %vm5202_vm10, %v3527_v50, %v2162_v53  ;;  %v1885_v50 = vsel %vm1266_vm4, %v5074_v41, %v5163_v25  ;;  %v1902_v16 = vadd.f32 %v1886_v63, %v1778_v14  ;;  %v2052_v53 = vperm.slane %v5086_v21, 2  ;;  %2338 = vmatpush.msrb.mxu2 %v2285_v20 }
 0x1f2   : > { %v2171_v1 = vsel %vm2168_vm13, %v2170_v26, %v2166_v55  ;;  %v1901_v6 = vadd.f32 %v1885_v50, %v1777_v11  ;;  %v5241_v23 = vadd.f32 %v2051_v61, %v2045_v10 }
 0x1f3   : > { %v5239_v19 = vmul.f32 %v2171_v1, %v5120_v34  ;;  %v2034_v34 = vperm.slane %v5081_v49, 2  ;;  %2339 = vmatpush.msrb.mxu2 %v2284_v36 }
 0x1f4   : > { %v3210_v25 = vmul.f32 -1.442695, %v5241_v23  ;;  %v5254_v38 = vpop.permute.xlu0 %1992 }
 0x1f5   : > { %v2226_v18 = vadd.f32 %v5239_v19, %v5247_v48 }
 0x1f6   : > { %3528 = vpow2.f32 %v3210_v25 }
 0x1f7   : > { %v1991_v42 = vpop.permute.xlu1 %1990  ;;  %v2227_v58 = vrot.slane %v2226_v18, 4 }
 0x1f8   : > { %v2007_v41 = vsel %vm1158_vm15, %v5069_v12, %v1991_v42  ;;  %v2259_v12 = vld [vmem:[%s5847_s7 + $0x28] sm:$0xff]  ;;  %v2008_v32 = vsel %vm1158_vm15, %v1991_v42, %v5254_v38 }
 0x1f9   : > { %v2023_v2 = vadd.f32 %v2007_v41, %v1901_v6  ;;  %v2024_v11 = vadd.f32 %v2008_v32, %v1902_v16  ;;  %2328 = vmatpush.msrb.mxu1 %v2259_v12  ;;  %v2283_v42 = vld [vmem:[%s5847_s7 + $0xe8] sm:$0xff]  ;;  %v1873_v6 = vpop.permute.xlu2 %1872  ;;  %v1565_v32 = vsel %vm1266_vm4, %v5188_v31, %v5215_v4 }
 0x1fa   : > { %2340 = vmatpush.msrb.mxu2 %v2283_v42 }
 0x1fb   : > { %v2041_v45 = vmul.f32 %v2033_v57, %v2023_v2  ;;  %v2042_v13 = vmul.f32 %v2034_v34, %v2024_v11  ;;  %2329 = vmatpush.msrb.mxu1 %v2258_v47  ;;  %v2228_v57 = vadd.f32 %v2227_v58, %v2226_v18  ;;  %v1683_v58 = vsel %vm1158_vm15, %v5159_v39, %v5259_v60 }
 0x1fc   : > { %v3529_v30 = vpop.eup %3528 }
 0x1fd   : > { %v5261_v14 = vadd.f32 %v2051_v61, %v2041_v45  ;;  %v5279_v55 = vadd.f32 %v2052_v53, %v2042_v13  ;;  %2330 = vmatpush.msrb.mxu1 %v2257_v8  ;;  %v1265_v61 = vpop.permute.xlu0 %1264  ;;  %v5291_v1 = vadd.f32 1.0, %v3529_v30 }
 0x1fe   : > { %v1274_v50 = vsel %vm1266_vm4, %v5027_v22, %v1265_v61  ;;  %v2035_v61 = vperm.slane %v5081_v49, 3 }
 0x1ff   : > { %v3206_v28 = vmul.f32 -1.442695, %v5261_v14  ;;  %v5275_v62 = vpop.permute.xlu1 %2002  ;;  %v3207_v26 = vmul.f32 -1.442695, %v5279_v55  ;;  %2331 = vmatpush.msrb.mxu1 %v2256_v24  ;;  %v1290_v63 = vadd.f32 %v1274_v50, %v4794_v51  ;;  %v2184_v4 = vand.u32 2147483648, %v5291_v1  ;;  %v2275_v50 = vld [vmem:[%s5847_s7 + $0xa8] sm:$0xff] }
 0x200   : > { %v2012_v44 = vsel %vm1158_vm15, %v2001_v5, %v5275_v62  ;;  %v2229_v5 = vrot.slane %v2228_v57, 2  ;;  %vm2178_vm0 = vweird.f32 %v5291_v1 }
 0x201   : > { %3530 = vpow2.f32 %v3206_v28  ;;  %v2028_v17 = vadd.f32 %v2012_v44, %v1906_v0  ;;  %2332 = vmatpush.msrb.mxu1 %v2255_v43  ;;  %v1887_v44 = vsel %vm1266_vm4, %v5193_v27, %v1873_v6  ;;  %v2005_v24 = vpop.permute.xlu2 %2004 }
 0x202   : > { %3532 = vpow2.f32 %v3207_v26  ;;  %v2230_v33 = vadd.f32 %v2229_v5, %v2228_v57  ;;  %v2053_v5 = vperm.slane %v5086_v21, 3 }
 0x203   : > { %v2046_v29 = vmul.f32 %v2034_v34, %v2028_v17  ;;  %3534 = vrcp.f32 %v5291_v1  ;;  %2333 = vmatpush.msrb.mxu1 %v2254_v37  ;;  %v2182_v17 = vand.u32 2147483647, %v5291_v1 }
 0x204   : > { %v2231_v41 = vrot.slane %v2230_v33, 1 }
 0x205   : > { %v5298_v10 = vadd.f32 %v2052_v53, %v2046_v29  ;;  %v1679_v53 = vpop.permute.xlu0 %1678  ;;  %vm5360_vm1 = vcmp.eq.f32.partialorder %v2182_v17, 8.507059e+37 }
 0x206   : > { %v2232_v25 = vadd.f32 %v2231_v41, %v2230_v33  ;;  %v1687_v52 = vsel %vm1158_vm15, %v5131_v46, %v1679_v53  ;;  %v2281_v53 = vld [vmem:[%s5847_s7 + $0xd8] sm:$0xff] }
 0x207   : > { %v3531_v22 = vpop.eup %3530  ;;  %v3211_v56 = vmul.f32 -1.442695, %v5298_v10  ;;  %v1353_v9 = vpop.permute.xlu1 %1352  ;;  %v2273_v41 = vld [vmem:[%s5847_s7 + $0x98] sm:$0xff] }
 0x208   : > { %v5309_v2 = vadd.f32 1.0, %v3531_v22  ;;  %v1361_v16 = vsel %vm1158_vm15, %v5043_v54, %v1353_v9  ;;  %v3533_v12 = vpop.eup %3532  ;;  %2334 = vmatmul.f32.vlgmr.msrb.gmra.mxu1 %v2232_v25  ;;  %v2282_v25 = vld [vmem:[%s5847_s7 + $0xe0] sm:$0xff] }
 0x209   : > { %3536 = vpow2.f32 %v3211_v56  ;;  %v1377_v45 = vadd.f32 %v1361_v16, %v1290_v63  ;;  %v5315_v51 = vpop.eup %3534  ;;  %v5320_v11 = vadd.f32 1.0, %v3533_v12  ;;  %2341 = vmatpush.msrb.mxu2 %v2282_v25  ;;  %v2316_v25 = vld [vmem:[%s5847_s7 + $0x1f0] sm:$0xff] }
 0x20a   : > { %3538 = vrcp.f32 %v5309_v2  ;;  %v2174_v54 = vmul.f32 %v5315_v51, %v5291_v1  ;;  %v2122_v26 = vand.u32 2147483647, %v5309_v2  ;;  %v2124_v39 = vand.u32 2147483648, %v5309_v2 }
 0x20b   : > { %v1457_v34 = vadd.f32 %v4832_v15, %v1377_v45  ;;  %3540 = vrcp.f32 %v5320_v11  ;;  %vm2118_vm2 = vweird.f32 %v5309_v2  ;;  %vm2133_vm6 = vweird.f32 %v5320_v11  ;;  %2342 = vmatpush.msrb.mxu2 %v2281_v53 }
 0x20c   : > { %v2175_v8 = vsub.f32 1.0, %v2174_v54  ;;  %vm5367_vm12 = vcmp.eq.f32.partialorder %v2122_v26, 8.507059e+37  ;;  %v2125_v42 = vor.u32 1.1754944e-38, %v2124_v39  ;;  %v2139_v12 = vand.u32 2147483648, %v5320_v11  ;;  %v2279_v26 = vld [vmem:[%s5847_s7 + $0xc8] sm:$0xff] }
 0x20d   : > { %v1581_v18 = vadd.f32 %v1565_v32, %v1457_v34  ;;  %v1883_v29 = vpop.permute.xlu0 %1882  ;;  %v2301_v32 = vld [vmem:[%s5847_s7 + $0x178] sm:$0xff]  ;;  %v2299_v39 = vld [vmem:[%s5847_s7 + $0x168] sm:$0xff] }
 0x20e   : > { %v2176_v27 = vmul.f32 %v5315_v51, %v2175_v8  ;;  %2358 = vmatpush.msrb.mxu3 %v2301_v32 }
 0x20f   : > { %v3537_v28 = vpop.eup %3536  ;;  %v1703_v15 = vadd.f32 %v1687_v52, %v1581_v18  ;;  %v1547_v13 = vpop.permute.xlu1 %1546 }
 0x210   : > { %v5327_v47 = vpop.eup %3538  ;;  %v5329_v0 = vadd.f32 1.0, %v3537_v28  ;;  %v1561_v31 = vsel %vm1266_vm4, %v5076_v3, %v1547_v13  ;;  %v2013_v3 = vsel %vm1158_vm15, %v5275_v62, %v2005_v24  ;;  %v1891_v62 = vsel %vm1266_vm4, %v5182_v35, %v1883_v29 }
 0x211   : > { %v2114_v46 = vmul.f32 %v5327_v47, %v5309_v2  ;;  %v1577_v57 = vadd.f32 %v1561_v31, %v5175_v59  ;;  %v1783_v60 = vadd.f32 %v4844_v40, %v1703_v15  ;;  %v5349_v43 = vpop.eup %3540  ;;  %v2185_v59 = vor.u32 1.1754944e-38, %v2184_v4 }
 0x212   : > { %3542 = vrcp.f32 %v5329_v0  ;;  %v2129_v40 = vmul.f32 %v5349_v43, %v5320_v11  ;;  %vm2119_vm3 = vweird.f32 %v5327_v47  ;;  %v2177_v56 = vadd.f32 %v5315_v51, %v2176_v27  ;;  %v2278_v27 = vld [vmem:[%s5847_s7 + $0xc0] sm:$0xff] }
 0x213   : > { %v2115_v30 = vsub.f32 1.0, %v2114_v46  ;;  %v1699_v36 = vadd.f32 %v1683_v58, %v1577_v57  ;;  %v1907_v37 = vadd.f32 %v1891_v62, %v1783_v60  ;;  %vm2179_vm4 = vweird.f32 %v5315_v51  ;;  %vm5376_vm7 = vmor %vm2118_vm2, %vm2119_vm3 }
 0x214   : > { %v2130_v22 = vsub.f32 1.0, %v2129_v40  ;;  %vm2134_vm8 = vweird.f32 %v5349_v43  ;;  %v2137_v2 = vand.u32 2147483647, %v5320_v11  ;;  %vm5405_vm9 = vmor %vm2178_vm0, %vm2179_vm4  ;;  %v2199_v13 = vand.u32 2147483648, %v5329_v0  ;;  %v2277_v40 = vld [vmem:[%s5847_s7 + $0xb8] sm:$0xff] }
 0x215   : > { %v2116_v20 = vmul.f32 %v5327_v47, %v2115_v30  ;;  %v2029_v63 = vadd.f32 %v2013_v3, %v1907_v37  ;;  %v1779_v54 = vadd.f32 %v4847_v7, %v1699_v36  ;;  %v2300_v7 = vld [vmem:[%s5847_s7 + $0x170] sm:$0xff]  ;;  %v2181_v8 = vsel %vm5405_vm9, %v5315_v51, %v2177_v56  ;;  %vm5426_vm10 = vmor %vm2133_vm6, %vm2134_vm8  ;;  %v2295_v36 = vld [vmem:[%s5847_s7 + $0x148] sm:$0xff] }
 0x216   : > { %v2131_v9 = vmul.f32 %v5349_v43, %v2130_v22  ;;  %v2197_v4 = vand.u32 2147483647, %v5329_v0  ;;  %2359 = vmatpush.msrb.mxu3 %v2300_v7  ;;  %vm2138_vm11 = vcmp.eq.f32.partialorder %v2137_v2, 8.507059e+37  ;;  %v2140_v24 = vor.u32 1.1754944e-38, %v2139_v12  ;;  %v2274_v22 = vld [vmem:[%s5847_s7 + $0xa0] sm:$0xff]  ;;  %v2317_v2 = vld [vmem:[%s5847_s7 + $0x1f8] sm:$0xff] }
 0x217   : > { %v2117_v35 = vadd.f32 %v5327_v47, %v2116_v20  ;;  %v2047_v34 = vmul.f32 %v2035_v61, %v2029_v63  ;;  %v1995_v18 = vpop.permute.xlu1 %1994  ;;  %vm2193_vm13 = vweird.f32 %v5329_v0  ;;  %v2200_v30 = vor.u32 1.1754944e-38, %v2199_v13  ;;  %v2272_v12 = vld [vmem:[%s5847_s7 + $0x90] sm:$0xff]  ;;  %2378 = vmatpush.msra.mxu0 %v2317_v2  ;;  %v2305_v2 = vld [vmem:[%s5847_s7 + $0x198] sm:$0xff] }
 0x218   : > { %v5371_v6 = vpop.eup %3542  ;;  %v2132_v28 = vadd.f32 %v5349_v43, %v2131_v9  ;;  %v2009_v1 = vsel %vm1158_vm15, %v5254_v38, %v1995_v18  ;;  %v1903_v38 = vadd.f32 %v1887_v44, %v1779_v54  ;;  %v2186_v44 = vsel %vm5360_vm1, %v2185_v59, %v2181_v8  ;;  %2360 = vmatpush.msrb.mxu3 %v2299_v39  ;;  %v2293_v9 = vld [vmem:[%s5847_s7 + $0x138] sm:$0xff]  ;;  %v2315_v54 = vld [vmem:[%s5847_s7 + $0x1e8] sm:$0xff]  ;;  %v2290_v8 = vld [vmem:[%s5847_s7 + $0x120] sm:$0xff] }
 0x219   : > { %v2189_v16 = vmul.f32 %v5371_v6, %v5329_v0  ;;  %v2121_v45 = vsel %vm5376_vm7, %v5327_v47, %v2117_v35  ;;  %v2280_v47 = vld [vmem:[%s5847_s7 + $0xd0] sm:$0xff]  ;;  %v5433_v58 = vadd.f32 %v2053_v5, %v2047_v34  ;;  %vm2194_vm15 = vweird.f32 %v5371_v6  ;;  %2379 = vmatpush.msra.mxu0 %v2316_v25 }
 0x21a   : > { %v2126_v46 = vsel %vm5367_vm12, %v2125_v42, %v2121_v45  ;;  %v2136_v51 = vsel %vm5426_vm10, %v5349_v43, %v2132_v28  ;;  %2343 = vmatpush.msrb.mxu2 %v2280_v47  ;;  %v2025_v3 = vadd.f32 %v2009_v1, %v1903_v38  ;;  %vm2195_vm14 = vmor %vm2193_vm13, %vm2194_vm15  ;;  %vm2198_vm0 = vcmp.eq.f32.partialorder %v2197_v4, 8.507059e+37  ;;  %v2292_v34 = vld [vmem:[%s5847_s7 + $0x130] sm:$0xff]  ;;  %v2271_v28 = vld [vmem:[%s5847_s7 + $0x88] sm:$0xff] }
 0x21b   : > { %v2190_v15 = vsub.f32 1.0, %v2189_v16  ;;  %v3212_v17 = vmul.f32 -1.442695, %v5433_v58  ;;  %v5454_v60 = vmul.f32 %v2126_v46, %v5261_v14  ;;  %v2141_v29 = vsel %vm2138_vm11, %v2140_v24, %v2136_v51  ;;  %v2298_v14 = vld [vmem:[%s5847_s7 + $0x160] sm:$0xff]  ;;  %2380 = vmatpush.msra.mxu0 %v2315_v54  ;;  %v2313_v46 = vld [vmem:[%s5847_s7 + $0x1d8] sm:$0xff]  ;;  %v2312_v24 = vld [vmem:[%s5847_s7 + $0x1d0] sm:$0xff] }
 0x21c   : > { %v2043_v0 = vmul.f32 %v2035_v61, %v2025_v3  ;;  %2344 = vmatpush.msrb.mxu2 %v2279_v26  ;;  %v5468_v62 = vmul.f32 %v2186_v44, %v5241_v23  ;;  %2361 = vmatpush.msrb.mxu3 %v2298_v14  ;;  %v5475_v61 = vmul.f32 %v2141_v29, %v5279_v55  ;;  %v2297_v23 = vld [vmem:[%s5847_s7 + $0x158] sm:$0xff]  ;;  %v2276_v55 = vld [vmem:[%s5847_s7 + $0xb0] sm:$0xff]  ;;  %v2314_v47 = vld [vmem:[%s5847_s7 + $0x1e0] sm:$0xff]  ;;  %vm2448_vm13 = vcmask 64512  }
 0x21d   : > { %v2191_v11 = vmul.f32 %v5371_v6, %v2190_v15  ;;  %3544 = vpow2.f32 %v3212_v17  ;;  %v2291_v15 = vld [vmem:[%s5847_s7 + $0x128] sm:$0xff]  ;;  %v2270_v1 = vld [vmem:[%s5847_s7 + $0x80] sm:$0xff]  ;;  %v2289_v51 = vld [vmem:[%s5847_s7 + $0x118] sm:$0xff]  ;;  %2381 = vmatpush.msra.mxu0 %v2314_v47 }
 0x21e   : > { %v5472_v49 = vadd.f32 %v2053_v5, %v2043_v0  ;;  %2345 = vmatpush.msrb.mxu2 %v2278_v27  ;;  %2362 = vmatpush.msrb.mxu3 %v2297_v23  ;;  %v2233_v5 = vadd.f32 %v5468_v62, %v5454_v60  ;;  %v2288_v17 = vld [vmem:[%s5847_s7 + $0x110] sm:$0xff]  ;;  %v2287_v26 = vld [vmem:[%s5847_s7 + $0x108] sm:$0xff]  ;;  %v2310_v0 = vld [vmem:[%s5847_s7 + $0x1c0] sm:$0xff] }
 0x21f   : > { %v2192_v57 = vadd.f32 %v5371_v6, %v2191_v11  ;;  %2382 = vmatpush.msra.mxu0 %v2313_v46  ;;  %v2286_v27 = vld [vmem:[%s5847_s7 + $0x100] sm:$0xff]  ;;  %v2309_v23 = vld [vmem:[%s5847_s7 + $0x1b8] sm:$0xff]  ;;  %v2304_v25 = vld [vmem:[%s5847_s7 + $0x190] sm:$0xff] }
 0x220   : > { %v3208_v21 = vmul.f32 -1.442695, %v5472_v49  ;;  %2346 = vmatpush.msrb.mxu2 %v2277_v40  ;;  %v2234_v33 = vrot.slane %v2233_v5, 4  ;;  %v2446_v46 = vld [vmem:[%s5850_s10] sm:$0xff] }
 0x221   : > { %v2196_v43 = vsel %vm2195_vm14, %v5371_v6, %v2192_v57  ;;  %v2294_v6 = vld [vmem:[%s5847_s7 + $0x140] sm:$0xff]  ;;  %v2311_v57 = vld [vmem:[%s5847_s7 + $0x1c8] sm:$0xff]  ;;  %2383 = vmatpush.msra.mxu0 %v2312_v24 }
 0x222   : > { %v2201_v59 = vsel %vm2198_vm0, %v2200_v30, %v2196_v43  ;;  %3546 = vpow2.f32 %v3208_v21  ;;  %2347 = vmatpush.msrb.mxu2 %v2276_v55  ;;  %v2235_v63 = vadd.f32 %v2234_v33, %v2233_v5  ;;  %v2307_v33 = vld [vmem:[%s5847_s7 + $0x1a8] sm:$0xff] }
 0x223   : > { %v5478_v20 = vmul.f32 %v2201_v59, %v5298_v10  ;;  %v2296_v10 = vld [vmem:[%s5847_s7 + $0x150] sm:$0xff]  ;;  %v3545_v35 = vpop.eup %3544  ;;  %2384 = vmatpush.msra.mxu0 %v2311_v57  ;;  %v2504_v21 = vld [vmem:[%s5852_s12 + $0x68] sm:$0xff] }
 0x224   : > { %2363 = vmatpush.msrb.mxu3 %v2296_v10  ;;  %v5503_v42 = vadd.f32 1.0, %v3545_v35  ;;  %2348 = vmatpush.msrb.mxu2 %v2275_v50  ;;  %v2236_v16 = vrot.slane %v2235_v63, 2 }
 0x225   : > { %v2240_v37 = vadd.f32 %v5478_v20, %v5475_v61  ;;  %2385 = vmatpush.msra.mxu0 %v2310_v0 }
 0x226   : > { %2364 = vmatpush.msrb.mxu3 %v2295_v36  ;;  %3548 = vrcp.f32 %v5503_v42  ;;  %2349 = vmatpush.msrb.mxu2 %v2274_v22  ;;  %v2237_v32 = vadd.f32 %v2236_v16, %v2235_v63  ;;  %v2214_v43 = vand.u32 2147483648, %v5503_v42  ;;  %vm2208_vm2 = vweird.f32 %v5503_v42  ;;  %v2308_v36 = vld [vmem:[%s5847_s7 + $0x1b0] sm:$0xff] }
 0x227   : > { %v2241_v56 = vrot.slane %v2240_v37, 4  ;;  %v2212_v59 = vand.u32 2147483647, %v5503_v42  ;;  %2386 = vmatpush.msra.mxu0 %v2309_v23  ;;  %v2505_v23 = vld [vmem:[%s5852_s12 + $0x70] sm:$0xff] }
 0x228   : > { %2365 = vmatpush.msrb.mxu3 %v2294_v6  ;;  %v3547_v53 = vpop.eup %3546  ;;  %2350 = vmatpush.msrb.mxu2 %v2273_v41  ;;  %v2238_v13 = vrot.slane %v2237_v32, 1 }
 0x229   : > { %v2242_v45 = vadd.f32 %v2241_v56, %v2240_v37  ;;  %v5533_v52 = vadd.f32 1.0, %v3547_v53  ;;  %v2215_v37 = vor.u32 1.1754944e-38, %v2214_v43  ;;  %vm2213_vm4 = vcmp.eq.f32.partialorder %v2212_v59, 8.507059e+37  ;;  %2387 = vmatpush.msra.mxu0 %v2308_v36  ;;  %v2306_v56 = vld [vmem:[%s5847_s7 + $0x1a0] sm:$0xff]  ;;  %v2497_v36 = vld [vmem:[%s5852_s12 + $0x30] sm:$0xff] }
 0x22a   : > { %2366 = vmatpush.msrb.mxu3 %v2293_v9  ;;  %2351 = vmatpush.msrb.mxu2 %v2272_v12  ;;  %v2239_v38 = vadd.f32 %v2238_v13, %v2237_v32 }
 0x22b   : > { %v2243_v18 = vrot.slane %v2242_v45, 2  ;;  %3550 = vrcp.f32 %v5533_v52  ;;  %v2154_v55 = vand.u32 2147483648, %v5533_v52  ;;  %v2152_v50 = vand.u32 2147483647, %v5533_v52  ;;  %2388 = vmatpush.msra.mxu0 %v2307_v33  ;;  %v2493_v33 = vld [vmem:[%s5852_s12 + $0x10] sm:$0xff] }
 0x22c   : > { %2367 = vmatpush.msrb.mxu3 %v2292_v34  ;;  %v3549_v7 = vpop.eup %3548  ;;  %2352 = vmatpush.msrb.mxu2 %v2271_v28  ;;  %vm2148_vm6 = vweird.f32 %v5533_v52  ;;  %v2399_v28 = vld [vmem:[%s5848_s8 + $0x8] sm:$0xff] }
 0x22d   : > { %v2244_v31 = vadd.f32 %v2243_v18, %v2242_v45  ;;  %v2204_v4 = vmul.f32 %v3549_v7, %v5503_v42  ;;  %vm2209_vm1 = vweird.f32 %v3549_v7  ;;  %v2155_v22 = vor.u32 1.1754944e-38, %v2154_v55  ;;  %2389 = vmatpush.msra.mxu0 %v2306_v56  ;;  %v2401_v18 = vld [vmem:[%s5848_s8 + $0x18] sm:$0xff]  ;;  %v2499_v55 = vld [vmem:[%s5852_s12 + $0x40] sm:$0xff] }
 0x22e   : > { %2368 = vmatpush.msrb.mxu3 %v2291_v15  ;;  %2353 = vmatpush.msrb.mxu2 %v2270_v1  ;;  %vm5583_vm3 = vmor %vm2208_vm2, %vm2209_vm1  ;;  %vm2153_vm8 = vcmp.eq.f32.partialorder %v2152_v50, 8.507059e+37  ;;  %v2398_v15 = vld [vmem:[%s5848_s8] sm:$0xff]  ;;  %v2506_v56 = vld [vmem:[%s5852_s12 + $0x78] sm:$0xff] }
 0x22f   : > { %v2205_v11 = vsub.f32 1.0, %v2204_v4  ;;  %2354 = vmatmul.f32.vlgmr.msrb.gmra.mxu2 %v2239_v38  ;;  %v2245_v3 = vrot.slane %v2244_v31, 1  ;;  %2390 = vmatpush.msra.mxu0 %v2305_v2  ;;  %v2402_v38 = vld [vmem:[%s5849_s9] sm:$0x1] }
 0x230   : > { %2369 = vmatpush.msrb.mxu3 %v2290_v8  ;;  %2418 = vmatpush.msra.mxu1 %v2401_v18  ;;  %v2495_v50 = vld [vmem:[%s5852_s12 + $0x20] sm:$0xff]  ;;  %v3426_v18 = vld [vmem:[%s5853_s13 + $0xf0] sm:$0xff] }
 0x231   : > { %v2206_v44 = vmul.f32 %v3549_v7, %v2205_v11  ;;  %v3551_v30 = vpop.eup %3550  ;;  %v2246_v14 = vadd.f32 %v2245_v3, %v2244_v31  ;;  %2391 = vmatpush.msra.mxu0 %v2304_v25  ;;  %2467 = vmatpush.msra.mxu2 %v2446_v46 }
 0x232   : > { %2370 = vmatpush.msrb.mxu3 %v2289_v51  ;;  %v2144_v29 = vmul.f32 %v3551_v30, %v5533_v52  ;;  %vm2149_vm12 = vweird.f32 %v3551_v30  ;;  %v2400_v52 = vld [vmem:[%s5848_s8 + $0x10] sm:$0xff] }
 0x233   : > { %v2207_v39 = vadd.f32 %v3549_v7, %v2206_v44  ;;  %vm2150_vm7 = vmor %vm2148_vm6, %vm2149_vm12  ;;  %2419 = vmatpush.msra.mxu1 %v2400_v52  ;;  %2562 = vmatpush.msrb.mxu2 %v2505_v23  ;;  %v3409_v52 = vld [vmem:[%s5853_s13 + $0x68] sm:$0xff] }
 0x234   : > { %2371 = vmatpush.msrb.mxu3 %v2288_v17  ;;  %v2145_v40 = vsub.f32 1.0, %v2144_v29  ;;  %v3413_v23 = vld [vmem:[%s5853_s13 + $0x88] sm:$0xff] }
 0x235   : > { %v2211_v10 = vsel %vm5583_vm3, %v3549_v7, %v2207_v39  ;;  %2420 = vmatpush.msra.mxu1 %v2399_v28  ;;  %v3401_v28 = vld [vmem:[%s5853_s13 + $0x28] sm:$0xff] }
 0x236   : > { %2372 = vmatpush.msrb.mxu3 %v2287_v26  ;;  %v2146_v5 = vmul.f32 %v3551_v30, %v2145_v40  ;;  %v2216_v42 = vsel %vm2213_vm4, %v2215_v37, %v2211_v10  ;;  %v2503_v40 = vld [vmem:[%s5852_s12 + $0x60] sm:$0xff]  ;;  %v2501_v10 = vld [vmem:[%s5852_s12 + $0x50] sm:$0xff]  ;;  %v2496_v37 = vld [vmem:[%s5852_s12 + $0x28] sm:$0xff] }
 0x237   : > { %v5602_v41 = vmul.f32 %v2216_v42, %v5433_v58  ;;  %v2303_v58 = vld [vmem:[%s5847_s7 + $0x188] sm:$0xff]  ;;  %2421 = vmatpush.msra.mxu1 %v2398_v15  ;;  %2563 = vmatpush.msrb.mxu2 %v2501_v10  ;;  %v3412_v10 = vld [vmem:[%s5853_s13 + $0x80] sm:$0xff] }
 0x238   : > { %2373 = vmatpush.msrb.mxu3 %v2286_v27  ;;  %v2147_v35 = vadd.f32 %v3551_v30, %v2146_v5  ;;  %2392 = vmatpush.msra.mxu0 %v2303_v58  ;;  %v2500_v5 = vld [vmem:[%s5852_s12 + $0x48] sm:$0xff]  ;;  %v3411_v58 = vld [vmem:[%s5853_s13 + $0x78] sm:$0xff] }
 0x239   : > { %2374 = vmatmul.f32.vlgmr.msrb.gmra.mxu3 %v2246_v14  ;;  %2542 = vmatpush.msrb.mxu1 %v2504_v21  ;;  %v2492_v42 = vld [vmem:[%s5852_s12 + $0x8] sm:$0xff]  ;;  %v3423_v21 = vld [vmem:[%s5853_s13 + $0xd8] sm:$0xff] }
 0x23a   : > { %v2151_v6 = vsel %vm2150_vm7, %v3551_v30, %v2147_v35  ;;  %2522 = vmatpush.msra.mxu3 %v2503_v40  ;;  %v2491_v35 = vld [vmem:[%s5852_s12] sm:$0xff]  ;;  %2564 = vmatpush.msrb.mxu2 %v2497_v36  ;;  %v3425_v15 = vld [vmem:[%s5853_s13 + $0xe8] sm:$0xff] }
 0x23b   : > { %v2156_v63 = vsel %vm2153_vm8, %v2155_v22, %v2151_v6  ;;  %2543 = vmatpush.msrb.mxu1 %v2500_v5  ;;  %v2447_v22 = vld [vmem:[%s5851_s11] sm:$0x1]  ;;  %v3397_v40 = vld [vmem:[%s5853_s13 + $0x8] sm:$0xff]  ;;  %v3422_v5 = vld [vmem:[%s5853_s13 + $0xd0] sm:$0xff] }
 0x23c   : > { %v5605_v9 = vmul.f32 %v2156_v63, %v5472_v49  ;;  %v2302_v49 = vld [vmem:[%s5847_s7 + $0x180] sm:$0xff]  ;;  %2523 = vmatpush.msra.mxu3 %v2499_v55  ;;  %2565 = vmatpush.msrb.mxu2 %v2493_v33  ;;  %v2502_v63 = vld [vmem:[%s5852_s12 + $0x58] sm:$0xff] }
 0x23d   : > { %2393 = vmatpush.msra.mxu0 %v2302_v49  ;;  %2544 = vmatpush.msrb.mxu1 %v2496_v37  ;;  %v3403_v49 = vld [vmem:[%s5853_s13 + $0x38] sm:$0xff]  ;;  %v3396_v55 = vld [vmem:[%s5853_s13] sm:$0xff] }
 0x23e   : > { %v2247_v16 = vadd.f32 %v5602_v41, %v5605_v9  ;;  %2524 = vmatpush.msra.mxu3 %v2495_v50  ;;  %v3421_v50 = vld [vmem:[%s5853_s13 + $0xc8] sm:$0xff]  ;;  %v3420_v36 = vld [vmem:[%s5853_s13 + $0xc0] sm:$0xff] }
 0x23f   : > { %2545 = vmatpush.msrb.mxu1 %v2492_v42 }
 0x240   : > { %v2248_v45 = vrot.slane %v2247_v16, 4  ;;  %2525 = vmatpush.msra.mxu3 %v2491_v35 }
 0x242   : > { %v2249_v12 = vadd.f32 %v2248_v45, %v2247_v16  ;;  %2582 = vmatpush.msrb.mxu3 %v2506_v56  ;;  %v2498_v16 = vld [vmem:[%s5852_s12 + $0x38] sm:$0xff] }
 0x243   : > { %v2494_v45 = vld [vmem:[%s5852_s12 + $0x18] sm:$0xff] }
 0x244   : > { %v2250_v34 = vrot.slane %v2249_v12, 2  ;;  %2583 = vmatpush.msrb.mxu3 %v2502_v63 }
 0x246   : > { %v2251_v53 = vadd.f32 %v2250_v34, %v2249_v12  ;;  %2584 = vmatpush.msrb.mxu3 %v2498_v16  ;;  %v3410_v12 = vld [vmem:[%s5853_s13 + $0x70] sm:$0xff] }
 0x247   : > { %v3402_v34 = vld [vmem:[%s5853_s13 + $0x30] sm:$0xff] }
 0x248   : > { %v2252_v32 = vrot.slane %v2251_v53, 1  ;;  %2585 = vmatpush.msrb.mxu3 %v2494_v45 }
 0x24a   : > { %v2253_v54 = vadd.f32 %v2252_v32, %v2251_v53  ;;  %v3427_v53 = vld [vmem:[%s5853_s13 + $0xf8] sm:$0xff] }
 0x24b   : > { %2904 = vmatpush.bf16.msrb.mxu0 %v3427_v53 }
 0x24c   : > { %2394 = vmatmul.f32.vlgmr.msra.gmra.mxu0 %v2253_v54 }
 0x24f   : > { %2905 = vmatpush.bf16.msrb.mxu0 %v3426_v18 }
 0x253   : > { %2906 = vmatpush.bf16.msrb.mxu0 %v3425_v15 }
 0x285   : > { %v2335_v47 = vpop.f32.mrf.mxu1 }
 0x2b2   : > { %v2355_v13 = vpop.f32.mrf.mxu2 }
 0x2b3   : > { %v2356_v1 = vadd.f32 %v2355_v13, %v2335_v47  ;;  %v3408_v13 = vld [vmem:[%s5853_s13 + $0x60] sm:$0xff] }
 0x2b4   : > { %v3400_v47 = vld [vmem:[%s5853_s13 + $0x20] sm:$0xff] }
 0x2bc   : > { %v2375_v7 = vpop.f32.mrf.mxu3 }
 0x2bd   : > { %v2376_v8 = vadd.f32 %v2375_v7, %v2356_v1 }
 0x2c9   : > { %v2395_v31 = vpop.f32.mrf.mxu0 }
 0x2ca   : > { %v2396_v4 = vadd.f32 %v2395_v31, %v2376_v8  ;;  %v3407_v8 = vld [vmem:[%s5853_s13 + $0x58] sm:$0xff] }
 0x2cb   : > { %v3399_v31 = vld [vmem:[%s5853_s13 + $0x18] sm:$0xff] }
 0x2cc   : > { %3213 = vmatmul.msk.f32.vlgmr.msra.gmra.mxu1 %vm1217_vm5, %v2396_v4 }
 0x2cd   : > { %2862 = vmatpush.bf16.msra.mxu1 %v3403_v49 }
 0x2d1   : > { %2863 = vmatpush.bf16.msra.mxu1 %v3402_v34 }
 0x2d5   : > { %2864 = vmatpush.bf16.msra.mxu1 %v3401_v28 }
 0x2d9   : > { %2865 = vmatpush.bf16.msra.mxu1 %v3400_v47 }
 0x2dd   : > { %2866 = vmatpush.bf16.msra.mxu1 %v3399_v31 }
 0x349   : > { %v2423_v51 = vpop.f32.mrf.mxu1 }
 0x34a   : > { %v2424_v11 = vadd.f32 %v2423_v51, %v2402_v38 }
 0x34c   : > { %v3214_v24 = vmul.f32 -1.442695, %v2424_v11 }
 0x34e   : > { %3552 = vpow2.f32 %v3214_v24 }
 0x354   : > { %v3553_v17 = vpop.eup %3552 }
 0x355   : > { %v2429_v3 = vadd.f32 1.0, %v3553_v17 }
 0x357   : > { %3554 = vrcp.f32 %v2429_v3  ;;  %v2441_v26 = vand.u32 2147483648, %v2429_v3  ;;  %v2439_v29 = vand.u32 2147483647, %v2429_v3  ;;  %vm2435_vm10 = vweird.f32 %v2429_v3 }
 0x359   : > { %v2442_v43 = vor.u32 1.1754944e-38, %v2441_v26  ;;  %vm2440_vm11 = vcmp.eq.f32.partialorder %v2439_v29, 8.507059e+37  ;;  %v3417_v26 = vld [vmem:[%s5853_s13 + $0xa8] sm:$0xff]  ;;  %v3415_v29 = vld [vmem:[%s5853_s13 + $0x98] sm:$0xff] }
 0x35d   : > { %v3555_v44 = vpop.eup %3554 }
 0x35e   : > { %v2431_v57 = vmul.f32 %v3555_v44, %v2429_v3  ;;  %vm2436_vm9 = vweird.f32 %v3555_v44  ;;  %v3419_v3 = vld [vmem:[%s5853_s13 + $0xb8] sm:$0xff] }
 0x35f   : > { %vm2437_vm15 = vmor %vm2435_vm10, %vm2436_vm9 }
 0x360   : > { %v2432_v30 = vsub.f32 1.0, %v2431_v57 }
 0x362   : > { %v2433_v39 = vmul.f32 %v3555_v44, %v2432_v30  ;;  %v3418_v30 = vld [vmem:[%s5853_s13 + $0xb0] sm:$0xff] }
 0x364   : > { %v2434_v0 = vadd.f32 %v3555_v44, %v2433_v39  ;;  %v3416_v39 = vld [vmem:[%s5853_s13 + $0xa0] sm:$0xff] }
 0x366   : > { %v2438_v27 = vsel %vm2437_vm15, %v3555_v44, %v2434_v0  ;;  %v3405_v0 = vld [vmem:[%s5853_s13 + $0x48] sm:$0xff] }
 0x367   : > { %v2443_v14 = vsel %vm2440_vm11, %v2442_v43, %v2438_v27  ;;  %v3398_v43 = vld [vmem:[%s5853_s13 + $0x10] sm:$0xff] }
 0x368   : > { %v2445_v59 = vmul.f32 %v2443_v14, %v2424_v11  ;;  %v3406_v11 = vld [vmem:[%s5853_s13 + $0x50] sm:$0xff]  ;;  %v3424_v14 = vld [vmem:[%s5853_s13 + $0xe0] sm:$0xff]  ;;  %2867 = vmatpush.bf16.msra.mxu1 %v3398_v43 }
 0x369   : > { %v3414_v27 = vld [vmem:[%s5853_s13 + $0x90] sm:$0xff]  ;;  %2907 = vmatpush.bf16.msrb.mxu0 %v3424_v14 }
 0x36a   : > { %3215 = vmatmul.msk.f32.vlgmr.msra.gmra.mxu2 %vm2448_vm13, %v2445_v59  ;;  %v3404_v59 = vld [vmem:[%s5853_s13 + $0x40] sm:$0xff] }
 0x36b   : > { %2876 = vmatpush.bf16.msra.mxu2 %v3411_v58 }
 0x36c   : > { %2868 = vmatpush.bf16.msra.mxu1 %v3397_v40 }
 0x36d   : > { %2908 = vmatpush.bf16.msrb.mxu0 %v3423_v21 }
 0x36f   : > { %2877 = vmatpush.bf16.msra.mxu2 %v3410_v12 }
 0x370   : > { %2869 = vmatpush.bf16.msra.mxu1 %v3396_v55 }
 0x371   : > { %2909 = vmatpush.bf16.msrb.mxu0 %v3422_v5 }
 0x373   : > { %2878 = vmatpush.bf16.msra.mxu2 %v3409_v52 }
 0x375   : > { %2910 = vmatpush.bf16.msrb.mxu0 %v3421_v50 }
 0x377   : > { %2879 = vmatpush.bf16.msra.mxu2 %v3408_v13  ;;  %v3478_v13 = vld [vmem:[%s5854_s14] ss:$0 sm:$0xff] }
 0x379   : > { %2911 = vmatpush.bf16.msrb.mxu0 %v3420_v36 }
 0x37b   : > { %2880 = vmatpush.bf16.msra.mxu2 %v3407_v8  ;;  %v520_v8 = vld [vmem:[%s3971_s28] sm:$0xff]   ;;  %s3575_s28 = sshra.s32 %s2954_s20, 4  ;;  %s3576_s28 = int_to_ptr.hbm [resolvable:$true] %s3575_s28 }
 0x37c   : > { %s3577_s26 = scalar_lea.hbm %s3576_s28, 8  ;;  %p3582_p0 = scmp.lt.s32.totalorder %s3576_s28, %s5856_s16 }
 0x37d   : > { %p3578_p11 = scmp.ne.s32.totalorder %s3576_s28, %s3577_s26  ;;  %p3583_p1 = scmp.lt.s32.totalorder %s3581_s24, %s3577_s26 }
 0x37f   : > { %2881 = vmatpush.bf16.msra.mxu2 %v3406_v11  ;;  %v2931_v11 = vunpack.c.h.bf16 %v520_v8  ;;  %p3579_p12 = pnand %p3578_p11, %p3753_p5  ;;  %p3584_p2 = por %p3583_p1, %p3582_p0 }
 0x381   : > { %p3580_p13 = pneg %p3579_p12 }
 0x383   : > { %2882 = vmatpush.bf16.msra.mxu2 %v3405_v0  ;;  %p3585_p3 = pnand %p3584_p2, %p3580_p13 }
 0x387   : > { %2883 = vmatpush.bf16.msra.mxu2 %v3404_v59 }
 0x3ed   : > { %v2469_v6 = vpop.f32.mrf.mxu2 }
 0x3ee   : > { %v2470_v2 = vadd.f32 %v2469_v6, %v2447_v22 }
 0x3f0   : > { %v3216_v25 = vmul.f32 -1.442695, %v2470_v2 }
 0x3f2   : > { %3556 = vpow2.f32 %v3216_v25 }
 0x3f8   : > { %v3557_v32 = vpop.eup %3556 }
 0x3f9   : > { %v2475_v54 = vadd.f32 1.0, %v3557_v32 }
 0x3fb   : > { %3558 = vrcp.f32 %v2475_v54  ;;  %v2487_v38 = vand.u32 2147483648, %v2475_v54  ;;  %v2485_v51 = vand.u32 2147483647, %v2475_v54  ;;  %vm2481_vm0 = vweird.f32 %v2475_v54 }
 0x3fd   : > { %v2488_v17 = vor.u32 1.1754944e-38, %v2487_v38  ;;  %vm2486_vm2 = vcmp.eq.f32.partialorder %v2485_v51, 8.507059e+37 }
 0x401   : > { %v3559_v7 = vpop.eup %3558 }
 0x402   : > { %v2477_v1 = vmul.f32 %v3559_v7, %v2475_v54  ;;  %vm2482_vm14 = vweird.f32 %v3559_v7 }
 0x403   : > { %vm2483_vm1 = vmor %vm2481_vm0, %vm2482_vm14 }
 0x404   : > { %v2478_v4 = vsub.f32 1.0, %v2477_v1 }
 0x406   : > { %v2479_v46 = vmul.f32 %v3559_v7, %v2478_v4 }
 0x408   : > { %v2480_v24 = vadd.f32 %v3559_v7, %v2479_v46  ;;  %v2930_v46 = vunpack.c.l.bf16 %v520_v8 }
 0x40a   : > { %v2484_v44 = vsel %vm2483_vm1, %v3559_v7, %v2480_v24  ;;  %v3479_v7 = vld [vmem:[%s5855_s15] ss:$0 sm:$0xff] }
 0x40b   : > { %v2489_v57 = vsel %vm2486_vm2, %v2488_v17, %v2484_v44 }
 0x40c   : > { %3217 = vmatmul.msk.f32.vlgmr.msra.gmra.mxu3 %vm1217_vm5, %v2489_v57  ;;  %3218 = vmatmul.msk.f32.vlgmr.msrb.gmra.mxu1 %vm1217_vm5, %v2489_v57 }
 0x40d   : > { %3219 = vmatmul.msk.f32.vlgmr.msrb.gmra.mxu2 %vm1217_vm5, %v2489_v57  ;;  %2890 = vmatpush.bf16.msra.mxu3 %v3419_v3 }
 0x411   : > { %2891 = vmatpush.bf16.msra.mxu3 %v3418_v30 }
 0x414   : > { %3220 = vmatmul.msk.f32.vlgmr.msrb.gmra.mxu3 %vm1217_vm5, %v2489_v57 }
 0x415   : > { %2892 = vmatpush.bf16.msra.mxu3 %v3417_v26 }
 0x419   : > { %2893 = vmatpush.bf16.msra.mxu3 %v3416_v39 }
 0x41d   : > { %2894 = vmatpush.bf16.msra.mxu3 %v3415_v29 }
 0x421   : > { %2895 = vmatpush.bf16.msra.mxu3 %v3414_v27 }
 0x425   : > { %2896 = vmatpush.bf16.msra.mxu3 %v3413_v23 }
 0x429   : > { %2897 = vmatpush.bf16.msra.mxu3 %v3412_v10 }
 0x489   : > { %v2547_v37 = vpop.f32.mrf.mxu1 }
 0x48a   : > { %v2591_v35 = vperm.slane %v2547_v37, 0 }
 0x48c   : > { %v2595_v33 = vmul.f32 %v2591_v35, %v5454_v60  ;;  %v2599_v42 = vmul.f32 %v2591_v35, %v5468_v62 }
 0x48e   : > { %v2603_v22 = vpack.c.bf16 %v2599_v42, %v2595_v33 }
 0x48f   : > { %v2527_v6 = vpop.f32.mrf.mxu3 }
 0x490   : > { %v2590_v56 = vperm.slane %v2527_v6, 0  ;;  %v2567_v63 = vpop.f32.mrf.mxu2  ;;  %2884 = vmatmul.bf16.vlgmr.msra.gmra.mxu2 %v2603_v22 }
 0x491   : > { %v2592_v2 = vperm.slane %v2567_v63, 0 }
 0x492   : > { %v2594_v16 = vmul.f32 %v2590_v56, %v5247_v48  ;;  %v2598_v25 = vmul.f32 %v2590_v56, %v5239_v19 }
 0x493   : > { %v2596_v45 = vmul.f32 %v2592_v2, %v5475_v61  ;;  %v2600_v58 = vmul.f32 %v2592_v2, %v5478_v20 }
 0x494   : > { %v2602_v49 = vpack.c.bf16 %v2598_v25, %v2594_v16 }
 0x495   : > { %v2604_v12 = vpack.c.bf16 %v2600_v58, %v2596_v45 }
 0x496   : > { %2870 = vmatmul.bf16.vlgmr.msra.gmra.mxu1 %v2602_v49 }
 0x497   : > { %2898 = vmatmul.bf16.vlgmr.msra.gmra.mxu3 %v2604_v12  ;;  %v2587_v60 = vpop.f32.mrf.mxu3 }
 0x498   : > { %v2593_v62 = vperm.slane %v2587_v60, 0 }
 0x49a   : > { %v2597_v34 = vmul.f32 %v2593_v62, %v5605_v9  ;;  %v2601_v53 = vmul.f32 %v2593_v62, %v5602_v41 }
 0x49c   : > { %v2605_v32 = vpack.c.bf16 %v2601_v53, %v2597_v34 }
 0x49e   : > { %2912 = vmatmul.bf16.vlgmr.msrb.gmra.mxu0 %v2605_v32 }
 0x513   : > { %v2871_v48 = vpop.f32.mrf.mxu1  ;;  %v2885_v54 = vpop.f32.mrf.mxu2 }
 0x514   : > { %v2886_v19 = vadd.f32 %v2885_v54, %v2871_v48 }
 0x51a   : > { %v2899_v61 = vpop.f32.mrf.mxu3 }
 0x51b   : > { %v2900_v20 = vadd.f32 %v2899_v61, %v2886_v19  ;;  %v2913_v18 = vpop.f32.mrf.mxu0  ;;  %v2873_v52 = vpop.f32.mrf.mxu1 }
 0x51c   : > { %v2887_v28 = vpop.f32.mrf.mxu2 }
 0x51d   : > { %v2914_v15 = vadd.f32 %v2913_v18, %v2900_v20  ;;  %v2888_v9 = vadd.f32 %v2887_v28, %v2873_v52 }
 0x51f   : > { %v2922_v47 = vmul.f32 %v3478_v13, %v2914_v15 }
 0x521   : > { %v2928_v38 = vadd.f32 %v3479_v7, %v2922_v47 }
 0x522   : > { %v2901_v41 = vpop.f32.mrf.mxu3 }
 0x523   : > { %v2902_v1 = vadd.f32 %v2901_v41, %v2888_v9  ;;  %v2915_v31 = vpop.f32.mrf.mxu0  ;;  %v2932_v17 = vadd.f32 %v2930_v46, %v2928_v38 }
 0x525   : > { %v2916_v4 = vadd.f32 %v2915_v31, %v2902_v1 }
 0x527   : > { %v2923_v51 = vmul.f32 %v3478_v13, %v2916_v4 }
 0x529   : > { %v2929_v24 = vadd.f32 %v3479_v7, %v2923_v51 }
 0x52b   : > { %v2933_v3 = vadd.f32 %v2931_v11, %v2929_v24 }
 0x52d   : > { %v3432_v44 = vpack.c.bf16 %v2933_v3, %v2932_v17 }
 0x52f   : > { %3433 = vst [vmem:[%s514_s29] sm:$0xff] %v3432_v44  }
 0x530   : > { %3588 = shalt.err (!%p3585_p3)
}
 0x531   : > { %s3629_s19 = smov 4  }
 0x532   : > { %3434 = dma.vmem_to_hbm [thread:$0]  (%p3753_p5), %s2952_s30, 128, %s2954_s20, %s2939_s25, %s3626_s27, %s3626_s27, %s3629_s19  }
 0x533 PF: > { %s6007_s29 = sld [smem:[#allocation8_spill]] }
 0x534   : > { %s6008_s1 = sld [smem:[#allocation6_spill]] }
 0x539   : > { %p3440_p4 = scmp.ge.s32.totalorder %s6007_s29, 2 }
 0x53a   : > { %s2968_s18 = sand.u32 1, %s6008_s1  }
 0x53b   : > { %p3437_p7 = pnand %p3440_p4, %p3757_p6  ;;  %s2969_s28 = scalar_lea.sflag [#allocation4], %s2968_s18 }
 0x53d   : > { %p3438_p8 = pneg %p3437_p7 }
 0x53f   : > { %3606 = dma.done.wait (%p3438_p8), %s2969_s28, 128  }
 0x540   : > { %3608 = vsyncadd (%p3438_p8), %s2969_s28, 4294967168  ;;  %s6010_s24 = sld [smem:[#allocation9_spill]]  ;;  %s6013_s21 = smov %s3615_s22 }
 0x541   : > { %s6011_s26 = sld [smem:[#allocation7_spill]] }
 0x542   : > { %s6012_s23 = sld [smem:[#allocation10_spill]] }
 0x546   : > { %p26_p9 = scmp.ge.s32.totalorder %s6010_s24, 4  }
 0x547   : > { %s6014_s22 = smov %s6011_s26 }
 0x548   :  { %28 = sbr.rel (!%p26_p9) target bundleno = 7 (0x7), region = 128 }
 0x54d   :  { %2975 = vsyncpa [#allocation4], 1 }
 0x54e   :  { %2977 = vsyncpa [#allocation4 + $0x1], 1 }

</bundles_post_ra>
